<compile_context>
chip_gen: v7x
topology: tpu7x:2x2x1
jax: 0.10.0
libtpu: 0.0.40
codegen_flags: <defaults>
</compile_context>

<pallas_src>
import jax
import jax.numpy as jnp
from jax.experimental import pallas as pl
from jax.experimental.pallas import tpu as pltpu

EPS = 1e-4


def _round_up(a: int, m: int) -> int:
    return ((a + m - 1) // m) * m


def _make_ffnet_kernel(num_layers: int):
    """Kernel factory: refs = (x, w0, b0, w1, b1, ..., w_{L-1}, b_{L-1}, g_out)."""

    def kernel(*refs):
        x_ref, g_ref = refs[0], refs[-1]
        x = x_ref[...].astype(jnp.float32)
        g_acc = jnp.zeros((x.shape[0], 1), jnp.float32)
        for layer in range(num_layers):
            w_ref = refs[1 + 2 * layer]
            b_ref = refs[2 + 2 * layer]
            # Row-wise L2 normalization: x / (||x|| + eps).  The reciprocal goes
            # to the EUP slot (otherwise idle), freeing VALU slots.
            norm = jnp.sqrt(jnp.sum(x * x, axis=1, keepdims=True))
            x_dir = x * pl.reciprocal(norm + EPS, approx=True)
            # Linear: x_dir @ W^T with W kept as (D_out, D_in) -- contract dim 1
            # of both operands on the MXU (no wrapper-side transpose / HBM copy).
            # Matmul operands take the weight dtype (bf16 on the fast path),
            # accumulation stays f32.
            z = jax.lax.dot_general(
                x_dir.astype(w_ref.dtype), w_ref[...],
                dimension_numbers=(((1,), (1,)), ((), ())),
                preferred_element_type=jnp.float32,
            )
            z = jnp.maximum(z + b_ref[...], 0.0)
            # Goodness: per-sample mean of squared activations.
            g_acc = g_acc + jnp.mean(z * z, axis=1, keepdims=True)
            x = z
        g_ref[...] = g_acc

    return kernel


def prepare_params(params, matmul_dtype=jnp.bfloat16):
    """One-time preprocessing OUTSIDE the hot path.

    Casts weights to the matmul dtype (bf16 halves weight HBM/VMEM traffic on
    v6e/v7x and roughly doubles MXU throughput) and reshapes biases to
    (1, D_out) for a cheap sublane-broadcast add.  No transpose: the kernel
    contracts dim 1 of both operands.
    """
    prepared = []
    for w, b in params:
        w = jnp.asarray(w).astype(matmul_dtype)          # (D_out, D_in)
        b = jnp.asarray(b, jnp.float32).reshape(1, -1)   # (1, D_out)
        prepared.append((w, b))
    return prepared


def ffnet_forward(x, prepared_params, *, block_rows=256):
    """x: (B, D_in) f32.  prepared_params: list of (W (D_out, D_in), b (1, D_out))."""
    B, D_in = x.shape
    L = len(prepared_params)
    assert L >= 1, "FFNet has to have at least one layer!"

    # Batch tiling: TB rows per grid step, pad B up to a multiple of TB.
    TB = min(block_rows, _round_up(B, 8))
    B_pad = _round_up(B, TB)
    if B_pad != B:
        x = jnp.pad(x, ((0, B_pad - B), (0, 0)))
    grid = (B_pad // TB,)

    flat_args = [x]
    in_specs = [pl.BlockSpec((TB, D_in), lambda i: (i, 0))]

    flops = 0
    bytes_accessed = x.size * x.dtype.itemsize + B_pad * 4
    w_bytes = 0
    max_dim = D_in
    for (w, b) in prepared_params:
        d_out, d_in = w.shape
        flat_args += [w, b]
        # Constant index_map: same block every grid step -> fetched once, stays
        # VMEM-resident across all batch tiles.  For very large layers on v7x
        # (64 MiB VMEM) add pipeline_mode=pl.Buffered(1) here to single-buffer
        # the weights.
        in_specs += [
            pl.BlockSpec(w.shape, lambda i: (0, 0)),
            pl.BlockSpec(b.shape, lambda i: (0, 0)),
        ]
        flops += 2 * B_pad * d_in * d_out + 6 * B_pad * d_out
        w_bytes += w.size * w.dtype.itemsize + b.size * b.dtype.itemsize
        max_dim = max(max_dim, d_out)
    bytes_accessed += w_bytes

    # Explicit VMEM budget: resident weights/biases (x2 for pipeline buffers),
    # double-buffered x and output tiles, plus f32 activation working set.
    vmem_est = (2 * w_bytes + 2 * TB * D_in * 4 + 2 * TB * 4 + 4 * TB * max_dim * 4)
    vmem_limit = int(min(max(vmem_est, 32 * 1024 * 1024), 56 * 1024 * 1024))

    out = pl.pallas_call(
        _make_ffnet_kernel(L),
        out_shape=jax.ShapeDtypeStruct((B_pad, 1), jnp.float32),
        grid=grid,
        in_specs=in_specs,
        out_specs=pl.BlockSpec((TB, 1), lambda i: (i, 0)),
        compiler_params=pltpu.CompilerParams(
            dimension_semantics=("parallel",),   # shard batch tiles across TCs (v7x)
            vmem_limit_bytes=vmem_limit,
        ),
        cost_estimate=pl.CostEstimate(
            flops=int(flops),
            transcendentals=int(2 * B_pad * L),   # sqrt + reciprocal per row per layer
            bytes_accessed=int(bytes_accessed),
        ),
    )(*flat_args)
    return out[:B, 0]   # (B,) -- matches torch.sum(torch.stack(g), dim=0)


def ffnet_reference(x, params):
    """Pure-JAX reference mirroring FFNet.forward / FFLinear.goodness (all f32)."""
    g_sum = jnp.zeros((x.shape[0],), jnp.float32)
    for (w, b) in params:
        norm = jnp.sqrt(jnp.sum(x * x, axis=1, keepdims=True))
        x_dir = x / (norm + EPS)
        z = jnp.maximum(x_dir @ w.T + b, 0.0)
        g_sum = g_sum + jnp.mean(z * z, axis=1)
        x = z
    return g_sum


def init_linear(key, out_features, in_features):
    """Deterministic nn.Linear-style init (uniform +- 1/sqrt(fan_in))."""
    kw, kb = jax.random.split(key)
    bound = 1.0 / jnp.sqrt(jnp.float32(in_features))
    w = jax.random.uniform(kw, (out_features, in_features), jnp.float32, -bound, bound)
    b = jax.random.uniform(kb, (out_features,), jnp.float32, -bound, bound)
    return w, b


if __name__ == "__main__":
    key = jax.random.PRNGKey(0)
    k_x, k0, k1, k2 = jax.random.split(key, 4)

    # Lane/MXU-aligned demo sizes: batch 512 (-> 2 grid steps of 256 rows),
    # features 128 -> 256 -> 256 -> 128 (multiples of the 128-lane vreg width).
    B, D_IN = 512, 128
    dims = [(256, 128), (256, 256), (128, 256)]   # (out_features, in_features)

    x = jax.random.normal(k_x, (B, D_IN), jnp.float32)
    params = [init_linear(k, o, i) for k, (o, i) in zip((k0, k1, k2), dims)]
    g_ref = ffnet_reference(x, params)

    # f32 matmul path: strict check (only the EUP approx-reciprocal differs).
    p32 = prepare_params(params, matmul_dtype=jnp.float32)
    g32 = jax.block_until_ready(ffnet_forward(x, p32))
    assert g32.shape == (B,)
    assert jnp.allclose(g32, g_ref, rtol=5e-3, atol=1e-3), (g32[:4], g_ref[:4])

    # bf16 matmul path (v6e/v7x fast path; f32 accumulate + f32 vector math).
    pbf = prepare_params(params, matmul_dtype=jnp.bfloat16)
    gbf = jax.block_until_ready(ffnet_forward(x, pbf))
    assert gbf.shape == (B,)
    assert jnp.allclose(gbf, g_ref, rtol=5e-2, atol=5e-3), (gbf[:4], g_ref[:4])

    print("KERNEL_OK")
</pallas_src>

<mosaic_0001>
module attributes {stable_mosaic.version = 11 : i64} {
  func.func @kernel(%arg0: i32, %arg1: memref<256x128xf32, #tpu.memory_space<vmem>>, %arg2: memref<256x128xf32, #tpu.memory_space<vmem>>, %arg3: memref<1x256xf32, #tpu.memory_space<vmem>>, %arg4: memref<256x256xf32, #tpu.memory_space<vmem>>, %arg5: memref<1x256xf32, #tpu.memory_space<vmem>>, %arg6: memref<128x256xf32, #tpu.memory_space<vmem>>, %arg7: memref<1x128xf32, #tpu.memory_space<vmem>>, %arg8: memref<256x1xf32, #tpu.memory_space<vmem>>) attributes {dimension_semantics = [#tpu.dimension_semantics<parallel>], iteration_bounds = array<i64: 2>, scalar_prefetch = 0 : i64, scratch_operands = 0 : i64, tpu.core_type = #tpu.core_type<tc>, window_params = [{transform_indices = @transform_0, window_bounds = array<i64: 256, 128>}, {pipeline_mode = #tpu.pipeline_mode<synchronous>, transform_indices = @transform_1, window_bounds = array<i64: 256, 128>}, {pipeline_mode = #tpu.pipeline_mode<synchronous>, transform_indices = @transform_2, window_bounds = array<i64: 1, 256>}, {pipeline_mode = #tpu.pipeline_mode<synchronous>, transform_indices = @transform_3, window_bounds = array<i64: 256, 256>}, {pipeline_mode = #tpu.pipeline_mode<synchronous>, transform_indices = @transform_4, window_bounds = array<i64: 1, 256>}, {pipeline_mode = #tpu.pipeline_mode<synchronous>, transform_indices = @transform_5, window_bounds = array<i64: 128, 256>}, {pipeline_mode = #tpu.pipeline_mode<synchronous>, transform_indices = @transform_6, window_bounds = array<i64: 1, 128>}, {transform_indices = @transform_7, window_bounds = array<i64: 256, 1>}]} {
    %c0 = arith.constant 0 : index
    %c0_0 = arith.constant 0 : index
    %0 = vector.load %arg1[%c0, %c0_0] : memref<256x128xf32, #tpu.memory_space<vmem>>, vector<256x128xf32>
    %cst = arith.constant 0.000000e+00 : f32
    %1 = vector.broadcast %cst : f32 to vector<256x1xf32>
    %2 = arith.mulf %0, %0 : vector<256x128xf32>
    %cst_1 = arith.constant dense<0.000000e+00> : vector<256xf32>
    %3 = vector.multi_reduction <add>, %2, %cst_1 [1] : vector<256x128xf32> to vector<256xf32>
    %4 = vector.shape_cast %3 : vector<256xf32> to vector<256x1xf32>
    %5 = math.sqrt %4 : vector<256x1xf32>
    %cst_2 = arith.constant 9.99999974E-5 : f32
    %6 = vector.broadcast %cst_2 : f32 to vector<256x1xf32>
    %7 = arith.addf %5, %6 : vector<256x1xf32>
    %8 = tpu.reciprocal %7 {approx = true} : vector<256x1xf32> -> vector<256x1xf32>
    %9 = vector.broadcast %8 : vector<256x1xf32> to vector<256x128xf32>
    %10 = arith.mulf %0, %9 : vector<256x128xf32>
    %c0_3 = arith.constant 0 : index
    %c0_4 = arith.constant 0 : index
    %11 = vector.load %arg2[%c0_3, %c0_4] : memref<256x128xf32, #tpu.memory_space<vmem>>, vector<256x128xf32>
    %cst_5 = arith.constant dense<0.000000e+00> : vector<256x256xf32>
    %12 = tpu.matmul %10, %11, %cst_5 {dimension_numbers = #tpu.dot_dimension_numbers<[1], [1], [0], [0], [0, 0, 1, 0], [], []>} : vector<256x128xf32>, vector<256x128xf32>, vector<256x256xf32> -> vector<256x256xf32>
    %c0_6 = arith.constant 0 : index
    %c0_7 = arith.constant 0 : index
    %13 = vector.load %arg3[%c0_6, %c0_7] : memref<1x256xf32, #tpu.memory_space<vmem>>, vector<1x256xf32>
    %14 = vector.broadcast %13 : vector<1x256xf32> to vector<256x256xf32>
    %15 = arith.addf %12, %14 : vector<256x256xf32>
    %cst_8 = arith.constant 0.000000e+00 : f32
    %16 = vector.broadcast %cst_8 : f32 to vector<256x256xf32>
    %17 = arith.maximumf %15, %16 : vector<256x256xf32>
    %18 = arith.mulf %17, %17 : vector<256x256xf32>
    %cst_9 = arith.constant dense<0.000000e+00> : vector<256xf32>
    %19 = vector.multi_reduction <add>, %18, %cst_9 [1] : vector<256x256xf32> to vector<256xf32>
    %20 = vector.shape_cast %19 : vector<256xf32> to vector<256x1xf32>
    %cst_10 = arith.constant 2.560000e+02 : f32
    %21 = vector.broadcast %cst_10 : f32 to vector<256x1xf32>
    %22 = arith.divf %20, %21 : vector<256x1xf32>
    %23 = arith.addf %1, %22 : vector<256x1xf32>
    %24 = arith.mulf %17, %17 : vector<256x256xf32>
    %cst_11 = arith.constant dense<0.000000e+00> : vector<256xf32>
    %25 = vector.multi_reduction <add>, %24, %cst_11 [1] : vector<256x256xf32> to vector<256xf32>
    %26 = vector.shape_cast %25 : vector<256xf32> to vector<256x1xf32>
    %27 = math.sqrt %26 : vector<256x1xf32>
    %cst_12 = arith.constant 9.99999974E-5 : f32
    %28 = vector.broadcast %cst_12 : f32 to vector<256x1xf32>
    %29 = arith.addf %27, %28 : vector<256x1xf32>
    %30 = tpu.reciprocal %29 {approx = true} : vector<256x1xf32> -> vector<256x1xf32>
    %31 = vector.broadcast %30 : vector<256x1xf32> to vector<256x256xf32>
    %32 = arith.mulf %17, %31 : vector<256x256xf32>
    %c0_13 = arith.constant 0 : index
    %c0_14 = arith.constant 0 : index
    %33 = vector.load %arg4[%c0_13, %c0_14] : memref<256x256xf32, #tpu.memory_space<vmem>>, vector<256x256xf32>
    %cst_15 = arith.constant dense<0.000000e+00> : vector<256x256xf32>
    %34 = tpu.matmul %32, %33, %cst_15 {dimension_numbers = #tpu.dot_dimension_numbers<[1], [1], [0], [0], [0, 0, 1, 0], [], []>} : vector<256x256xf32>, vector<256x256xf32>, vector<256x256xf32> -> vector<256x256xf32>
    %c0_16 = arith.constant 0 : index
    %c0_17 = arith.constant 0 : index
    %35 = vector.load %arg5[%c0_16, %c0_17] : memref<1x256xf32, #tpu.memory_space<vmem>>, vector<1x256xf32>
    %36 = vector.broadcast %35 : vector<1x256xf32> to vector<256x256xf32>
    %37 = arith.addf %34, %36 : vector<256x256xf32>
    %cst_18 = arith.constant 0.000000e+00 : f32
    %38 = vector.broadcast %cst_18 : f32 to vector<256x256xf32>
    %39 = arith.maximumf %37, %38 : vector<256x256xf32>
    %40 = arith.mulf %39, %39 : vector<256x256xf32>
    %cst_19 = arith.constant dense<0.000000e+00> : vector<256xf32>
    %41 = vector.multi_reduction <add>, %40, %cst_19 [1] : vector<256x256xf32> to vector<256xf32>
    %42 = vector.shape_cast %41 : vector<256xf32> to vector<256x1xf32>
    %cst_20 = arith.constant 2.560000e+02 : f32
    %43 = vector.broadcast %cst_20 : f32 to vector<256x1xf32>
    %44 = arith.divf %42, %43 : vector<256x1xf32>
    %45 = arith.addf %23, %44 : vector<256x1xf32>
    %46 = arith.mulf %39, %39 : vector<256x256xf32>
    %cst_21 = arith.constant dense<0.000000e+00> : vector<256xf32>
    %47 = vector.multi_reduction <add>, %46, %cst_21 [1] : vector<256x256xf32> to vector<256xf32>
    %48 = vector.shape_cast %47 : vector<256xf32> to vector<256x1xf32>
    %49 = math.sqrt %48 : vector<256x1xf32>
    %cst_22 = arith.constant 9.99999974E-5 : f32
    %50 = vector.broadcast %cst_22 : f32 to vector<256x1xf32>
    %51 = arith.addf %49, %50 : vector<256x1xf32>
    %52 = tpu.reciprocal %51 {approx = true} : vector<256x1xf32> -> vector<256x1xf32>
    %53 = vector.broadcast %52 : vector<256x1xf32> to vector<256x256xf32>
    %54 = arith.mulf %39, %53 : vector<256x256xf32>
    %c0_23 = arith.constant 0 : index
    %c0_24 = arith.constant 0 : index
    %55 = vector.load %arg6[%c0_23, %c0_24] : memref<128x256xf32, #tpu.memory_space<vmem>>, vector<128x256xf32>
    %cst_25 = arith.constant dense<0.000000e+00> : vector<256x128xf32>
    %56 = tpu.matmul %54, %55, %cst_25 {dimension_numbers = #tpu.dot_dimension_numbers<[1], [1], [0], [0], [0, 0, 1, 0], [], []>} : vector<256x256xf32>, vector<128x256xf32>, vector<256x128xf32> -> vector<256x128xf32>
    %c0_26 = arith.constant 0 : index
    %c0_27 = arith.constant 0 : index
    %57 = vector.load %arg7[%c0_26, %c0_27] : memref<1x128xf32, #tpu.memory_space<vmem>>, vector<1x128xf32>
    %58 = vector.broadcast %57 : vector<1x128xf32> to vector<256x128xf32>
    %59 = arith.addf %56, %58 : vector<256x128xf32>
    %cst_28 = arith.constant 0.000000e+00 : f32
    %60 = vector.broadcast %cst_28 : f32 to vector<256x128xf32>
    %61 = arith.maximumf %59, %60 : vector<256x128xf32>
    %62 = arith.mulf %61, %61 : vector<256x128xf32>
    %cst_29 = arith.constant dense<0.000000e+00> : vector<256xf32>
    %63 = vector.multi_reduction <add>, %62, %cst_29 [1] : vector<256x128xf32> to vector<256xf32>
    %64 = vector.shape_cast %63 : vector<256xf32> to vector<256x1xf32>
    %cst_30 = arith.constant 1.280000e+02 : f32
    %65 = vector.broadcast %cst_30 : f32 to vector<256x1xf32>
    %66 = arith.divf %64, %65 : vector<256x1xf32>
    %67 = arith.addf %45, %66 : vector<256x1xf32>
    %c0_31 = arith.constant 0 : index
    %c0_32 = arith.constant 0 : index
    %68 = vector.load %arg8[%c0_31, %c0_32] : memref<256x1xf32, #tpu.memory_space<vmem>>, vector<256x1xf32>
    tpu.vector_store %arg8[%c0_31, %c0_32], %67 {strides = array<i32>} : memref<256x1xf32, #tpu.memory_space<vmem>>, vector<256x1xf32>,
    return
  }
  func.func @transform_0(%arg0: i32) -> (i32, i32) {
    %c0_i32 = arith.constant 0 : i32
    %c0_i32_0 = arith.constant 0 : i32
    return %arg0, %c0_i32 : i32, i32
  }
  func.func @transform_1(%arg0: i32) -> (i32, i32) {
    %c0_i32 = arith.constant 0 : i32
    %c0_i32_0 = arith.constant 0 : i32
    %c0_i32_1 = arith.constant 0 : i32
    return %c0_i32, %c0_i32_0 : i32, i32
  }
  func.func @transform_2(%arg0: i32) -> (i32, i32) {
    %c0_i32 = arith.constant 0 : i32
    %c0_i32_0 = arith.constant 0 : i32
    %c0_i32_1 = arith.constant 0 : i32
    return %c0_i32, %c0_i32_0 : i32, i32
  }
  func.func @transform_3(%arg0: i32) -> (i32, i32) {
    %c0_i32 = arith.constant 0 : i32
    %c0_i32_0 = arith.constant 0 : i32
    %c0_i32_1 = arith.constant 0 : i32
    return %c0_i32, %c0_i32_0 : i32, i32
  }
  func.func @transform_4(%arg0: i32) -> (i32, i32) {
    %c0_i32 = arith.constant 0 : i32
    %c0_i32_0 = arith.constant 0 : i32
    %c0_i32_1 = arith.constant 0 : i32
    return %c0_i32, %c0_i32_0 : i32, i32
  }
  func.func @transform_5(%arg0: i32) -> (i32, i32) {
    %c0_i32 = arith.constant 0 : i32
    %c0_i32_0 = arith.constant 0 : i32
    %c0_i32_1 = arith.constant 0 : i32
    return %c0_i32, %c0_i32_0 : i32, i32
  }
  func.func @transform_6(%arg0: i32) -> (i32, i32) {
    %c0_i32 = arith.constant 0 : i32
    %c0_i32_0 = arith.constant 0 : i32
    %c0_i32_1 = arith.constant 0 : i32
    return %c0_i32, %c0_i32_0 : i32, i32
  }
  func.func @transform_7(%arg0: i32) -> (i32, i32) {
    %c0_i32 = arith.constant 0 : i32
    %c0_i32_0 = arith.constant 0 : i32
    return %arg0, %c0_i32 : i32, i32
  }
}

</mosaic_0001>

<bundles_post_ra>
// kernel: tpu_custom_call.1
= control target key start
LH: loop header
LB: loop body
LE: loop exit
PB: predicated region body
PF: predicated region fallthrough
CT: control target
= control target key end

     0   :  { %12 = vsyncpa [#allocation3], 0  ;;  %s6341_s0 = inlined_call_operand.hbm [shape: f32[512,128], index: 0, kind: input, shape index: {}]   ;;  %s6342_s1 = inlined_call_operand.hbm [shape: f32[256,128], index: 1, kind: input, shape index: {}]   ;;  %s6343_s2 = inlined_call_operand.vmem [shape: f32[1,256], index: 2, kind: input, shape index: {}]   ;;  %s6344_s3 = inlined_call_operand.hbm [shape: f32[256,256], index: 3, kind: input, shape index: {}]   ;;  %s6345_s4 = inlined_call_operand.vmem [shape: f32[1,256], index: 4, kind: input, shape index: {}]   ;;  %s6346_s5 = inlined_call_operand.hbm [shape: f32[128,256], index: 5, kind: input, shape index: {}]   ;;  %s6347_s6 = inlined_call_operand.vmem [shape: f32[1,128], index: 6, kind: input, shape index: {}]   ;;  %s6348_s7 = inlined_call_operand.vmem [shape: f32[512,1], index: 7, kind: output, shape index: {}]  }
   0x1   :  { %14 = vsyncpa [#allocation3 + $0x1], 0 }
   0x2   :  { %15 = vsyncpa [#allocation5], 0 }
   0x3   :  { %16 = vsyncpa [#allocation8], 0  ;;  %s4219_s24 = smov 0   ;;  %s4221_s25 = smov 0  }
   0x4   :  { %s4223_s26 = smov 0   ;;  %s4225_s27 = smov 0  }
   0x5 LB: > { %s6353_s28 = sadd.s32 4294967295, %s4169_s27   ;;  %p42_p0 = scmp.ne.s32.totalorder %s4161_s25, %s4157_s24  ;;  %s4169_s27 = sphi %s4225_s27, %s6598_s27   ;;  %s4165_s26 = sphi %s4223_s26, %s6597_s26   ;;  %s4161_s25 = sphi %s4221_s25, %s6596_s25   ;;  %s4157_s24 = sphi %s4219_s24, %s6595_s24  }
   0x6   : > { %p4241_p1 = scmp.eq.s32.totalorder %s6353_s28, 0  ;;  %p3296_p2 = scmp.ge.s32.totalorder %s4169_s27, 1 }
   0x7   : > { %p205_p3 = scmp.lt.s32.totalorder %s4169_s27, 3  ;;  %s4171_s9 = smov [#allocation4]  }
   0x8   : > { %s6431_s29 = scalar_select %p4241_p1, 1, 0 }
   0x9   : > { %p4249_p4 = por %p4241_p1, %p42_p0  ;;  %p4253_p5 = pnand %p3296_p2, %p205_p3 }
   0xa   : > { %s217_s10 = sshll.u32 %s4171_s9, 4  ;;  %s4172_s12 = smov [#allocation6]   ;;  %s218_s10 = int_to_ptr.vmem [resolvable:$true] %s217_s10 }
   0xb   : > { %s6432_s30 = scalar_select %p4249_p4, 1, 0 }
   0xc   : > { %s6433_s8 = scalar_select %p4253_p5, 1, 0 }
   0xd   : > { %p3569_p6 = pneg %p4253_p5  ;;  %s233_s13 = sshll.u32 %s4172_s12, 4  ;;  %s4265_s13 = int_to_ptr.vmem [resolvable:$true] %s233_s13 }
   0xe   : > { %s4013_s16 = scalar_lea.hbm %s6342_s1, 4096 }
   0xf   : > { %p4261_p7 = pnand %p3569_p6, %p4241_p1  ;;  %p4014_p8 = scmp.ne.s32.totalorder %s6342_s1, %s4013_s16 }
  0x10   : > { %p4020_p12 = scmp.lt.u32.totalorder %s4013_s16, %s6342_s1 }
  0x11   : > { %p4275_p9 = pneg %p4261_p7 }
  0x13   : > { %p4016_p10 = pnand %p4275_p9, %p4014_p8 }
  0x15   : > { %p4017_p11 = pneg %p4016_p10 }
  0x17   : > { %p4022_p13 = pnand %p4020_p12, %p4017_p11 }
  0x19   : > { %4025 = shalt.err (!%p4022_p13)
}
  0x1a   : > { %s4026_s22 = scalar_lea.vmem %s218_s10, 4096  ;;  %p4034_p6 = scmp.lt.s32.totalorder %s218_s10, %s218_s10 }
  0x1b   : > { %p4027_p0 = scmp.ne.s32.totalorder %s218_s10, %s4026_s22  ;;  %p4035_p1 = scmp.lt.s32.totalorder %s4026_s22, %s4026_s22 }
  0x1d   : > { %p4029_p2 = pnand %p4027_p0, %p4275_p9  ;;  %p4036_p4 = por %p4035_p1, %p4034_p6 }
  0x1f   : > { %p4030_p3 = pneg %p4029_p2 }
  0x21   : > { %p4037_p5 = pnand %p4036_p4, %p4030_p3 }
  0x23   : > { %4040 = shalt.err (!%p4037_p5)
}
  0x24   : > { %s6354_s23 = smov 128   ;;  %s6355_s24 = smov 8  }
  0x25   : > { %3572 = dma.hbm_to_vmem [thread:$0]  (!%p4261_p7), %s6342_s1, 4096, %s218_s10, [#allocation5], %s6354_s23, %s6354_s23, %s6355_s24  }
  0x26   : > { %s4041_s16 = scalar_lea.hbm %s6344_s3, 8192 }
  0x27   : > { %p4042_p1 = scmp.ne.s32.totalorder %s6344_s3, %s4041_s16  ;;  %p4048_p8 = scmp.lt.u32.totalorder %s4041_s16, %s6344_s3 }
  0x29   : > { %p4044_p4 = pnand %p4042_p1, %p4275_p9 }
  0x2b   : > { %p4045_p5 = pneg %p4044_p4 }
  0x2d   : > { %p4050_p10 = pnand %p4048_p8, %p4045_p5 }
  0x2f   : > { %4053 = shalt.err (!%p4050_p10)
}
  0x30   : > { %s4054_s10 = scalar_lea.vmem %s4265_s13, 8192  ;;  %p4062_p0 = scmp.lt.s32.totalorder %s4265_s13, %s4265_s13 }
  0x31   : > { %p4055_p11 = scmp.ne.s32.totalorder %s4265_s13, %s4054_s10  ;;  %p4063_p2 = scmp.lt.s32.totalorder %s4054_s10, %s4054_s10 }
  0x33   : > { %p4057_p12 = pnand %p4055_p11, %p4275_p9  ;;  %p4064_p3 = por %p4063_p2, %p4062_p0 }
  0x35   : > { %p4058_p13 = pneg %p4057_p12 }
  0x37   : > { %p4065_p6 = pnand %p4064_p3, %p4058_p13 }
  0x39   : > { %4068 = shalt.err (!%p4065_p6)
}
  0x3a   : > { %s4175_s22 = smov 256   ;;  %s4176_s9 = smov 16  }
  0x3b   : > { %3575 = dma.hbm_to_vmem [thread:$0]  (!%p4261_p7), %s6344_s3, 8192, %s4265_s13, [#allocation5], %s4175_s22, %s4175_s22, %s4176_s9  }
  0x3c   : > { %s4177_s15 = smov [#allocation7]   ;;  %s4318_s17 = sadd.s32 1, %s4169_s27  }
  0x3d   : > { %s249_s16 = sshll.u32 %s4177_s15, 4  ;;  %s4069_s21 = scalar_lea.hbm %s6346_s5, 4096  ;;  %s250_s16 = int_to_ptr.vmem [resolvable:$true] %s249_s16 }
  0x3e   : > { %p4070_p1 = scmp.ne.s32.totalorder %s6346_s5, %s4069_s21  ;;  %p4076_p8 = scmp.lt.u32.totalorder %s4069_s21, %s6346_s5 }
  0x40   : > { %p4072_p4 = pnand %p4070_p1, %p4275_p9 }
  0x42   : > { %p4073_p5 = pneg %p4072_p4 }
  0x44   : > { %p4078_p10 = pnand %p4076_p8, %p4073_p5 }
  0x46   : > { %4081 = shalt.err (!%p4078_p10)
}
  0x47   : > { %s4082_s13 = scalar_lea.vmem %s250_s16, 4096  ;;  %p4090_p0 = scmp.lt.s32.totalorder %s250_s16, %s250_s16 }
  0x48   : > { %p4083_p11 = scmp.ne.s32.totalorder %s250_s16, %s4082_s13  ;;  %p4091_p2 = scmp.lt.s32.totalorder %s4082_s13, %s4082_s13 }
  0x4a   : > { %p4085_p12 = pnand %p4083_p11, %p4275_p9  ;;  %p4092_p3 = por %p4091_p2, %p4090_p0 }
  0x4c   : > { %p4086_p13 = pneg %p4085_p12 }
  0x4e   : > { %p4093_p6 = pnand %p4092_p3, %p4086_p13 }
  0x50   : > { %4096 = shalt.err (!%p4093_p6)
}
  0x51   : > { %3578 = dma.hbm_to_vmem [thread:$0]  (!%p4261_p7), %s6346_s5, 4096, %s250_s16, [#allocation8], %s4175_s22, %s4175_s22, %s4176_s9  }
  0x52   : > { %s26_s19 = ssub.s32 %s4169_s27, %s4318_s17  ;;  %s29_s23 = sadd.s32 1, %s4165_s26 }
  0x53   : > { %p27_p9 = scmp.eq.s32.totalorder %s26_s19, 0  ;;  %p36_p1 = scmp.ne.s32.totalorder %s4165_s26, %s4161_s25 }
  0x54   : > { %p37_p4 = scmp.eq.s32.totalorder %s4169_s27, 0  ;;  %p3586_p5 = scmp.lt.s32.totalorder %s4169_s27, 2 }
  0x55   : > { %s4346_s11 = scalar_select %p27_p9, %s4165_s26, %s29_s23  }
  0x56   : > { %p38_p8 = por %p37_p4, %p36_p1  ;;  %s266_s24 = sand.u32 1, %s4165_s26  }
  0x57   : > { %s3301_s14 = sshll.u32 %s266_s24, 8  ;;  %s3314_s15 = sshll.u32 %s4169_s27, 12 }
  0x58   : > { %s4353_s21 = scalar_lea.hbm %s6341_s0, %s3314_s15  ;;  %s270_s22 = scalar_lea.vmem [#allocation2], %s3301_s14 }
  0x59   : > { %s277_s9 = sshll.u32 %s270_s22, 4  ;;  %p4357_p7 = pnand %p3586_p5, %p38_p8  ;;  %s4355_s9 = int_to_ptr.vmem [resolvable:$true] %s277_s9 }
  0x5a   : > { %s4361_s10 = scalar_lea.sflag [#allocation3], %s266_s24  ;;  %s4097_s13 = scalar_lea.hbm %s4353_s21, 4096 }
  0x5b   : > { %p4098_p10 = scmp.ne.s32.totalorder %s4353_s21, %s4097_s13  ;;  %p4099_p11 = pneg %p4357_p7 }
  0x5c   : > { %s4102_s19 = scalar_lea.hbm %s6341_s0, 8192  ;;  %p4103_p0 = scmp.lt.u32.totalorder %s4353_s21, %s6341_s0 }
  0x5d   : > { %p4100_p12 = pnand %p4099_p11, %p4098_p10  ;;  %p4104_p2 = scmp.lt.u32.totalorder %s4102_s19, %s4097_s13 }
  0x5e   : > { %p4106_p6 = scmp.lt.u32.totalorder %s4097_s13, %s4353_s21 }
  0x5f   : > { %p4101_p13 = pneg %p4100_p12  ;;  %p4105_p3 = por %p4104_p2, %p4103_p0 }
  0x61   : > { %p4107_p9 = por %p4106_p6, %p4105_p3 }
  0x63   : > { %p4108_p1 = pnand %p4107_p9, %p4101_p13 }
  0x65   : > { %4111 = shalt.err (!%p4108_p1)
}
  0x66   : > { %s4112_s24 = scalar_lea.vmem %s4355_s9, 4096  ;;  %s4178_s15 = smov [#allocation2]  }
  0x67   : > { %p4113_p4 = scmp.ne.s32.totalorder %s4355_s9, %s4112_s24  ;;  %s4117_s18 = sshll.u32 %s4178_s15, 4  ;;  %s4118_s18 = int_to_ptr.vmem [resolvable:$false] %s4117_s18 }
  0x68   : > { %s4119_s20 = scalar_lea.vmem %s4118_s18, 8192  ;;  %p4120_p10 = scmp.lt.s32.totalorder %s4355_s9, %s4118_s18 }
  0x69   : > { %p4115_p5 = pnand %p4113_p4, %p4099_p11  ;;  %p4121_p12 = scmp.lt.s32.totalorder %s4119_s20, %s4112_s24 }
  0x6b   : > { %p4116_p8 = pneg %p4115_p5  ;;  %p4122_p0 = por %p4121_p12, %p4120_p10 }
  0x6d   : > { %p4123_p2 = pnand %p4122_p0, %p4116_p8 }
  0x6f   : > { %4126 = shalt.err (!%p4123_p2)
}
  0x70   : > { %s6437_s22 = smov 8   ;;  %s6438_s13 = smov 128  }
  0x71   : > { %3582 = dma.hbm_to_vmem [thread:$0]  (!%p4357_p7), %s4353_s21, 4096, %s4355_s9, %s4361_s10, %s6438_s13, %s6438_s13, %s6437_s22  }
  0x72   : > { %p6439_p11 = scmp.ne.s32.totalorder %s6433_s8, 0 }
  0x74   : > { %289 = sbr.rel (%p6439_p11) target bundleno = 1586 (0x632), region = 48 }
  0x7b   : > { %s291_s28 = sand.u32 1, %s4161_s25   ;;  %p6440_p13 = scmp.ne.s32.totalorder %s6432_s30, 0 }
  0x7c   : > { %s3305_s12 = sshll.u32 %s291_s28, 8  ;;  %s292_s19 = scalar_lea.sflag [#allocation3], %s291_s28 }
  0x7d   : > { %s4395_s23 = scalar_lea.vmem [#allocation2], %s3305_s12 }
  0x7e   : > { %4144 = dma.done.wait (%p6440_p13), %s292_s19, 4096  }
  0x7f   : > { %4146 = vsyncadd (%p6440_p13), %s292_s19, 4294963200  ;;  %p6441_p3 = scmp.ne.s32.totalorder %s6431_s29, 0 }
  0x81   : > { %4148 = dma.done.wait (%p6441_p3), [#allocation5], 12288  }
  0x82   : > { %4150 = vsyncadd (%p6441_p3), [#allocation5], 4294955008 }
  0x83   : > { %4152 = dma.done.wait (%p6441_p3), [#allocation8], 4096  }
  0x84   : > { %4154 = vsyncadd (%p6441_p3), [#allocation8], 4294963200  ;;  %v4410_v0 = vld [vmem:[%s4395_s23 + $0x10] sm:$0xff]  ;;  %v4413_v1 = vld [vmem:[%s4395_s23] sm:$0xff]  ;;  %s6588_s10 = sadd.s32 4294967295, %s4169_s27  }
  0x85   : > { %v4416_v2 = vld [vmem:[%s4395_s23 + $0x18] sm:$0xff]  ;;  %v379_v3 = vmul.f32 %v4410_v0, %v4410_v0  ;;  %v377_v4 = vmul.f32 %v4413_v1, %v4413_v1  ;;  %v4423_v5 = vld [vmem:[%s4395_s23 + $0x8] sm:$0xff]  ;;  %v4433_v9 = vld [vmem:[%s4395_s23 + $0x20] sm:$0xff]  ;;  %s3309_s14 = sshll.u32 %s6588_s10, 5 }
  0x86   : > { %v380_v6 = vmul.f32 %v4416_v2, %v4416_v2  ;;  %v378_v7 = vmul.f32 %v4423_v5, %v4423_v5  ;;  %v4430_v8 = vld [vmem:[%s4395_s23 + $0x28] sm:$0xff]  ;;  %v381_v11 = vmul.f32 %v4433_v9, %v4433_v9  ;;  %v4440_v12 = vld [vmem:[%s4395_s23 + $0x30] sm:$0xff]  ;;  %v4443_v13 = vld [vmem:[%s4395_s23 + $0x38] sm:$0xff]  ;;  %p340_p7 = scmp.lt.s32.totalorder %s3309_s14, 63 }
  0x87   : > { %413 = vadd.xlane.f32.xlu1 %v379_v3  ;;  %409 = vadd.xlane.f32.xlu0 %v377_v4  ;;  %v382_v10 = vmul.f32 %v4430_v8, %v4430_v8  ;;  %v809_v14 = vld [vmem:[#allocation4 + $0x80] sm:$0xff]  ;;  %v810_v15 = vld [vmem:[#allocation4 + $0x88] sm:$0xff]  ;;  %v383_v16 = vmul.f32 %v4440_v12, %v4440_v12  ;;  %v384_v17 = vmul.f32 %v4443_v13, %v4443_v13  ;;  %v811_v24 = vld [vmem:[#allocation4 + $0x90] sm:$0xff] }
  0x88   : > { %v4450_v18 = vld [vmem:[%s4395_s23 + $0x40] sm:$0xff]  ;;  %v3411_v19 = vpack.c.bf16 %v810_v15, %v809_v14  ;;  %v794_v21 = vld [vmem:[#allocation4 + $0x8] sm:$0xff]  ;;  %v812_v25 = vld [vmem:[#allocation4 + $0x98] sm:$0xff]  ;;  %s6600_s14 = smov (!%p340_p7, %s3309_s14), 63 }
  0x89   : > { %v793_v20 = vld [vmem:[#allocation4] sm:$0xff]  ;;  %v4453_v22 = vld [vmem:[%s4395_s23 + $0x48] sm:$0xff]  ;;  %v3415_v26 = vpack.c.bf16 %v812_v25, %v811_v24  ;;  %v385_v27 = vmul.f32 %v4450_v18, %v4450_v18  ;;  %v795_v29 = vld [vmem:[#allocation4 + $0x10] sm:$0xff]  ;;  %s3310_s24 = sshll.u32 %s6600_s14, 3 }
  0x8a   : > { %v3413_v23 = vpack.c.bf16 %v794_v21, %v793_v20  ;;  %3412 = vmatprep.subr.bf16.mxu0 %v3411_v19  ;;  %v386_v28 = vmul.f32 %v4453_v22, %v4453_v22  ;;  %v796_v30 = vld [vmem:[#allocation4 + $0x18] sm:$0xff]  ;;  %v4460_v31 = vld [vmem:[%s4395_s23 + $0x50] sm:$0xff]  ;;  %v813_v33 = vld [vmem:[#allocation4 + $0xa0] sm:$0xff]  ;;  %s6227_s20 = scalar_lea.vmem %s6348_s7, %s3310_s24 }
  0x8b   : > { %415 = vadd.xlane.f32.xlu1 %v380_v6  ;;  %411 = vadd.xlane.f32.xlu0 %v378_v7  ;;  %v4463_v32 = vld [vmem:[%s4395_s23 + $0x58] sm:$0xff]  ;;  %v814_v34 = vld [vmem:[#allocation4 + $0xa8] sm:$0xff]  ;;  %v3417_v35 = vpack.c.bf16 %v796_v30, %v795_v29  ;;  %v387_v36 = vmul.f32 %v4460_v31, %v4460_v31  ;;  %v4470_v38 = vld [vmem:[%s4395_s23 + $0x60] sm:$0xff] }
  0x8c   : > { %3414 = vmatpush3.bf16.xpose.msra.mxu0 %v3413_v23  ;;  %v388_v37 = vmul.f32 %v4463_v32, %v4463_v32  ;;  %v4473_v39 = vld [vmem:[%s4395_s23 + $0x68] sm:$0xff]  ;;  %v3419_v40 = vpack.c.bf16 %v814_v34, %v813_v33  ;;  %v389_v41 = vmul.f32 %v4470_v38, %v4470_v38  ;;  %v797_v43 = vld [vmem:[#allocation4 + $0x20] sm:$0xff]  ;;  %v4480_v45 = vld [vmem:[%s4395_s23 + $0x70] sm:$0xff] }
  0x8d   : > { %3416 = vmatprep.subr.bf16.mxu0 %v3415_v26  ;;  %v390_v42 = vmul.f32 %v4473_v39, %v4473_v39  ;;  %v798_v44 = vld [vmem:[#allocation4 + $0x28] sm:$0xff]  ;;  %v4483_v46 = vld [vmem:[%s4395_s23 + $0x78] sm:$0xff]  ;;  %v815_v47 = vld [vmem:[#allocation4 + $0xb0] sm:$0xff]  ;;  %v391_v50 = vmul.f32 %v4480_v45, %v4480_v45 }
  0x8e   : > { %v816_v48 = vld [vmem:[#allocation4 + $0xb8] sm:$0xff]  ;;  %v3421_v49 = vpack.c.bf16 %v798_v44, %v797_v43  ;;  %v392_v51 = vmul.f32 %v4483_v46, %v4483_v46  ;;  %v4490_v52 = vld [vmem:[%s4395_s23 + $0x80] sm:$0xff]  ;;  %v4493_v53 = vld [vmem:[%s4395_s23 + $0x88] sm:$0xff] }
  0x8f   : > { %419 = vadd.xlane.f32.xlu1 %v382_v10  ;;  %417 = vadd.xlane.f32.xlu0 %v381_v11  ;;  %v3423_v54 = vpack.c.bf16 %v816_v48, %v815_v47  ;;  %v393_v55 = vmul.f32 %v4490_v52, %v4490_v52  ;;  %v394_v56 = vmul.f32 %v4493_v53, %v4493_v53  ;;  %v799_v57 = vld [vmem:[#allocation4 + $0x30] sm:$0xff]  ;;  %v800_v58 = vld [vmem:[#allocation4 + $0x38] sm:$0xff]  ;;  %v817_v61 = vld [vmem:[#allocation4 + $0xc0] sm:$0xff] }
  0x90   : > { %v4500_v59 = vld [vmem:[%s4395_s23 + $0x90] sm:$0xff]  ;;  %v4503_v60 = vld [vmem:[%s4395_s23 + $0x98] sm:$0xff]  ;;  %v818_v62 = vld [vmem:[#allocation4 + $0xc8] sm:$0xff]  ;;  %v3425_v63 = vpack.c.bf16 %v800_v58, %v799_v57 }
  0x91   : > { %v395_v3 = vmul.f32 %v4500_v59, %v4500_v59  ;;  %v396_v4 = vmul.f32 %v4503_v60, %v4503_v60  ;;  %v4510_v6 = vld [vmem:[%s4395_s23 + $0xa0] sm:$0xff]  ;;  %v4513_v7 = vld [vmem:[%s4395_s23 + $0xa8] sm:$0xff]  ;;  %v3427_v10 = vpack.c.bf16 %v818_v62, %v817_v61  ;;  %v4523_v19 = vld [vmem:[%s4395_s23 + $0xb8] sm:$0xff] }
  0x92   : > { %v397_v11 = vmul.f32 %v4510_v6, %v4510_v6  ;;  %v398_v14 = vmul.f32 %v4513_v7, %v4513_v7  ;;  %v801_v15 = vld [vmem:[#allocation4 + $0x40] sm:$0xff]  ;;  %v819_v20 = vld [vmem:[#allocation4 + $0xd0] sm:$0xff]  ;;  %v820_v21 = vld [vmem:[#allocation4 + $0xd8] sm:$0xff]  ;;  %v400_v25 = vmul.f32 %v4523_v19, %v4523_v19 }
  0x93   : > { %421 = vadd.xlane.f32.xlu0 %v383_v16  ;;  %423 = vadd.xlane.f32.xlu1 %v384_v17  ;;  %v802_v16 = vld [vmem:[#allocation4 + $0x48] sm:$0xff]  ;;  %v4520_v17 = vld [vmem:[%s4395_s23 + $0xb0] sm:$0xff]  ;;  %v4530_v26 = vld [vmem:[%s4395_s23 + $0xc0] sm:$0xff] }
  0x94   : > { %3418 = vmatpush3.bf16.xpose.msra.mxu0 %v3417_v35  ;;  %v3429_v23 = vpack.c.bf16 %v802_v16, %v801_v15  ;;  %v399_v24 = vmul.f32 %v4520_v17, %v4520_v17  ;;  %v401_v29 = vmul.f32 %v4530_v26, %v4530_v26  ;;  %v803_v33 = vld [vmem:[#allocation4 + $0x50] sm:$0xff]  ;;  %v804_v34 = vld [vmem:[#allocation4 + $0x58] sm:$0xff]  ;;  %v4550_v44 = vld [vmem:[%s4395_s23 + $0xe0] sm:$0xff] }
  0x95   : > { %3420 = vmatprep.subr.bf16.mxu0 %v3419_v40  ;;  %v4540_v35 = vld [vmem:[%s4395_s23 + $0xd0] sm:$0xff]  ;;  %v822_v40 = vld [vmem:[#allocation4 + $0xe8] sm:$0xff]  ;;  %v824_v58 = vld [vmem:[#allocation4 + $0xf8] sm:$0xff] }
  0x96   : > { %v4553_v47 = vld [vmem:[%s4395_s23 + $0xe8] sm:$0xff]  ;;  %v823_v57 = vld [vmem:[#allocation4 + $0xf0] sm:$0xff] }
  0x97   : > { %425 = vadd.xlane.f32.xlu0 %v385_v27  ;;  %427 = vadd.xlane.f32.xlu1 %v386_v28  ;;  %v4533_v27 = vld [vmem:[%s4395_s23 + $0xc8] sm:$0xff]  ;;  %v3431_v28 = vpack.c.bf16 %v820_v21, %v819_v20 }
  0x98   : > { %v402_v30 = vmul.f32 %v4533_v27, %v4533_v27 }
  0x9b   : > { %429 = vadd.xlane.f32.xlu0 %v387_v36  ;;  %431 = vadd.xlane.f32.xlu1 %v388_v37  ;;  %v4543_v36 = vld [vmem:[%s4395_s23 + $0xd8] sm:$0xff]  ;;  %v821_v37 = vld [vmem:[#allocation4 + $0xe0] sm:$0xff] }
  0x9c   : > { %3422 = vmatpush3.bf16.xpose.msra.mxu0 %v3421_v49  ;;  %v404_v43 = vmul.f32 %v4543_v36, %v4543_v36  ;;  %v3435_v48 = vpack.c.bf16 %v822_v40, %v821_v37  ;;  %v405_v49 = vmul.f32 %v4550_v44, %v4550_v44 }
  0x9d   : > { %3424 = vmatprep.subr.bf16.mxu0 %v3423_v54  ;;  %v806_v54 = vld [vmem:[#allocation4 + $0x68] sm:$0xff] }
  0x9f   : > { %433 = vadd.xlane.f32.xlu0 %v389_v41  ;;  %435 = vadd.xlane.f32.xlu1 %v390_v42  ;;  %v3433_v41 = vpack.c.bf16 %v804_v34, %v803_v33  ;;  %v403_v42 = vmul.f32 %v4540_v35, %v4540_v35 }
  0xa3   : > { %437 = vadd.xlane.f32.xlu0 %v391_v50  ;;  %439 = vadd.xlane.f32.xlu1 %v392_v51  ;;  %v406_v50 = vmul.f32 %v4553_v47, %v4553_v47  ;;  %v805_v51 = vld [vmem:[#allocation4 + $0x60] sm:$0xff] }
  0xa4   : > { %3426 = vmatpush3.bf16.xpose.msra.mxu0 %v3425_v63  ;;  %v3437_v61 = vpack.c.bf16 %v806_v54, %v805_v51 }
  0xa5   : > { %3428 = vmatprep.subr.bf16.mxu0 %v3427_v10  ;;  %v808_v10 = vld [vmem:[#allocation4 + $0x78] sm:$0xff] }
  0xa7   : > { %441 = vadd.xlane.f32.xlu0 %v393_v55  ;;  %443 = vadd.xlane.f32.xlu1 %v394_v56  ;;  %v4560_v55 = vld [vmem:[%s4395_s23 + $0xf0] sm:$0xff]  ;;  %v4563_v56 = vld [vmem:[%s4395_s23 + $0xf8] sm:$0xff] }
  0xa8   : > { %v407_v62 = vmul.f32 %v4560_v55, %v4560_v55  ;;  %v408_v63 = vmul.f32 %v4563_v56, %v4563_v56 }
  0xab   : > { %445 = vadd.xlane.f32.xlu0 %v395_v3  ;;  %447 = vadd.xlane.f32.xlu1 %v396_v4  ;;  %v3439_v3 = vpack.c.bf16 %v824_v58, %v823_v57  ;;  %v807_v4 = vld [vmem:[#allocation4 + $0x70] sm:$0xff] }
  0xac   : > { %3430 = vmatpush3.bf16.xpose.msra.mxu0 %v3429_v23 }
  0xad   : > { %3432 = vmatprep.subr.bf16.mxu0 %v3431_v28 }
  0xaf   : > { %449 = vadd.xlane.f32.xlu0 %v397_v11  ;;  %451 = vadd.xlane.f32.xlu1 %v398_v14  ;;  %v3441_v11 = vpack.c.bf16 %v808_v10, %v807_v4 }
  0xb3   : > { %453 = vadd.xlane.f32.xlu0 %v399_v24  ;;  %455 = vadd.xlane.f32.xlu1 %v400_v25 }
  0xb4   : > { %3434 = vmatpush3.bf16.xpose.msra.mxu0 %v3433_v41 }
  0xb5   : > { %3436 = vmatprep.subr.bf16.mxu0 %v3435_v48 }
  0xb7   : > { %457 = vadd.xlane.f32.xlu0 %v401_v29  ;;  %459 = vadd.xlane.f32.xlu1 %v402_v30 }
  0xbb   : > { %461 = vadd.xlane.f32.xlu0 %v403_v42  ;;  %463 = vadd.xlane.f32.xlu1 %v404_v43 }
  0xbc   : > { %3438 = vmatpush3.bf16.xpose.msra.mxu0 %v3437_v61 }
  0xbd   : > { %3440 = vmatprep.subr.bf16.mxu0 %v3439_v3 }
  0xbf   : > { %465 = vadd.xlane.f32.xlu0 %v405_v49  ;;  %467 = vadd.xlane.f32.xlu1 %v406_v50 }
  0xc3   : > { %469 = vadd.xlane.f32.xlu0 %v407_v62  ;;  %471 = vadd.xlane.f32.xlu1 %v408_v63 }
  0xc4   : > { %3442 = vmatpush3.bf16.xpose.msra.mxu0 %v3441_v11 }
 0x114   : > { %v414_v14 = vpop.xlane.xlu1 %413  ;;  %v410_v15 = vpop.xlane.xlu0 %409 }
 0x115   : > { %3629 = vrsqrt.f32 %v414_v14  ;;  %vm475_vm0 = vcmp.eq.f32.partialorder %v410_v15, inf  ;;  %v478_v33 = vand.u32 2147483648, %v410_v15  ;;  %vm477_vm1 = vcmp.eq.f32.partialorder %v410_v15, 0.0 }
 0x116   : > { %3631 = vrsqrt.f32 %v410_v15  ;;  %vm489_vm2 = vcmp.eq.f32.partialorder %v414_v14, inf  ;;  %v492_v50 = vand.u32 2147483648, %v414_v14  ;;  %vm491_vm4 = vcmp.eq.f32.partialorder %v414_v14, 0.0 }
 0x118   : > { %v416_v16 = vpop.xlane.xlu1 %415  ;;  %v412_v20 = vpop.xlane.xlu0 %411 }
 0x119   : > { %3633 = vrsqrt.f32 %v416_v16  ;;  %vm482_vm3 = vcmp.eq.f32.partialorder %v412_v20, inf  ;;  %v485_v54 = vand.u32 2147483648, %v412_v20  ;;  %vm496_vm5 = vcmp.eq.f32.partialorder %v416_v16, inf }
 0x11a   : > { %3635 = vrsqrt.f32 %v412_v20  ;;  %vm484_vm6 = vcmp.eq.f32.partialorder %v412_v20, 0.0  ;;  %v499_v11 = vand.u32 2147483648, %v416_v16  ;;  %vm498_vm7 = vcmp.eq.f32.partialorder %v416_v16, 0.0 }
 0x11c   : > { %v418_v21 = vpop.xlane.xlu0 %417  ;;  %v4569_v23 = vpop.xlane.xlu1 %419 }
 0x11d   : > { %3637 = vrsqrt.f32 %v418_v21  ;;  %vm503_vm8 = vcmp.eq.f32.partialorder %v418_v21, inf  ;;  %vm510_vm9 = vcmp.eq.f32.partialorder %v4569_v23, inf  ;;  %vm505_vm10 = vcmp.eq.f32.partialorder %v418_v21, 0.0 }
 0x11e   : > { %3639 = vrsqrt.f32 %v4569_v23  ;;  %vm512_vm11 = vcmp.eq.f32.partialorder %v4569_v23, 0.0 }
 0x11f   : > { %v3630_v24 = vpop.eup %3629 }
 0x120   : > { %v3632_v25 = vpop.eup %3631  ;;  %v488_v28 = vmul.f32 %v3630_v24, %v414_v14  ;;  %v4572_v30 = vpop.xlane.xlu0 %421 }
 0x121   : > { %v474_v29 = vmul.f32 %v3632_v25, %v410_v15  ;;  %3641 = vrsqrt.f32 %v4572_v30  ;;  %v4575_v49 = vpop.xlane.xlu1 %423  ;;  %vm517_vm12 = vcmp.eq.f32.partialorder %v4572_v30, inf  ;;  %vm519_vm13 = vcmp.eq.f32.partialorder %v4572_v30, 0.0 }
 0x122   : > { %v490_v42 = vsel %vm489_vm2, %v414_v14, %v488_v28  ;;  %3643 = vrsqrt.f32 %v4575_v49  ;;  %vm524_vm14 = vcmp.eq.f32.partialorder %v4575_v49, inf  ;;  %vm526_vm15 = vcmp.eq.f32.partialorder %v4575_v49, 0.0 }
 0x123   : > { %v3634_v34 = vpop.eup %3633  ;;  %v476_v37 = vsel %vm475_vm0, %v410_v15, %v474_v29  ;;  %v493_v61 = vsel %vm491_vm4, %v492_v50, %v490_v42 }
 0x124   : > { %v3636_v40 = vpop.eup %3635  ;;  %v479_v41 = vsel %vm477_vm1, %v478_v33, %v476_v37  ;;  %v495_v43 = vmul.f32 %v3634_v34, %v416_v16  ;;  %v4578_v3 = vpop.xlane.xlu0 %425  ;;  %v699_v15 = vadd.f32 0.0001, %v493_v61  ;;  %v506_v33 = vand.u32 2147483648, %v418_v21 }
 0x125   : > { %v481_v48 = vmul.f32 %v3636_v40, %v412_v20  ;;  %v697_v57 = vadd.f32 0.0001, %v479_v41  ;;  %v4582_v28 = vpop.xlane.xlu1 %427  ;;  %v513_v34 = vand.u32 2147483648, %v4569_v23  ;;  %vm531_vm0 = vcmp.eq.f32.partialorder %v4578_v3, inf }
 0x126   : > { %v497_v62 = vsel %vm496_vm5, %v416_v16, %v495_v43  ;;  %vm533_vm1 = vcmp.eq.f32.partialorder %v4578_v3, 0.0  ;;  %vm538_vm2 = vcmp.eq.f32.partialorder %v4582_v28, inf }
 0x127   : > { %v483_v51 = vsel %vm482_vm3, %v412_v20, %v481_v48  ;;  %v3638_v58 = vpop.eup %3637  ;;  %3645 = vrcp.f32 %v697_v57  ;;  %v500_v24 = vsel %vm498_vm7, %v499_v11, %v497_v62  ;;  %v520_v48 = vand.u32 2147483648, %v4572_v30 }
 0x128   : > { %v502_v63 = vmul.f32 %v3638_v58, %v418_v21  ;;  %v486_v4 = vsel %vm484_vm6, %v485_v54, %v483_v51  ;;  %v3640_v10 = vpop.eup %3639  ;;  %3647 = vrsqrt.f32 %v4578_v3  ;;  %v700_v16 = vadd.f32 0.0001, %v500_v24  ;;  %v4590_v42 = vpop.xlane.xlu0 %429 }
 0x129   : > { %v698_v14 = vadd.f32 0.0001, %v486_v4  ;;  %v509_v20 = vmul.f32 %v3640_v10, %v4569_v23  ;;  %v4598_v57 = vpop.xlane.xlu1 %431  ;;  %v527_v4 = vand.u32 2147483648, %v4575_v49  ;;  %vm540_vm3 = vcmp.eq.f32.partialorder %v4582_v28, 0.0 }
 0x12a   : > { %v504_v25 = vsel %vm503_vm8, %v418_v21, %v502_v63  ;;  %vm545_vm4 = vcmp.eq.f32.partialorder %v4590_v42, inf  ;;  %vm547_vm5 = vcmp.eq.f32.partialorder %v4590_v42, 0.0  ;;  %vm552_vm6 = vcmp.eq.f32.partialorder %v4598_v57, inf }
 0x12b   : > { %v3642_v29 = vpop.eup %3641  ;;  %3649 = vrcp.f32 %v698_v14  ;;  %v507_v37 = vsel %vm505_vm10, %v506_v33, %v504_v25  ;;  %v511_v40 = vsel %vm510_vm9, %v4569_v23, %v509_v20  ;;  %v534_v25 = vand.u32 2147483648, %v4578_v3 }
 0x12c   : > { %3651 = vrcp.f32 %v699_v15  ;;  %v516_v41 = vmul.f32 %v3642_v29, %v4572_v30  ;;  %v3644_v43 = vpop.eup %3643  ;;  %v701_v21 = vadd.f32 0.0001, %v507_v37  ;;  %v514_v50 = vsel %vm512_vm11, %v513_v34, %v511_v40 }
 0x12d   : > { %3653 = vrsqrt.f32 %v4582_v28  ;;  %v523_v23 = vmul.f32 %v3644_v43, %v4575_v49  ;;  %v702_v62 = vadd.f32 0.0001, %v514_v50  ;;  %v4617_v34 = vpop.xlane.xlu1 %435  ;;  %vm554_vm7 = vcmp.eq.f32.partialorder %v4598_v57, 0.0 }
 0x12e   : > { %3655 = vrcp.f32 %v700_v16  ;;  %v518_v54 = vsel %vm517_vm12, %v4572_v30, %v516_v41  ;;  %v541_v41 = vand.u32 2147483648, %v4582_v28  ;;  %vm566_vm10 = vcmp.eq.f32.partialorder %v4617_v34, inf }
 0x12f   : > { %3657 = vrsqrt.f32 %v4590_v42  ;;  %v521_v10 = vsel %vm519_vm13, %v520_v48, %v518_v54  ;;  %v525_v30 = vsel %vm524_vm14, %v4575_v49, %v523_v23  ;;  %v548_v23 = vand.u32 2147483648, %v4590_v42 }
 0x130   : > { %3659 = vrcp.f32 %v701_v21  ;;  %v703_v20 = vadd.f32 0.0001, %v521_v10  ;;  %v528_v49 = vsel %vm526_vm15, %v527_v4, %v525_v30  ;;  %vm568_vm11 = vcmp.eq.f32.partialorder %v4617_v34, 0.0 }
 0x131   : > { %v3646_v51 = vpop.eup %3645  ;;  %3661 = vrsqrt.f32 %v4598_v57  ;;  %v704_v40 = vadd.f32 0.0001, %v528_v49 }
 0x132   : > { %v3648_v58 = vpop.eup %3647  ;;  %v761_v61 = vmul.f32 %v3646_v51, %v4413_v1  ;;  %v4608_v1 = vpop.xlane.xlu0 %433  ;;  %3663 = vrcp.f32 %v702_v62 }
 0x133   : > { %v530_v15 = vmul.f32 %v3648_v58, %v4578_v3  ;;  %3665 = vrsqrt.f32 %v4608_v1  ;;  %vm559_vm8 = vcmp.eq.f32.partialorder %v4608_v1, inf  ;;  %vm561_vm9 = vcmp.eq.f32.partialorder %v4608_v1, 0.0 }
 0x134   : > { %3347 = vmatprep.mubr.f32.mxu0 %v761_v61  ;;  %3667 = vrcp.f32 %v703_v20 }
 0x135   : > { %v3650_v63 = vpop.eup %3649  ;;  %3348 = vmatmul.mubr.f32.vlgmr.msra.gmra.mrb[0].mxu0 %v761_v61  ;;  %v532_v16 = vsel %vm531_vm0, %v4578_v3, %v530_v15  ;;  %3669 = vrsqrt.f32 %v4617_v34 }
 0x136   : > { %v3652_v11 = vpop.eup %3651  ;;  %v762_v14 = vmul.f32 %v3650_v63, %v4423_v5  ;;  %v535_v43 = vsel %vm533_vm1, %v534_v25, %v532_v16  ;;  %v4626_v50 = vpop.xlane.xlu0 %437  ;;  %3671 = vrcp.f32 %v704_v40 }
 0x137   : > { %v3654_v24 = vpop.eup %3653  ;;  %v763_v29 = vmul.f32 %v3652_v11, %v4410_v0  ;;  %v705_v54 = vadd.f32 0.0001, %v535_v43  ;;  %3673 = vrsqrt.f32 %v4626_v50  ;;  %v4635_v63 = vpop.xlane.xlu1 %439  ;;  %v555_v11 = vand.u32 2147483648, %v4598_v57 }
 0x138   : > { %3349 = vmatprep.mubr.f32.mxu0 %v762_v14  ;;  %v3656_v33 = vpop.eup %3655  ;;  %v537_v5 = vmul.f32 %v3654_v24, %v4582_v28  ;;  %vm573_vm12 = vcmp.eq.f32.partialorder %v4626_v50, inf  ;;  %vm575_vm13 = vcmp.eq.f32.partialorder %v4626_v50, 0.0  ;;  %vm580_vm14 = vcmp.eq.f32.partialorder %v4635_v63, inf }
 0x139   : > { %3350 = vmatmul.mubr.f32.gmra.mrb[2].mxu0 %v762_v14  ;;  %v3658_v37 = vpop.eup %3657  ;;  %v764_v0 = vmul.f32 %v3656_v33, %v4416_v2  ;;  %3675 = vrcp.f32 %v705_v54  ;;  %v576_v54 = vand.u32 2147483648, %v4626_v50  ;;  %vm582_vm15 = vcmp.eq.f32.partialorder %v4635_v63, 0.0 }
 0x13a   : > { %3351 = vmatprep.mubr.f32.mxu0 %v763_v29  ;;  %v3660_v21 = vpop.eup %3659  ;;  %v539_v3 = vsel %vm538_vm2, %v4582_v28, %v537_v5  ;;  %v544_v48 = vmul.f32 %v3658_v37, %v4590_v42  ;;  %3677 = vrsqrt.f32 %v4635_v63  ;;  %v4644_v24 = vpop.xlane.xlu0 %441 }
 0x13b   : > { %v3662_v51 = vpop.eup %3661  ;;  %v765_v2 = vmul.f32 %v3660_v21, %v4433_v9  ;;  %v542_v58 = vsel %vm540_vm3, %v541_v41, %v539_v3  ;;  %v4653_v5 = vpop.xlane.xlu1 %443  ;;  %v569_v41 = vand.u32 2147483648, %v4617_v34  ;;  %vm587_vm0 = vcmp.eq.f32.partialorder %v4644_v24, inf }
 0x13c   : > { %v3664_v61 = vpop.eup %3663  ;;  %v546_v28 = vsel %vm545_vm4, %v4590_v42, %v544_v48  ;;  %v551_v62 = vmul.f32 %v3662_v51, %v4598_v57  ;;  %v706_v10 = vadd.f32 0.0001, %v542_v58  ;;  %vm589_vm1 = vcmp.eq.f32.partialorder %v4644_v24, 0.0 }
 0x13d   : > { %3352 = vmatmul.mubr.f32.gmra.mrb[4].mxu0 %v763_v29  ;;  %v3666_v4 = vpop.eup %3665  ;;  %v766_v9 = vmul.f32 %v3664_v61, %v4430_v8  ;;  %v549_v30 = vsel %vm547_vm5, %v548_v23, %v546_v28  ;;  %v562_v29 = vand.u32 2147483648, %v4608_v1  ;;  %vm594_vm2 = vcmp.eq.f32.partialorder %v4653_v5, inf }
 0x13e   : > { %3353 = vmatprep.mubr.f32.mxu0 %v764_v0  ;;  %v3668_v15 = vpop.eup %3667  ;;  %v553_v42 = vsel %vm552_vm6, %v4598_v57, %v551_v62  ;;  %v558_v14 = vmul.f32 %v3666_v4, %v4608_v1  ;;  %3679 = vrcp.f32 %v706_v10  ;;  %v707_v25 = vadd.f32 0.0001, %v549_v30  ;;  %v4662_v3 = vpop.xlane.xlu0 %445 }
 0x13f   : > { %v3670_v20 = vpop.eup %3669  ;;  %3681 = vrsqrt.f32 %v4644_v24  ;;  %v767_v8 = vmul.f32 %v3668_v15, %v4440_v12  ;;  %v556_v49 = vsel %vm554_vm7, %v555_v11, %v553_v42  ;;  %v4671_v61 = vpop.xlane.xlu1 %447  ;;  %v583_v4 = vand.u32 2147483648, %v4635_v63 }
 0x140   : > { %v3672_v33 = vpop.eup %3671  ;;  %v560_v57 = vsel %vm559_vm8, %v4608_v1, %v558_v14  ;;  %v565_v16 = vmul.f32 %v3670_v20, %v4617_v34  ;;  %3683 = vrcp.f32 %v707_v25  ;;  %v708_v40 = vadd.f32 0.0001, %v556_v49 }
 0x141   : > { %3354 = vmatmul.mubr.f32.gmra.mrb[6].mxu0 %v764_v0  ;;  %v3674_v37 = vpop.eup %3673  ;;  %3685 = vrsqrt.f32 %v4653_v5  ;;  %v768_v12 = vmul.f32 %v3672_v33, %v4443_v13  ;;  %v563_v0 = vsel %vm561_vm9, %v562_v29, %v560_v57  ;;  %v590_v14 = vand.u32 2147483648, %v4644_v24 }
 0x142   : > { %3355 = vmatprep.mubr.f32.mxu0 %v765_v2  ;;  %v567_v1 = vsel %vm566_vm10, %v4617_v34, %v565_v16  ;;  %v572_v21 = vmul.f32 %v3674_v37, %v4626_v50  ;;  %3687 = vrcp.f32 %v708_v40  ;;  %v709_v51 = vadd.f32 0.0001, %v563_v0  ;;  %v4680_v30 = vpop.xlane.xlu0 %449 }
 0x143   : > { %v3676_v43 = vpop.eup %3675  ;;  %3689 = vrsqrt.f32 %v4662_v3  ;;  %v570_v23 = vsel %vm568_vm11, %v569_v41, %v567_v1  ;;  %v597_v57 = vand.u32 2147483648, %v4653_v5  ;;  %vm596_vm3 = vcmp.eq.f32.partialorder %v4653_v5, 0.0 }
 0x144   : > { %v3678_v48 = vpop.eup %3677  ;;  %v769_v13 = vmul.f32 %v3676_v43, %v4450_v18  ;;  %v574_v34 = vsel %vm573_vm12, %v4626_v50, %v572_v21  ;;  %3691 = vrcp.f32 %v709_v51  ;;  %v710_v62 = vadd.f32 0.0001, %v570_v23 }
 0x145   : > { %3356 = vmatmul.mubr.f32.gmra.mrb[8].mxu0 %v765_v2  ;;  %v579_v58 = vmul.f32 %v3678_v48, %v4635_v63  ;;  %3693 = vrsqrt.f32 %v4671_v61  ;;  %v577_v10 = vsel %vm575_vm13, %v576_v54, %v574_v34  ;;  %vm601_vm4 = vcmp.eq.f32.partialorder %v4662_v3, inf }
 0x146   : > { %3357 = vmatprep.mubr.f32.mxu0 %v766_v9  ;;  %3695 = vrcp.f32 %v710_v62  ;;  %v711_v42 = vadd.f32 0.0001, %v577_v10  ;;  %v4698_v41 = vpop.xlane.xlu0 %453  ;;  %v604_v43 = vand.u32 2147483648, %v4662_v3  ;;  %vm603_vm5 = vcmp.eq.f32.partialorder %v4662_v3, 0.0 }
 0x147   : > { %v581_v50 = vsel %vm580_vm14, %v4635_v63, %v579_v58  ;;  %3697 = vrsqrt.f32 %v4680_v30  ;;  %vm608_vm6 = vcmp.eq.f32.partialorder %v4671_v61, inf  ;;  %v611_v23 = vand.u32 2147483648, %v4671_v61 }
 0x148   : > { %v3680_v2 = vpop.eup %3679  ;;  %v584_v20 = vsel %vm582_vm15, %v583_v4, %v581_v50  ;;  %3699 = vrcp.f32 %v711_v42  ;;  %vm610_vm7 = vcmp.eq.f32.partialorder %v4671_v61, 0.0  ;;  %vm615_vm8 = vcmp.eq.f32.partialorder %v4680_v30, inf }
 0x149   : > { %3358 = vmatmul.mubr.f32.gmra.mrb[10].mxu0 %v766_v9  ;;  %v3682_v28 = vpop.eup %3681  ;;  %v770_v18 = vmul.f32 %v3680_v2, %v4453_v22  ;;  %v712_v33 = vadd.f32 0.0001, %v584_v20  ;;  %vm617_vm9 = vcmp.eq.f32.partialorder %v4680_v30, 0.0  ;;  %vm629_vm12 = vcmp.eq.f32.partialorder %v4698_v41, inf }
 0x14a   : > { %3359 = vmatprep.mubr.f32.mxu0 %v767_v8  ;;  %v3684_v11 = vpop.eup %3683  ;;  %v586_v9 = vmul.f32 %v3682_v28, %v4644_v24  ;;  %v4716_v28 = vpop.xlane.xlu0 %457  ;;  %vm631_vm13 = vcmp.eq.f32.partialorder %v4698_v41, 0.0 }
 0x14b   : > { %v3686_v15 = vpop.eup %3685  ;;  %v771_v22 = vmul.f32 %v3684_v11, %v4460_v31 }
 0x14c   : > { %v3688_v25 = vpop.eup %3687  ;;  %v588_v63 = vsel %vm587_vm0, %v4644_v24, %v586_v9  ;;  %v593_v29 = vmul.f32 %v3686_v15, %v4653_v5  ;;  %vm643_vm0 = vcmp.eq.f32.partialorder %v4716_v28, inf }
 0x14d   : > { %3360 = vmatmul.mubr.f32.gmra.mrb[12].mxu0 %v767_v8  ;;  %v4689_v8 = vpop.xlane.xlu1 %451  ;;  %v3690_v49 = vpop.eup %3689  ;;  %v772_v31 = vmul.f32 %v3688_v25, %v4463_v32  ;;  %v591_v16 = vsel %vm589_vm1, %v590_v14, %v588_v63  ;;  %vm645_vm1 = vcmp.eq.f32.partialorder %v4716_v28, 0.0 }
 0x14e   : > { %3361 = vmatprep.mubr.f32.mxu0 %v768_v12  ;;  %3701 = vrsqrt.f32 %v4689_v8  ;;  %v3692_v37 = vpop.eup %3691  ;;  %v595_v24 = vsel %vm594_vm2, %v4653_v5, %v593_v29  ;;  %v600_v40 = vmul.f32 %v3690_v49, %v4662_v3  ;;  %v713_v0 = vadd.f32 0.0001, %v591_v16  ;;  %v4734_v63 = vpop.xlane.xlu0 %461 }
 0x14f   : > { %3703 = vrcp.f32 %v712_v33  ;;  %v773_v32 = vmul.f32 %v3692_v37, %v4470_v38  ;;  %v598_v1 = vsel %vm596_vm3, %v597_v57, %v595_v24  ;;  %vm622_vm10 = vcmp.eq.f32.partialorder %v4689_v8, inf }
 0x150   : > { %3705 = vrsqrt.f32 %v4698_v41  ;;  %v602_v5 = vsel %vm601_vm4, %v4662_v3, %v600_v40  ;;  %v625_v14 = vand.u32 2147483648, %v4689_v8  ;;  %vm624_vm11 = vcmp.eq.f32.partialorder %v4689_v8, 0.0 }
 0x151   : > { %3362 = vmatmul.mubr.f32.gmra.mrb[14].mxu0 %v768_v12  ;;  %v3694_v12 = vpop.eup %3693  ;;  %v4707_v51 = vpop.xlane.xlu1 %455  ;;  %3707 = vrcp.f32 %v713_v0  ;;  %v605_v2 = vsel %vm603_vm5, %v604_v43, %v602_v5  ;;  %v632_v33 = vand.u32 2147483648, %v4698_v41  ;;  %vm657_vm4 = vcmp.eq.f32.partialorder %v4734_v63, inf }
 0x152   : > { %3363 = vmatprep.mubr.f32.mxu0 %v769_v13  ;;  %v3696_v21 = vpop.eup %3695  ;;  %v607_v48 = vmul.f32 %v3694_v12, %v4671_v61  ;;  %3709 = vrsqrt.f32 %v4707_v51  ;;  %v715_v4 = vadd.f32 0.0001, %v605_v2  ;;  %vm636_vm14 = vcmp.eq.f32.partialorder %v4707_v51, inf }
 0x153   : > { %v3698_v54 = vpop.eup %3697  ;;  %v774_v38 = vmul.f32 %v3696_v21, %v4473_v39  ;;  %v639_v12 = vand.u32 2147483648, %v4707_v51  ;;  %vm638_vm15 = vcmp.eq.f32.partialorder %v4707_v51, 0.0  ;;  %vm659_vm5 = vcmp.eq.f32.partialorder %v4734_v63, 0.0 }
 0x154   : > { %v3700_v34 = vpop.eup %3699  ;;  %v609_v3 = vsel %vm608_vm6, %v4671_v61, %v607_v48  ;;  %v614_v58 = vmul.f32 %v3698_v54, %v4680_v30  ;;  %v646_v48 = vand.u32 2147483648, %v4716_v28 }
 0x155   : > { %3364 = vmatmul.mubr.f32.gmra.mrb[16].mxu0 %v769_v13  ;;  %v714_v13 = vadd.f32 0.0001, %v598_v1  ;;  %v775_v39 = vmul.f32 %v3700_v34, %v4480_v45  ;;  %v612_v10 = vsel %vm610_vm7, %v611_v23, %v609_v3  ;;  %v4725_v9 = vpop.xlane.xlu1 %459  ;;  %v4752_v1 = vpop.xlane.xlu0 %465 }
 0x156   : > { %3365 = vmatprep.mubr.f32.mxu0 %v770_v18  ;;  %v616_v61 = vsel %vm615_vm8, %v4680_v30, %v614_v58  ;;  %v716_v42 = vadd.f32 0.0001, %v612_v10  ;;  %vm650_vm2 = vcmp.eq.f32.partialorder %v4725_v9, inf  ;;  %v653_v3 = vand.u32 2147483648, %v4725_v9 }
 0x157   : > { %3711 = vrcp.f32 %v714_v13  ;;  %vm652_vm3 = vcmp.eq.f32.partialorder %v4725_v9, 0.0  ;;  %vm671_vm8 = vcmp.eq.f32.partialorder %v4752_v1, inf }
 0x158   : > { %v3702_v62 = vpop.eup %3701  ;;  %3713 = vrsqrt.f32 %v4716_v28 }
 0x159   : > { %3366 = vmatmul.mubr.f32.gmra.mrb[18].mxu0 %v770_v18  ;;  %v618_v18 = vand.u32 2147483648, %v4680_v30  ;;  %v3704_v11 = vpop.eup %3703  ;;  %v621_v50 = vmul.f32 %v3702_v62, %v4689_v8  ;;  %3715 = vrcp.f32 %v715_v4  ;;  %v4743_v37 = vpop.xlane.xlu1 %463 }
 0x15a   : > { %3367 = vmatprep.mubr.f32.mxu0 %v771_v22  ;;  %v3706_v15 = vpop.eup %3705  ;;  %3717 = vrsqrt.f32 %v4725_v9  ;;  %v776_v45 = vmul.f32 %v3704_v11, %v4483_v46  ;;  %v660_v11 = vand.u32 2147483648, %v4734_v63  ;;  %vm664_vm6 = vcmp.eq.f32.partialorder %v4743_v37, inf }
 0x15b   : > { %v3708_v20 = vpop.eup %3707  ;;  %v623_v30 = vsel %vm622_vm10, %v4689_v8, %v621_v50  ;;  %v628_v25 = vmul.f32 %v3706_v15, %v4698_v41  ;;  %3719 = vrcp.f32 %v716_v42  ;;  %vm666_vm7 = vcmp.eq.f32.partialorder %v4743_v37, 0.0 }
 0x15c   : > { %v3710_v29 = vpop.eup %3709  ;;  %3721 = vrsqrt.f32 %v4734_v63  ;;  %v777_v46 = vmul.f32 %v3708_v20, %v4490_v52  ;;  %v626_v57 = vsel %vm624_vm11, %v625_v14, %v623_v30 }
 0x15d   : > { %3368 = vmatmul.mubr.f32.gmra.mrb[20].mxu0 %v771_v22  ;;  %v619_v22 = vsel %vm617_vm9, %v618_v18, %v616_v61  ;;  %v630_v8 = vsel %vm629_vm12, %v4698_v41, %v628_v25  ;;  %v635_v16 = vmul.f32 %v3710_v29, %v4707_v51  ;;  %v718_v40 = vadd.f32 0.0001, %v626_v57  ;;  %v4770_v18 = vpop.xlane.xlu0 %469 }
 0x15e   : > { %3369 = vmatprep.mubr.f32.mxu0 %v772_v31  ;;  %v717_v49 = vadd.f32 0.0001, %v619_v22  ;;  %v633_v0 = vsel %vm631_vm13, %v632_v33, %v630_v8  ;;  %v667_v22 = vand.u32 2147483648, %v4743_v37  ;;  %v674_v33 = vand.u32 2147483648, %v4752_v1 }
 0x15f   : > { %v637_v41 = vsel %vm636_vm14, %v4707_v51, %v635_v16  ;;  %v719_v5 = vadd.f32 0.0001, %v633_v0  ;;  %vm673_vm9 = vcmp.eq.f32.partialorder %v4752_v1, 0.0  ;;  %vm685_vm12 = vcmp.eq.f32.partialorder %v4770_v18, inf }
 0x160   : > { %3723 = vrcp.f32 %v717_v49  ;;  %v640_v54 = vsel %vm638_vm15, %v639_v12, %v637_v41  ;;  %vm687_vm13 = vcmp.eq.f32.partialorder %v4770_v18, 0.0 }
 0x161   : > { %3370 = vmatmul.mubr.f32.gmra.mrb[22].mxu0 %v772_v31  ;;  %v3712_v31 = vpop.eup %3711  ;;  %3725 = vrsqrt.f32 %v4743_v37  ;;  %v720_v34 = vadd.f32 0.0001, %v640_v54 }
 0x162   : > { %3371 = vmatprep.mubr.f32.mxu0 %v773_v32  ;;  %v3714_v24 = vpop.eup %3713  ;;  %v778_v52 = vmul.f32 %v3712_v31, %v4493_v53  ;;  %3727 = vrcp.f32 %v718_v40 }
 0x163   : > { %v3716_v43 = vpop.eup %3715  ;;  %3729 = vrsqrt.f32 %v4752_v1 }
 0x164   : > { %v3718_v21 = vpop.eup %3717  ;;  %v779_v53 = vmul.f32 %v3716_v43, %v4500_v59  ;;  %3731 = vrcp.f32 %v719_v5 }
 0x165   : > { %3372 = vmatmul.mubr.f32.gmra.mrb[24].mxu0 %v773_v32  ;;  %v642_v32 = vmul.f32 %v3714_v24, %v4716_v28  ;;  %v3720_v13 = vpop.eup %3719  ;;  %v649_v23 = vmul.f32 %v3718_v21, %v4725_v9 }
 0x166   : > { %3373 = vmatprep.mubr.f32.mxu0 %v774_v38  ;;  %v3722_v2 = vpop.eup %3721  ;;  %v780_v59 = vmul.f32 %v3720_v13, %v4503_v60 }
 0x167   : > { %v644_v51 = vsel %vm643_vm0, %v4716_v28, %v642_v32  ;;  %v651_v28 = vsel %vm650_vm2, %v4725_v9, %v649_v23  ;;  %v656_v4 = vmul.f32 %v3722_v2, %v4734_v63  ;;  %v688_v32 = vand.u32 2147483648, %v4770_v18 }
 0x168   : > { %v647_v58 = vsel %vm645_vm1, %v646_v48, %v644_v51  ;;  %v654_v61 = vsel %vm652_vm3, %v653_v3, %v651_v28 }
 0x169   : > { %3374 = vmatmul.mubr.f32.gmra.mrb[26].mxu0 %v774_v38  ;;  %v4761_v38 = vpop.xlane.xlu1 %467  ;;  %v721_v10 = vadd.f32 0.0001, %v647_v58  ;;  %v658_v9 = vsel %vm657_vm4, %v4734_v63, %v656_v4 }
 0x16a   : > { %3375 = vmatprep.mubr.f32.mxu0 %v775_v39  ;;  %3733 = vrsqrt.f32 %v4761_v38  ;;  %v3724_v62 = vpop.eup %3723  ;;  %v661_v20 = vsel %vm659_vm5, %v660_v11, %v658_v9  ;;  %vm678_vm10 = vcmp.eq.f32.partialorder %v4761_v38, inf  ;;  %v681_v24 = vand.u32 2147483648, %v4761_v38  ;;  %v1742_v9 = vld [vmem:[#allocation6 + $0x38] sm:$0xff] }
 0x16b   : > { %3735 = vrcp.f32 %v720_v34  ;;  %v781_v60 = vmul.f32 %v3724_v62, %v4510_v6  ;;  %v723_v49 = vadd.f32 0.0001, %v661_v20  ;;  %vm680_vm11 = vcmp.eq.f32.partialorder %v4761_v38, 0.0  ;;  %v1745_v20 = vld [vmem:[#allocation6 + $0x50] sm:$0xff] }
 0x16c   : > { %3737 = vrsqrt.f32 %v4770_v18 }
 0x16d   : > { %3376 = vmatmul.mubr.f32.gmra.mrb[28].mxu0 %v775_v39  ;;  %v3726_v39 = vpop.eup %3725  ;;  %v4779_v42 = vpop.xlane.xlu1 %471  ;;  %3739 = vrcp.f32 %v721_v10  ;;  %v1736_v10 = vld [vmem:[#allocation6 + $0x8] sm:$0xff] }
 0x16e   : > { %3377 = vmatprep.mubr.f32.mxu0 %v776_v45  ;;  %v3728_v50 = vpop.eup %3727  ;;  %v663_v15 = vmul.f32 %v3726_v39, %v4743_v37  ;;  %3741 = vrsqrt.f32 %v4779_v42  ;;  %vm692_vm14 = vcmp.eq.f32.partialorder %v4779_v42, inf  ;;  %v695_v13 = vand.u32 2147483648, %v4779_v42 }
 0x16f   : > { %v3730_v14 = vpop.eup %3729  ;;  %v782_v6 = vmul.f32 %v3728_v50, %v4513_v7  ;;  %vm694_vm15 = vcmp.eq.f32.partialorder %v4779_v42, 0.0 }
 0x170   : > { %v3732_v30 = vpop.eup %3731  ;;  %v665_v25 = vsel %vm664_vm6, %v4743_v37, %v663_v15  ;;  %v670_v63 = vmul.f32 %v3730_v14, %v4752_v1 }
 0x171   : > { %3378 = vmatmul.mubr.f32.gmra.mrb[30].mxu0 %v776_v45  ;;  %v722_v45 = vadd.f32 0.0001, %v654_v61  ;;  %v668_v7 = vsel %vm666_vm7, %v667_v22, %v665_v25  ;;  %v1737_v61 = vld [vmem:[#allocation6 + $0x10] sm:$0xff]  ;;  %v1748_v25 = vld [vmem:[#allocation6 + $0x68] sm:$0xff] }
 0x172   : > { %3379 = vmatprep.mubr.f32.mxu0 %v777_v46  ;;  %v672_v31 = vsel %vm671_vm8, %v4752_v1, %v670_v63  ;;  %v724_v37 = vadd.f32 0.0001, %v668_v7  ;;  %v1750_v63 = vld [vmem:[#allocation6 + $0x78] sm:$0xff]  ;;  %v1752_v7 = vld [vmem:[#allocation6 + $0x88] sm:$0xff] }
 0x173   : > { %3743 = vrcp.f32 %v722_v45  ;;  %v1746_v45 = vld [vmem:[#allocation6 + $0x58] sm:$0xff] }
 0x174   : > { %v3734_v29 = vpop.eup %3733  ;;  %3745 = vrcp.f32 %v723_v49  ;;  %v1747_v49 = vld [vmem:[#allocation6 + $0x60] sm:$0xff] }
 0x175   : > { %3380 = vmatmul.mubr.f32.gmra.mrb[32].mxu0 %v777_v46  ;;  %v783_v46 = vmul.f32 %v3732_v30, %v4520_v17  ;;  %v3736_v57 = vpop.eup %3735  ;;  %v677_v8 = vmul.f32 %v3734_v29, %v4761_v38  ;;  %v675_v17 = vsel %vm673_vm9, %v674_v33, %v672_v31  ;;  %3747 = vrcp.f32 %v724_v37  ;;  %v1749_v33 = vld [vmem:[#allocation6 + $0x70] sm:$0xff] }
 0x176   : > { %3381 = vmatprep.mubr.f32.mxu0 %v778_v52  ;;  %v3738_v16 = vpop.eup %3737  ;;  %v784_v40 = vmul.f32 %v3736_v57, %v4523_v19  ;;  %v725_v41 = vadd.f32 0.0001, %v675_v17  ;;  %v3455_v29 = vpack.c.bf16 %v1750_v63, %v1748_v25  ;;  %v1754_v57 = vld [vmem:[#allocation6 + $0x98] sm:$0xff] }
 0x177   : > { %v3740_v12 = vpop.eup %3739  ;;  %v684_v0 = vmul.f32 %v3738_v16, %v4770_v18  ;;  %v3459_v31 = vpack.c.bf16 %v1754_v57, %v1752_v7  ;;  %v1753_v16 = vld [vmem:[#allocation6 + $0x90] sm:$0xff] }
 0x178   : > { %v3742_v43 = vpop.eup %3741  ;;  %v785_v1 = vmul.f32 %v3740_v12, %v4530_v26  ;;  %3749 = vrcp.f32 %v725_v41  ;;  %v1755_v12 = vld [vmem:[#allocation6 + $0xa0] sm:$0xff]  ;;  %v1762_v41 = vld [vmem:[#allocation6 + $0xd8] sm:$0xff] }
 0x179   : > { %3382 = vmatmul.mubr.f32.gmra.mrb[34].mxu0 %v778_v52  ;;  %v679_v52 = vsel %vm678_vm10, %v4761_v38, %v677_v8  ;;  %v686_v5 = vsel %vm685_vm12, %v4770_v18, %v684_v0  ;;  %v691_v48 = vmul.f32 %v3742_v43, %v4779_v42  ;;  %v1751_v8 = vld [vmem:[#allocation6 + $0x80] sm:$0xff]  ;;  %v1760_v43 = vld [vmem:[#allocation6 + $0xc8] sm:$0xff] }
 0x17a   : > { %3383 = vmatprep.mubr.f32.mxu0 %v779_v53  ;;  %v682_v19 = vsel %vm680_vm11, %v681_v24, %v679_v52  ;;  %v689_v54 = vsel %vm687_vm13, %v688_v32, %v686_v5  ;;  %v3461_v37 = vpack.c.bf16 %v1753_v16, %v1751_v8  ;;  %v1756_v24 = vld [vmem:[#allocation6 + $0xa8] sm:$0xff]  ;;  %v1757_v52 = vld [vmem:[#allocation6 + $0xb0] sm:$0xff]  ;;  %v3467_v32 = vpack.c.bf16 %v1762_v41, %v1760_v43  ;;  %v1779_v41 = vld [vmem:[#allocation6 + $0x160] sm:$0xff] }
 0x17b   : > { %v693_v23 = vsel %vm692_vm14, %v4779_v42, %v691_v48  ;;  %v727_v38 = vadd.f32 0.0001, %v689_v54  ;;  %v1741_v42 = vld [vmem:[#allocation6 + $0x30] sm:$0xff]  ;;  %v3465_v0 = vpack.c.bf16 %v1757_v52, %v1755_v12  ;;  %v1764_v5 = vld [vmem:[#allocation6 + $0xe8] sm:$0xff]  ;;  %v1766_v48 = vld [vmem:[#allocation6 + $0xf8] sm:$0xff] }
 0x17c   : > { %v696_v2 = vsel %vm694_vm15, %v695_v13, %v693_v23  ;;  %v1763_v54 = vld [vmem:[#allocation6 + $0xe0] sm:$0xff]  ;;  %v1765_v13 = vld [vmem:[#allocation6 + $0xf0] sm:$0xff] }
 0x17d   : > { %3384 = vmatmul.mubr.f32.gmra.mrb[36].mxu0 %v779_v53  ;;  %v3744_v21 = vpop.eup %3743  ;;  %v726_v53 = vadd.f32 0.0001, %v682_v19  ;;  %v1761_v19 = vld [vmem:[#allocation6 + $0xd0] sm:$0xff] }
 0x17e   : > { %3385 = vmatprep.mubr.f32.mxu0 %v780_v59  ;;  %v786_v51 = vmul.f32 %v3744_v21, %v4533_v27  ;;  %v3746_v26 = vpop.eup %3745 }
 0x17f   : > { %3751 = vrcp.f32 %v726_v53  ;;  %v787_v34 = vmul.f32 %v3746_v26, %v4540_v35  ;;  %v3748_v3 = vpop.eup %3747  ;;  %v3471_v53 = vpack.c.bf16 %v1766_v48, %v1764_v5  ;;  %v3473_v26 = vpack.c.bf16 %v1765_v13, %v1763_v54  ;;  %v1784_v5 = vld [vmem:[#allocation6 + $0x188] sm:$0xff]  ;;  %v1786_v48 = vld [vmem:[#allocation6 + $0x198] sm:$0xff] }
 0x180   : > { %3753 = vrcp.f32 %v727_v38  ;;  %v788_v58 = vmul.f32 %v3748_v3, %v4543_v36  ;;  %v1768_v38 = vld [vmem:[#allocation6 + $0x108] sm:$0xff]  ;;  %v1767_v3 = vld [vmem:[#allocation6 + $0x100] sm:$0xff] }
 0x181   : > { %3386 = vmatmul.mubr.f32.gmra.mrb[38].mxu0 %v780_v59  ;;  %v728_v59 = vadd.f32 0.0001, %v696_v2  ;;  %v1770_v2 = vld [vmem:[#allocation6 + $0x118] sm:$0xff] }
 0x182   : > { %3387 = vmatprep.mubr.f32.mxu0 %v781_v60  ;;  %v3750_v27 = vpop.eup %3749 }
 0x183   : > { %3755 = vrcp.f32 %v728_v59  ;;  %v789_v62 = vmul.f32 %v3750_v27, %v4550_v44  ;;  %v1738_v44 = vld [vmem:[#allocation6 + $0x18] sm:$0xff]  ;;  %v1769_v59 = vld [vmem:[#allocation6 + $0x110] sm:$0xff] }
 0x184   : > { %v3443_v11 = vpack.c.bf16 %v1738_v44, %v1736_v10  ;;  %v3477_v27 = vpack.c.bf16 %v1769_v59, %v1767_v3  ;;  %v1771_v44 = vld [vmem:[#allocation6 + $0x120] sm:$0xff] }
 0x185   : > { %3388 = vmatmul.mubr.f32.gmra.mrb[40].mxu0 %v781_v60  ;;  %v1735_v60 = vld [vmem:[#allocation6] sm:$0xff] }
 0x186   : > { %3389 = vmatprep.mubr.f32.mxu0 %v782_v6  ;;  %v3445_v50 = vpack.c.bf16 %v1737_v61, %v1735_v60  ;;  %3444 = vmatprep.subr.bf16.mxu1 %v3443_v11  ;;  %v1773_v11 = vld [vmem:[#allocation6 + $0x130] sm:$0xff] }
 0x188   : > { %3446 = vmatpush1.bf16.xpose.msra.mxu1 %v3445_v50  ;;  %v3481_v50 = vpack.c.bf16 %v1773_v11, %v1771_v44 }
 0x189   : > { %3390 = vmatmul.mubr.f32.gmra.mrb[42].mxu0 %v782_v6  ;;  %v3752_v28 = vpop.eup %3751  ;;  %v1743_v6 = vld [vmem:[#allocation6 + $0x40] sm:$0xff] }
 0x18a   : > { %3391 = vmatprep.mubr.f32.mxu0 %v783_v46  ;;  %v790_v4 = vmul.f32 %v3752_v28, %v4553_v47  ;;  %v3754_v18 = vpop.eup %3753  ;;  %v1740_v47 = vld [vmem:[#allocation6 + $0x28] sm:$0xff]  ;;  %v3453_v30 = vpack.c.bf16 %v1745_v20, %v1743_v6  ;;  %v1778_v20 = vld [vmem:[#allocation6 + $0x158] sm:$0xff] }
 0x18b   : > { %v791_v35 = vmul.f32 %v3754_v18, %v4560_v55  ;;  %v3447_v15 = vpack.c.bf16 %v1742_v9, %v1740_v47  ;;  %v1739_v55 = vld [vmem:[#allocation6 + $0x20] sm:$0xff]  ;;  %v1776_v6 = vld [vmem:[#allocation6 + $0x148] sm:$0xff] }
 0x18c   : > { %v3449_v14 = vpack.c.bf16 %v1741_v42, %v1739_v55  ;;  %v3483_v63 = vpack.c.bf16 %v1778_v20, %v1776_v6 }
 0x18d   : > { %3392 = vmatmul.mubr.f32.gmra.mrb[44].mxu0 %v783_v46  ;;  %v3756_v39 = vpop.eup %3755  ;;  %3448 = vmatprep.subr.bf16.mxu1 %v3447_v15  ;;  %v3457_v46 = vpack.c.bf16 %v1749_v33, %v1747_v49  ;;  %v1780_v49 = vld [vmem:[#allocation6 + $0x168] sm:$0xff]  ;;  %v1782_v33 = vld [vmem:[#allocation6 + $0x178] sm:$0xff] }
 0x18e   : > { %3393 = vmatprep.mubr.f32.mxu0 %v784_v40  ;;  %v792_v36 = vmul.f32 %v3756_v39, %v4563_v56  ;;  %v1744_v56 = vld [vmem:[#allocation6 + $0x48] sm:$0xff]  ;;  %v1774_v39 = vld [vmem:[#allocation6 + $0x138] sm:$0xff]  ;;  %v3487_v8 = vpack.c.bf16 %v1782_v33, %v1780_v49 }
 0x18f   : > { %v3451_v22 = vpack.c.bf16 %v1746_v45, %v1744_v56 }
 0x190   : > { %3450 = vmatpush1.bf16.xpose.msra.mxu1 %v3449_v14 }
 0x191   : > { %3394 = vmatmul.mubr.f32.gmra.mrb[46].mxu0 %v784_v40  ;;  %3452 = vmatprep.subr.bf16.mxu1 %v3451_v22  ;;  %v1758_v40 = vld [vmem:[#allocation6 + $0xb8] sm:$0xff] }
 0x192   : > { %3395 = vmatprep.mubr.f32.mxu0 %v785_v1  ;;  %v3463_v17 = vpack.c.bf16 %v1758_v40, %v1756_v24 }
 0x195   : > { %3396 = vmatmul.mubr.f32.gmra.mrb[48].mxu0 %v785_v1  ;;  %v1759_v1 = vld [vmem:[#allocation6 + $0xc0] sm:$0xff] }
 0x196   : > { %3397 = vmatprep.mubr.f32.mxu0 %v786_v51  ;;  %v3469_v21 = vpack.c.bf16 %v1761_v19, %v1759_v1 }
 0x198   : > { %3454 = vmatpush1.bf16.xpose.msra.mxu1 %v3453_v30  ;;  %v1775_v30 = vld [vmem:[#allocation6 + $0x140] sm:$0xff] }
 0x199   : > { %3398 = vmatmul.mubr.f32.gmra.mrb[50].mxu0 %v786_v51  ;;  %3456 = vmatprep.subr.bf16.mxu1 %v3455_v29  ;;  %v827_v51 = vlaneseq  ;;  %v1777_v29 = vld [vmem:[#allocation6 + $0x150] sm:$0xff] }
 0x19a   : > { %3399 = vmatprep.mubr.f32.mxu0 %v787_v34 }
 0x19b   : > { %v4817_v23 = vshrl.u32 %v827_v51, 7 }
 0x19d   : > { %3400 = vmatmul.mubr.f32.gmra.mrb[52].mxu0 %v787_v34  ;;  %6442 = vst [vmem:[#allocation12_spill] sm:$0xff] %v4817_v23  ;;  %v3475_v34 = vpack.c.bf16 %v1770_v2, %v1768_v38  ;;  %v6356_v28 = vsub.s32 1, %v4817_v23 }
 0x19e   : > { %3401 = vmatprep.mubr.f32.mxu0 %v788_v58 }
 0x1a0   : > { %3458 = vmatpush1.bf16.xpose.msra.mxu1 %v3457_v46 }
 0x1a1   : > { %3402 = vmatmul.mubr.f32.gmra.mrb[54].mxu0 %v788_v58  ;;  %3460 = vmatprep.subr.bf16.mxu1 %v3459_v31  ;;  %v6357_v58 = vsub.s32 0, %v4817_v23  ;;  %v3485_v31 = vpack.c.bf16 %v1777_v29, %v1775_v30 }
 0x1a2   : > { %3403 = vmatprep.mubr.f32.mxu0 %v789_v62 }
 0x1a5   : > { %3404 = vmatmul.mubr.f32.gmra.mrb[56].mxu0 %v789_v62  ;;  %v825_v62 = vld [vmem:[%s6343_s2] sm:$0x3] }
 0x1a6   : > { %3405 = vmatprep.mubr.f32.mxu0 %v790_v4  ;;  %v4830_v18 = vrot.slane %v825_v62, %v6356_v28 }
 0x1a8   : > { %3462 = vmatpush1.bf16.xpose.msra.mxu1 %v3461_v37 }
 0x1a9   : > { %3406 = vmatmul.mubr.f32.gmra.mrb[58].mxu0 %v790_v4  ;;  %3464 = vmatprep.subr.bf16.mxu1 %v3463_v17  ;;  %v4826_v4 = vrot.slane %v825_v62, %v6357_v58 }
 0x1aa   : > { %3407 = vmatprep.mubr.f32.mxu0 %v791_v35 }
 0x1ad   : > { %3408 = vmatmul.mubr.f32.gmra.mrb[60].mxu0 %v791_v35  ;;  %v1772_v35 = vld [vmem:[#allocation6 + $0x128] sm:$0xff] }
 0x1ae   : > { %3409 = vmatprep.mubr.f32.mxu0 %v792_v36  ;;  %v3479_v10 = vpack.c.bf16 %v1774_v39, %v1772_v35 }
 0x1b0   : > { %3466 = vmatpush1.bf16.xpose.msra.mxu1 %v3465_v0 }
 0x1b1   : > { %3410 = vmatmul.mubr.f32.gmra.mrb[62].mxu0 %v792_v36  ;;  %3468 = vmatprep.subr.bf16.mxu1 %v3467_v32  ;;  %v1781_v32 = vld [vmem:[#allocation6 + $0x170] sm:$0xff] }
 0x1b2   : > { %v3489_v51 = vpack.c.bf16 %v1781_v32, %v1779_v41 }
 0x1b8   : > { %3470 = vmatpush1.bf16.xpose.msra.mxu1 %v3469_v21 }
 0x1b9   : > { %3472 = vmatprep.subr.bf16.mxu1 %v3471_v53 }
 0x1c0   : > { %3474 = vmatpush1.bf16.xpose.msra.mxu1 %v3473_v26 }
 0x1c1   : > { %3476 = vmatprep.subr.bf16.mxu1 %v3475_v34  ;;  %v3491_v34 = vpack.c.bf16 %v1786_v48, %v1784_v5  ;;  %v1789_v5 = vld [vmem:[#allocation6 + $0x1b0] sm:$0xff] }
 0x1c8   : > { %3478 = vmatpush1.bf16.xpose.msra.mxu1 %v3477_v27 }
 0x1c9   : > { %3480 = vmatprep.subr.bf16.mxu1 %v3479_v10 }
 0x1d0   : > { %3482 = vmatpush1.bf16.xpose.msra.mxu1 %v3481_v50 }
 0x1d1   : > { %3484 = vmatprep.subr.bf16.mxu1 %v3483_v63 }
 0x1d8   : > { %3486 = vmatpush1.bf16.xpose.msra.mxu1 %v3485_v31 }
 0x1d9   : > { %3488 = vmatprep.subr.bf16.mxu1 %v3487_v8 }
 0x1e0   : > { %3490 = vmatpush1.bf16.xpose.msra.mxu1 %v3489_v51 }
 0x1e1   : > { %3492 = vmatprep.subr.bf16.mxu1 %v3491_v34 }
 0x208   : > { %v903_v36 = vpop.f32.mrb[0].mxu0 }
 0x209   : > { %v904_v60 = vadd.f32 %v903_v36, %v4826_v4  ;;  %v905_v61 = vpop.f32.mrb[1].mxu0 }
 0x20a   : > { %v906_v47 = vadd.f32 %v905_v61, %v4830_v18 }
 0x20b   : > { %v4834_v9 = vmax.f32 %v904_v60, 0.0 }
 0x20c   : > { %v4836_v15 = vmax.f32 %v906_v47, 0.0  ;;  %v909_v55 = vpop.f32.mrb[2].mxu0 }
 0x20d   : > { %v1158_v42 = vmul.f32 %v4834_v9, %v4834_v9  ;;  %v910_v14 = vadd.f32 %v909_v55, %v4826_v4  ;;  %v911_v56 = vpop.f32.mrb[3].mxu0 }
 0x20e   : > { %v1159_v45 = vmul.f32 %v4836_v15, %v4836_v15  ;;  %v912_v22 = vadd.f32 %v911_v56, %v4830_v18 }
 0x20f   : > { %v4844_v25 = vmax.f32 %v910_v14, 0.0 }
 0x210   : > { %v4846_v46 = vmax.f32 %v912_v22, 0.0  ;;  %v915_v7 = vpop.f32.mrb[4].mxu0  ;;  %v1222_v57 = vadd.f32 %v1159_v45, %v1158_v42  ;;  %v1783_v45 = vld [vmem:[#allocation6 + $0x180] sm:$0xff]  ;;  %v1785_v22 = vld [vmem:[#allocation6 + $0x190] sm:$0xff] }
 0x211   : > { %v1160_v16 = vmul.f32 %v4844_v25, %v4844_v25  ;;  %v916_v37 = vadd.f32 %v915_v7, %v4826_v4  ;;  %v917_v24 = vpop.f32.mrb[5].mxu0  ;;  %v3493_v63 = vpack.c.bf16 %v1785_v22, %v1783_v45  ;;  %v1791_v22 = vld [vmem:[#allocation6 + $0x1c0] sm:$0xff] }
 0x212   : > { %v1161_v40 = vmul.f32 %v4846_v46, %v4846_v46  ;;  %v918_v17 = vadd.f32 %v917_v24, %v4830_v18  ;;  %1223 = vadd.xlane.f32.xlu0 %v1222_v57 }
 0x213   : > { %v4854_v12 = vmax.f32 %v916_v37, 0.0  ;;  %3494 = vmatpush1.bf16.xpose.msra.mxu1 %v3493_v63 }
 0x214   : > { %v4856_v52 = vmax.f32 %v918_v17, 0.0  ;;  %v921_v0 = vpop.f32.mrb[6].mxu0  ;;  %v1225_v43 = vadd.f32 %v1161_v40, %v1160_v16 }
 0x215   : > { %v1162_v1 = vmul.f32 %v4854_v12, %v4854_v12  ;;  %v922_v19 = vadd.f32 %v921_v0, %v4826_v4  ;;  %v923_v21 = vpop.f32.mrb[7].mxu0  ;;  %v1788_v0 = vld [vmem:[#allocation6 + $0x1a8] sm:$0xff] }
 0x216   : > { %v1163_v53 = vmul.f32 %v4856_v52, %v4856_v52  ;;  %v924_v54 = vadd.f32 %v923_v21, %v4830_v18  ;;  %1226 = vadd.xlane.f32.xlu1 %v1225_v43  ;;  %v1790_v43 = vld [vmem:[#allocation6 + $0x1b8] sm:$0xff]  ;;  %v1787_v21 = vld [vmem:[#allocation6 + $0x1a0] sm:$0xff] }
 0x217   : > { %v4864_v13 = vmax.f32 %v922_v19, 0.0  ;;  %v3495_v19 = vpack.c.bf16 %v1790_v43, %v1788_v0  ;;  %v3497_v51 = vpack.c.bf16 %v1789_v5, %v1787_v21  ;;  %v1798_v21 = vld [vmem:[#allocation6 + $0x1f8] sm:$0xff] }
 0x218   : > { %v4866_v26 = vmax.f32 %v924_v54, 0.0  ;;  %v927_v38 = vpop.f32.mrb[8].mxu0  ;;  %v1228_v2 = vadd.f32 %v1163_v53, %v1162_v1 }
 0x219   : > { %v1164_v3 = vmul.f32 %v4864_v13, %v4864_v13  ;;  %v928_v59 = vadd.f32 %v927_v38, %v4826_v4  ;;  %v929_v27 = vpop.f32.mrb[9].mxu0  ;;  %3496 = vmatprep.subr.bf16.mxu1 %v3495_v19  ;;  %v1796_v19 = vld [vmem:[#allocation6 + $0x1e8] sm:$0xff] }
 0x21a   : > { %v1165_v62 = vmul.f32 %v4866_v26, %v4866_v26  ;;  %v930_v35 = vadd.f32 %v929_v27, %v4830_v18  ;;  %1229 = vadd.xlane.f32.xlu0 %v1228_v2 }
 0x21b   : > { %v4874_v39 = vmax.f32 %v928_v59, 0.0  ;;  %3498 = vmatpush1.bf16.xpose.msra.mxu1 %v3497_v51  ;;  %v1795_v51 = vld [vmem:[#allocation6 + $0x1e0] sm:$0xff] }
 0x21c   : > { %v4876_v36 = vmax.f32 %v930_v35, 0.0  ;;  %v933_v10 = vpop.f32.mrb[10].mxu0  ;;  %v1231_v44 = vadd.f32 %v1165_v62, %v1164_v3 }
 0x21d   : > { %v1166_v11 = vmul.f32 %v4874_v39, %v4874_v39  ;;  %v934_v60 = vadd.f32 %v933_v10, %v4826_v4  ;;  %v935_v61 = vpop.f32.mrb[11].mxu0 }
 0x21e   : > { %v1167_v50 = vmul.f32 %v4876_v36, %v4876_v36  ;;  %v936_v47 = vadd.f32 %v935_v61, %v4830_v18  ;;  %1232 = vadd.xlane.f32.xlu1 %v1231_v44  ;;  %v1792_v61 = vld [vmem:[#allocation6 + $0x1c8] sm:$0xff] }
 0x21f   : > { %v4884_v55 = vmax.f32 %v934_v60, 0.0 }
 0x220   : > { %v4886_v42 = vmax.f32 %v936_v47, 0.0  ;;  %v939_v14 = vpop.f32.mrb[12].mxu0  ;;  %v1234_v56 = vadd.f32 %v1167_v50, %v1166_v11  ;;  %v1794_v50 = vld [vmem:[#allocation6 + $0x1d8] sm:$0xff] }
 0x221   : > { %v1168_v6 = vmul.f32 %v4884_v55, %v4884_v55  ;;  %v940_v20 = vadd.f32 %v939_v14, %v4826_v4  ;;  %v941_v30 = vpop.f32.mrb[13].mxu0  ;;  %v3499_v45 = vpack.c.bf16 %v1794_v50, %v1792_v61 }
 0x222   : > { %v1169_v29 = vmul.f32 %v4886_v42, %v4886_v42  ;;  %v942_v49 = vadd.f32 %v941_v30, %v4830_v18  ;;  %1235 = vadd.xlane.f32.xlu0 %v1234_v56 }
 0x223   : > { %v4894_v33 = vmax.f32 %v940_v20, 0.0  ;;  %3500 = vmatprep.subr.bf16.mxu1 %v3499_v45 }
 0x224   : > { %v4896_v7 = vmax.f32 %v942_v49, 0.0  ;;  %v945_v57 = vpop.f32.mrb[14].mxu0  ;;  %v1237_v31 = vadd.f32 %v1169_v29, %v1168_v6  ;;  %v1793_v6 = vld [vmem:[#allocation6 + $0x1d0] sm:$0xff] }
 0x225   : > { %v1170_v8 = vmul.f32 %v4894_v33, %v4894_v33  ;;  %v946_v16 = vadd.f32 %v945_v57, %v4826_v4  ;;  %v947_v37 = vpop.f32.mrb[15].mxu0  ;;  %v3501_v29 = vpack.c.bf16 %v1793_v6, %v1791_v22 }
 0x226   : > { %v1171_v24 = vmul.f32 %v4896_v7, %v4896_v7  ;;  %v948_v40 = vadd.f32 %v947_v37, %v4830_v18  ;;  %1238 = vadd.xlane.f32.xlu1 %v1237_v31 }
 0x227   : > { %v4904_v17 = vmax.f32 %v946_v16, 0.0  ;;  %3502 = vmatpush1.bf16.xpose.msra.mxu1 %v3501_v29 }
 0x228   : > { %v4906_v41 = vmax.f32 %v948_v40, 0.0  ;;  %v951_v32 = vpop.f32.mrb[16].mxu0  ;;  %v1240_v1 = vadd.f32 %v1171_v24, %v1170_v8 }
 0x229   : > { %v1172_v48 = vmul.f32 %v4904_v17, %v4904_v17  ;;  %v952_v53 = vadd.f32 %v951_v32, %v4826_v4  ;;  %v953_v54 = vpop.f32.mrb[17].mxu0 }
 0x22a   : > { %v1173_v38 = vmul.f32 %v4906_v41, %v4906_v41  ;;  %v954_v2 = vadd.f32 %v953_v54, %v4830_v18  ;;  %1241 = vadd.xlane.f32.xlu0 %v1240_v1  ;;  %v3503_v54 = vpack.c.bf16 %v1798_v21, %v1796_v19 }
 0x22b   : > { %v4914_v34 = vmax.f32 %v952_v53, 0.0 }
 0x22c   : > { %v4916_v3 = vmax.f32 %v954_v2, 0.0  ;;  %v957_v59 = vpop.f32.mrb[18].mxu0  ;;  %v1243_v27 = vadd.f32 %v1173_v38, %v1172_v48  ;;  %v1797_v38 = vld [vmem:[#allocation6 + $0x1f0] sm:$0xff]  ;;  %3504 = vmatprep.subr.bf16.mxu1 %v3503_v54 }
 0x22d   : > { %v1174_v62 = vmul.f32 %v4914_v34, %v4914_v34  ;;  %v958_v35 = vadd.f32 %v957_v59, %v4826_v4  ;;  %v959_v10 = vpop.f32.mrb[19].mxu0 }
 0x22e   : > { %v1175_v44 = vmul.f32 %v4916_v3, %v4916_v3  ;;  %v960_v11 = vadd.f32 %v959_v10, %v4830_v18  ;;  %1244 = vadd.xlane.f32.xlu1 %v1243_v27 }
 0x22f   : > { %v4924_v60 = vmax.f32 %v958_v35, 0.0 }
 0x230   : > { %v4926_v47 = vmax.f32 %v960_v11, 0.0  ;;  %v963_v14 = vpop.f32.mrb[20].mxu0  ;;  %v1246_v56 = vadd.f32 %v1175_v44, %v1174_v62  ;;  %v3505_v62 = vpack.c.bf16 %v1797_v38, %v1795_v51 }
 0x231   : > { %v1176_v20 = vmul.f32 %v4924_v60, %v4924_v60  ;;  %v964_v30 = vadd.f32 %v963_v14, %v4826_v4  ;;  %v965_v63 = vpop.f32.mrb[21].mxu0 }
 0x232   : > { %v1177_v49 = vmul.f32 %v4926_v47, %v4926_v47  ;;  %v966_v57 = vadd.f32 %v965_v63, %v4830_v18  ;;  %1247 = vadd.xlane.f32.xlu0 %v1246_v56  ;;  %3506 = vmatpush1.bf16.xpose.msra.mxu1 %v3505_v62 }
 0x233   : > { %v4934_v31 = vmax.f32 %v964_v30, 0.0 }
 0x234   : > { %v4936_v8 = vmax.f32 %v966_v57, 0.0  ;;  %v969_v16 = vpop.f32.mrb[22].mxu0  ;;  %v1249_v37 = vadd.f32 %v1177_v49, %v1176_v20 }
 0x235   : > { %v1178_v24 = vmul.f32 %v4934_v31, %v4934_v31  ;;  %v970_v40 = vadd.f32 %v969_v16, %v4826_v4  ;;  %v971_v0 = vpop.f32.mrb[23].mxu0 }
 0x236   : > { %v1179_v43 = vmul.f32 %v4936_v8, %v4936_v8  ;;  %v972_v32 = vadd.f32 %v971_v0, %v4830_v18  ;;  %1250 = vadd.xlane.f32.xlu1 %v1249_v37 }
 0x237   : > { %v4944_v1 = vmax.f32 %v970_v40, 0.0 }
 0x238   : > { %v4946_v5 = vmax.f32 %v972_v32, 0.0  ;;  %v975_v48 = vpop.f32.mrb[24].mxu0  ;;  %v1252_v53 = vadd.f32 %v1179_v43, %v1178_v24 }
 0x239   : > { %v1180_v2 = vmul.f32 %v4944_v1, %v4944_v1  ;;  %v976_v59 = vadd.f32 %v975_v48, %v4826_v4  ;;  %v977_v27 = vpop.f32.mrb[25].mxu0 }
 0x23a   : > { %v1181_v35 = vmul.f32 %v4946_v5, %v4946_v5  ;;  %v978_v10 = vadd.f32 %v977_v27, %v4830_v18  ;;  %1253 = vadd.xlane.f32.xlu0 %v1252_v53 }
 0x23b   : > { %v4954_v44 = vmax.f32 %v976_v59, 0.0 }
 0x23c   : > { %v4956_v11 = vmax.f32 %v978_v10, 0.0  ;;  %v981_v61 = vpop.f32.mrb[26].mxu0  ;;  %v1255_v50 = vadd.f32 %v1181_v35, %v1180_v2 }
 0x23d   : > { %v1182_v14 = vmul.f32 %v4954_v44, %v4954_v44  ;;  %v982_v56 = vadd.f32 %v981_v61, %v4826_v4  ;;  %v983_v45 = vpop.f32.mrb[27].mxu0 }
 0x23e   : > { %v1183_v22 = vmul.f32 %v4956_v11, %v4956_v11  ;;  %v984_v6 = vadd.f32 %v983_v45, %v4830_v18  ;;  %1256 = vadd.xlane.f32.xlu1 %v1255_v50 }
 0x23f   : > { %v4964_v20 = vmax.f32 %v982_v56, 0.0 }
 0x240   : > { %v4966_v30 = vmax.f32 %v984_v6, 0.0  ;;  %v987_v63 = vpop.f32.mrb[28].mxu0  ;;  %v1258_v29 = vadd.f32 %v1183_v22, %v1182_v14 }
 0x241   : > { %v1184_v49 = vmul.f32 %v4964_v20, %v4964_v20  ;;  %v988_v57 = vadd.f32 %v987_v63, %v4826_v4  ;;  %v989_v16 = vpop.f32.mrb[29].mxu0 }
 0x242   : > { %v1185_v37 = vmul.f32 %v4966_v30, %v4966_v30  ;;  %v990_v24 = vadd.f32 %v989_v16, %v4830_v18  ;;  %1259 = vadd.xlane.f32.xlu0 %v1258_v29 }
 0x243   : > { %v4974_v40 = vmax.f32 %v988_v57, 0.0 }
 0x244   : > { %v4976_v0 = vmax.f32 %v990_v24, 0.0  ;;  %v993_v43 = vpop.f32.mrb[30].mxu0  ;;  %v1261_v32 = vadd.f32 %v1185_v37, %v1184_v49 }
 0x245   : > { %v1186_v19 = vmul.f32 %v4974_v40, %v4974_v40  ;;  %v994_v21 = vadd.f32 %v993_v43, %v4826_v4  ;;  %v995_v48 = vpop.f32.mrb[31].mxu0 }
 0x246   : > { %v1187_v53 = vmul.f32 %v4976_v0, %v4976_v0  ;;  %v996_v54 = vadd.f32 %v995_v48, %v4830_v18  ;;  %1262 = vadd.xlane.f32.xlu1 %v1261_v32 }
 0x247   : > { %v4984_v51 = vmax.f32 %v994_v21, 0.0 }
 0x248   : > { %v4986_v38 = vmax.f32 %v996_v54, 0.0  ;;  %v999_v2 = vpop.f32.mrb[32].mxu0  ;;  %v1264_v59 = vadd.f32 %v1187_v53, %v1186_v19 }
 0x249   : > { %v1188_v27 = vmul.f32 %v4984_v51, %v4984_v51  ;;  %v1000_v62 = vadd.f32 %v999_v2, %v4826_v4  ;;  %v1001_v35 = vpop.f32.mrb[33].mxu0 }
 0x24a   : > { %v1189_v10 = vmul.f32 %v4986_v38, %v4986_v38  ;;  %v1002_v61 = vadd.f32 %v1001_v35, %v4830_v18  ;;  %1265 = vadd.xlane.f32.xlu0 %v1264_v59 }
 0x24b   : > { %v4994_v50 = vmax.f32 %v1000_v62, 0.0 }
 0x24c   : > { %v4996_v14 = vmax.f32 %v1002_v61, 0.0  ;;  %v1005_v56 = vpop.f32.mrb[34].mxu0  ;;  %v1267_v45 = vadd.f32 %v1189_v10, %v1188_v27 }
 0x24d   : > { %v1190_v22 = vmul.f32 %v4994_v50, %v4994_v50  ;;  %v1006_v6 = vadd.f32 %v1005_v56, %v4826_v4  ;;  %v1007_v63 = vpop.f32.mrb[35].mxu0 }
 0x24e   : > { %v1191_v29 = vmul.f32 %v4996_v14, %v4996_v14  ;;  %v1008_v49 = vadd.f32 %v1007_v63, %v4830_v18  ;;  %1268 = vadd.xlane.f32.xlu1 %v1267_v45 }
 0x24f   : > { %v5004_v57 = vmax.f32 %v1006_v6, 0.0 }
 0x250   : > { %v5006_v16 = vmax.f32 %v1008_v49, 0.0  ;;  %v1011_v37 = vpop.f32.mrb[36].mxu0  ;;  %v1270_v24 = vadd.f32 %v1191_v29, %v1190_v22 }
 0x251   : > { %v1192_v43 = vmul.f32 %v5004_v57, %v5004_v57  ;;  %v1012_v32 = vadd.f32 %v1011_v37, %v4826_v4  ;;  %v1013_v19 = vpop.f32.mrb[37].mxu0 }
 0x252   : > { %v1193_v21 = vmul.f32 %v5006_v16, %v5006_v16  ;;  %v1014_v48 = vadd.f32 %v1013_v19, %v4830_v18  ;;  %1271 = vadd.xlane.f32.xlu0 %v1270_v24 }
 0x253   : > { %v5014_v53 = vmax.f32 %v1012_v32, 0.0 }
 0x254   : > { %v5016_v54 = vmax.f32 %v1014_v48, 0.0  ;;  %v1017_v2 = vpop.f32.mrb[38].mxu0  ;;  %v1273_v59 = vadd.f32 %v1193_v21, %v1192_v43 }
 0x255   : > { %v1194_v27 = vmul.f32 %v5014_v53, %v5014_v53  ;;  %v1018_v62 = vadd.f32 %v1017_v2, %v4826_v4  ;;  %v1019_v35 = vpop.f32.mrb[39].mxu0 }
 0x256   : > { %v1195_v10 = vmul.f32 %v5016_v54, %v5016_v54  ;;  %v1020_v61 = vadd.f32 %v1019_v35, %v4830_v18  ;;  %1274 = vadd.xlane.f32.xlu1 %v1273_v59 }
 0x257   : > { %v5024_v56 = vmax.f32 %v1018_v62, 0.0 }
 0x258   : > { %v5026_v45 = vmax.f32 %v1020_v61, 0.0  ;;  %v1023_v22 = vpop.f32.mrb[40].mxu0  ;;  %v1276_v6 = vadd.f32 %v1195_v10, %v1194_v27 }
 0x259   : > { %v1196_v63 = vmul.f32 %v5024_v56, %v5024_v56  ;;  %v1024_v29 = vadd.f32 %v1023_v22, %v4826_v4  ;;  %v1025_v49 = vpop.f32.mrb[41].mxu0 }
 0x25a   : > { %v1197_v37 = vmul.f32 %v5026_v45, %v5026_v45  ;;  %v1026_v24 = vadd.f32 %v1025_v49, %v4830_v18  ;;  %1277 = vadd.xlane.f32.xlu0 %v1276_v6 }
 0x25b   : > { %v5034_v43 = vmax.f32 %v1024_v29, 0.0 }
 0x25c   : > { %v5036_v32 = vmax.f32 %v1026_v24, 0.0  ;;  %v1029_v19 = vpop.f32.mrb[42].mxu0  ;;  %v1279_v21 = vadd.f32 %v1197_v37, %v1196_v63 }
 0x25d   : > { %v1198_v48 = vmul.f32 %v5034_v43, %v5034_v43  ;;  %v1030_v2 = vadd.f32 %v1029_v19, %v4826_v4  ;;  %v1031_v59 = vpop.f32.mrb[43].mxu0 }
 0x25e   : > { %v1199_v27 = vmul.f32 %v5036_v32, %v5036_v32  ;;  %v1032_v62 = vadd.f32 %v1031_v59, %v4830_v18  ;;  %1280 = vadd.xlane.f32.xlu1 %v1279_v21 }
 0x25f   : > { %v5044_v35 = vmax.f32 %v1030_v2, 0.0 }
 0x260   : > { %v5046_v10 = vmax.f32 %v1032_v62, 0.0  ;;  %v1035_v61 = vpop.f32.mrb[44].mxu0  ;;  %v1282_v22 = vadd.f32 %v1199_v27, %v1198_v48 }
 0x261   : > { %v1200_v6 = vmul.f32 %v5044_v35, %v5044_v35  ;;  %v1036_v63 = vadd.f32 %v1035_v61, %v4826_v4  ;;  %v1037_v29 = vpop.f32.mrb[45].mxu0 }
 0x262   : > { %v1201_v49 = vmul.f32 %v5046_v10, %v5046_v10  ;;  %v1038_v37 = vadd.f32 %v1037_v29, %v4830_v18  ;;  %1283 = vadd.xlane.f32.xlu0 %v1282_v22 }
 0x263   : > { %v5054_v24 = vmax.f32 %v1036_v63, 0.0 }
 0x264   : > { %v5056_v19 = vmax.f32 %v1038_v37, 0.0  ;;  %v1041_v21 = vpop.f32.mrb[46].mxu0  ;;  %v1285_v2 = vadd.f32 %v1201_v49, %v1200_v6 }
 0x265   : > { %v1202_v48 = vmul.f32 %v5054_v24, %v5054_v24  ;;  %v1042_v59 = vadd.f32 %v1041_v21, %v4826_v4  ;;  %v1043_v27 = vpop.f32.mrb[47].mxu0 }
 0x266   : > { %v1203_v62 = vmul.f32 %v5056_v19, %v5056_v19  ;;  %v1044_v61 = vadd.f32 %v1043_v27, %v4830_v18  ;;  %1286 = vadd.xlane.f32.xlu1 %v1285_v2 }
 0x267   : > { %v5064_v29 = vmax.f32 %v1042_v59, 0.0 }
 0x268   : > { %v5066_v22 = vmax.f32 %v1044_v61, 0.0  ;;  %v1047_v63 = vpop.f32.mrb[48].mxu0  ;;  %v1288_v37 = vadd.f32 %v1203_v62, %v1202_v48 }
 0x269   : > { %6443 = vst [vmem:[#allocation13_spill] sm:$0xff] %v5064_v29  ;;  %v1204_v6 = vmul.f32 %v5064_v29, %v5064_v29  ;;  %v1048_v49 = vadd.f32 %v1047_v63, %v4826_v4  ;;  %v1049_v28 = vpop.f32.mrb[49].mxu0 }
 0x26a   : > { %v1205_v21 = vmul.f32 %v5066_v22, %v5066_v22  ;;  %v1050_v58 = vadd.f32 %v1049_v28, %v4830_v18  ;;  %1289 = vadd.xlane.f32.xlu0 %v1288_v37 }
 0x26b   : > { %v5074_v27 = vmax.f32 %v1048_v49, 0.0 }
 0x26c   : > { %v5076_v2 = vmax.f32 %v1050_v58, 0.0  ;;  %v1053_v59 = vpop.f32.mrb[50].mxu0  ;;  %v1291_v61 = vadd.f32 %v1205_v21, %v1204_v6 }
 0x26d   : > { %6444 = vst [vmem:[#allocation14_spill] sm:$0xff] %v5074_v27  ;;  %v1206_v48 = vmul.f32 %v5074_v27, %v5074_v27  ;;  %v1054_v62 = vadd.f32 %v1053_v59, %v4826_v4  ;;  %v1055_v23 = vpop.f32.mrb[51].mxu0 }
 0x26e   : > { %6445 = vst [vmem:[#allocation15_spill] sm:$0xff] %v5076_v2  ;;  %v1207_v63 = vmul.f32 %v5076_v2, %v5076_v2  ;;  %v1056_v29 = vadd.f32 %v1055_v23, %v4830_v18  ;;  %1292 = vadd.xlane.f32.xlu1 %v1291_v61 }
 0x26f   : > { %v5084_v28 = vmax.f32 %v1054_v62, 0.0 }
 0x270   : > { %v5086_v37 = vmax.f32 %v1056_v29, 0.0  ;;  %v1059_v58 = vpop.f32.mrb[52].mxu0  ;;  %v1294_v49 = vadd.f32 %v1207_v63, %v1206_v48 }
 0x271   : > { %6446 = vst [vmem:[#allocation16_spill] sm:$0xff] %v5084_v28  ;;  %v1208_v6 = vmul.f32 %v5084_v28, %v5084_v28  ;;  %v1060_v21 = vadd.f32 %v1059_v58, %v4826_v4  ;;  %v1061_v27 = vpop.f32.mrb[53].mxu0 }
 0x272   : > { %6447 = vst [vmem:[#allocation17_spill] sm:$0xff] %v5086_v37  ;;  %v1209_v59 = vmul.f32 %v5086_v37, %v5086_v37  ;;  %v1062_v2 = vadd.f32 %v1061_v27, %v4830_v18  ;;  %1295 = vadd.xlane.f32.xlu0 %v1294_v49 }
 0x273   : > { %v5094_v23 = vmax.f32 %v1060_v21, 0.0 }
 0x274   : > { %v5096_v61 = vmax.f32 %v1062_v2, 0.0  ;;  %v1065_v29 = vpop.f32.mrb[54].mxu0  ;;  %v1297_v62 = vadd.f32 %v1209_v59, %v1208_v6 }
 0x275   : > { %6448 = vst [vmem:[#allocation18_spill] sm:$0xff] %v5094_v23  ;;  %v1210_v48 = vmul.f32 %v5094_v23, %v5094_v23  ;;  %v1066_v63 = vadd.f32 %v1065_v29, %v4826_v4  ;;  %v1067_v28 = vpop.f32.mrb[55].mxu0 }
 0x276   : > { %6449 = vst [vmem:[#allocation19_spill] sm:$0xff] %v5096_v61  ;;  %v1211_v58 = vmul.f32 %v5096_v61, %v5096_v61  ;;  %v1068_v37 = vadd.f32 %v1067_v28, %v4830_v18  ;;  %1298 = vadd.xlane.f32.xlu1 %v1297_v62 }
 0x277   : > { %v5104_v27 = vmax.f32 %v1066_v63, 0.0 }
 0x278   : > { %v5106_v49 = vmax.f32 %v1068_v37, 0.0  ;;  %v1071_v2 = vpop.f32.mrb[56].mxu0  ;;  %v1300_v21 = vadd.f32 %v1211_v58, %v1210_v48 }
 0x279   : > { %6450 = vst [vmem:[#allocation20_spill] sm:$0xff] %v5104_v27  ;;  %v1212_v6 = vmul.f32 %v5104_v27, %v5104_v27  ;;  %v1072_v59 = vadd.f32 %v1071_v2, %v4826_v4  ;;  %v1073_v23 = vpop.f32.mrb[57].mxu0 }
 0x27a   : > { %6451 = vst [vmem:[#allocation21_spill] sm:$0xff] %v5106_v49  ;;  %v1213_v29 = vmul.f32 %v5106_v49, %v5106_v49  ;;  %v1074_v61 = vadd.f32 %v1073_v23, %v4830_v18  ;;  %1301 = vadd.xlane.f32.xlu0 %v1300_v21 }
 0x27b   : > { %v5114_v28 = vmax.f32 %v1072_v59, 0.0 }
 0x27c   : > { %v5116_v62 = vmax.f32 %v1074_v61, 0.0  ;;  %v1077_v37 = vpop.f32.mrb[58].mxu0  ;;  %v1303_v63 = vadd.f32 %v1213_v29, %v1212_v6 }
 0x27d   : > { %6452 = vst [vmem:[#allocation22_spill] sm:$0xff] %v5114_v28  ;;  %v1214_v48 = vmul.f32 %v5114_v28, %v5114_v28  ;;  %v1078_v58 = vadd.f32 %v1077_v37, %v4826_v4  ;;  %v1079_v27 = vpop.f32.mrb[59].mxu0 }
 0x27e   : > { %6453 = vst [vmem:[#allocation23_spill] sm:$0xff] %v5116_v62  ;;  %v1215_v2 = vmul.f32 %v5116_v62, %v5116_v62  ;;  %v1080_v49 = vadd.f32 %v1079_v27, %v4830_v18  ;;  %1304 = vadd.xlane.f32.xlu1 %v1303_v63 }
 0x27f   : > { %v5124_v23 = vmax.f32 %v1078_v58, 0.0 }
 0x280   : > { %v5126_v21 = vmax.f32 %v1080_v49, 0.0  ;;  %v1083_v61 = vpop.f32.mrb[60].mxu0  ;;  %v1306_v59 = vadd.f32 %v1215_v2, %v1214_v48 }
 0x281   : > { %6454 = vst [vmem:[#allocation24_spill] sm:$0xff] %v5124_v23  ;;  %v1216_v6 = vmul.f32 %v5124_v23, %v5124_v23  ;;  %v1084_v29 = vadd.f32 %v1083_v61, %v4826_v4  ;;  %v1085_v28 = vpop.f32.mrb[61].mxu0 }
 0x282   : > { %6455 = vst [vmem:[#allocation25_spill] sm:$0xff] %v5126_v21  ;;  %v1217_v37 = vmul.f32 %v5126_v21, %v5126_v21  ;;  %v1086_v62 = vadd.f32 %v1085_v28, %v4830_v18  ;;  %1307 = vadd.xlane.f32.xlu0 %v1306_v59 }
 0x283   : > { %v5134_v27 = vmax.f32 %v1084_v29, 0.0 }
 0x284   : > { %v5136_v63 = vmax.f32 %v1086_v62, 0.0  ;;  %v1089_v49 = vpop.f32.mrb[62].mxu0  ;;  %v1309_v58 = vadd.f32 %v1217_v37, %v1216_v6 }
 0x285   : > { %6456 = vst [vmem:[#allocation26_spill] sm:$0xff] %v5134_v27  ;;  %v1218_v48 = vmul.f32 %v5134_v27, %v5134_v27  ;;  %v1090_v2 = vadd.f32 %v1089_v49, %v4826_v4  ;;  %v1091_v23 = vpop.f32.mrb[63].mxu0 }
 0x286   : > { %6457 = vst [vmem:[#allocation27_spill] sm:$0xff] %v5136_v63  ;;  %v1219_v61 = vmul.f32 %v5136_v63, %v5136_v63  ;;  %v1092_v21 = vadd.f32 %v1091_v23, %v4830_v18  ;;  %1310 = vadd.xlane.f32.xlu1 %v1309_v58 }
 0x287   : > { %v5144_v28 = vmax.f32 %v1090_v2, 0.0 }
 0x288   : > { %v5146_v59 = vmax.f32 %v1092_v21, 0.0  ;;  %v1312_v62 = vadd.f32 %v1219_v61, %v1218_v48 }
 0x289   : > { %6458 = vst [vmem:[#allocation28_spill] sm:$0xff] %v5144_v28  ;;  %v1220_v6 = vmul.f32 %v5144_v28, %v5144_v28 }
 0x28a   : > { %6459 = vst [vmem:[#allocation29_spill] sm:$0xff] %v5146_v59  ;;  %v1221_v29 = vmul.f32 %v5146_v59, %v5146_v59  ;;  %1313 = vadd.xlane.f32.xlu0 %v1312_v62 }
 0x28c   : > { %v1315_v4 = vadd.f32 %v1221_v29, %v1220_v6 }
 0x28e   : > { %1316 = vadd.xlane.f32.xlu1 %v1315_v4 }
 0x29f   : > { %v5152_v37 = vpop.xlane.xlu0 %1223 }
 0x2a0   : > { %6460 = vst [vmem:[#allocation30_spill] sm:$0xff] %v5152_v37  ;;  %3757 = vrsqrt.f32 %v5152_v37  ;;  %vm1385_vm0 = vcmp.eq.f32.partialorder %v5152_v37, inf  ;;  %v1388_v48 = vand.u32 2147483648, %v5152_v37  ;;  %vm1387_vm1 = vcmp.eq.f32.partialorder %v5152_v37, 0.0 }
 0x2a3   : > { %v5155_v18 = vpop.xlane.xlu1 %1226 }
 0x2a4   : > { %6461 = vst [vmem:[#allocation31_spill] sm:$0xff] %v5155_v18  ;;  %3759 = vrsqrt.f32 %v5155_v18  ;;  %vm1392_vm2 = vcmp.eq.f32.partialorder %v5155_v18, inf  ;;  %vm1394_vm3 = vcmp.eq.f32.partialorder %v5155_v18, 0.0 }
 0x2a7   : > { %v5158_v23 = vpop.xlane.xlu0 %1229 }
 0x2a8   : > { %6462 = vst [vmem:[#allocation32_spill] sm:$0xff] %v5158_v23  ;;  %3761 = vrsqrt.f32 %v5158_v23  ;;  %vm1399_vm4 = vcmp.eq.f32.partialorder %v5158_v23, inf  ;;  %vm1401_vm5 = vcmp.eq.f32.partialorder %v5158_v23, 0.0 }
 0x2aa   : > { %v3758_v21 = vpop.eup %3757 }
 0x2ab   : > { %v1384_v49 = vmul.f32 %v3758_v21, %v5152_v37  ;;  %v5162_v58 = vpop.xlane.xlu1 %1232  ;;  %v1395_v21 = vand.u32 2147483648, %v5155_v18 }
 0x2ac   : > { %6463 = vst [vmem:[#allocation33_spill] sm:$0xff] %v5162_v58  ;;  %3763 = vrsqrt.f32 %v5162_v58  ;;  %vm1406_vm6 = vcmp.eq.f32.partialorder %v5162_v58, inf  ;;  %vm1408_vm7 = vcmp.eq.f32.partialorder %v5162_v58, 0.0 }
 0x2ad   : > { %v1386_v2 = vsel %vm1385_vm0, %v5152_v37, %v1384_v49 }
 0x2ae   : > { %v3760_v61 = vpop.eup %3759  ;;  %v1389_v62 = vsel %vm1387_vm1, %v1388_v48, %v1386_v2 }
 0x2af   : > { %v1391_v6 = vmul.f32 %v3760_v61, %v5155_v18  ;;  %v5170_v29 = vpop.xlane.xlu0 %1235  ;;  %v1607_v4 = vadd.f32 0.0001, %v1389_v62  ;;  %v1402_v62 = vand.u32 2147483648, %v5158_v23 }
 0x2b0   : > { %3765 = vrsqrt.f32 %v5170_v29  ;;  %vm1413_vm8 = vcmp.eq.f32.partialorder %v5170_v29, inf  ;;  %vm1415_vm9 = vcmp.eq.f32.partialorder %v5170_v29, 0.0 }
 0x2b1   : > { %v1393_v28 = vsel %vm1392_vm2, %v5155_v18, %v1391_v6  ;;  %3767 = vrcp.f32 %v1607_v4 }
 0x2b2   : > { %v3762_v49 = vpop.eup %3761  ;;  %v1396_v37 = vsel %vm1394_vm3, %v1395_v21, %v1393_v28 }
 0x2b3   : > { %v1398_v48 = vmul.f32 %v3762_v49, %v5158_v23  ;;  %v5178_v2 = vpop.xlane.xlu1 %1238  ;;  %v1608_v61 = vadd.f32 0.0001, %v1396_v37  ;;  %v1409_v37 = vand.u32 2147483648, %v5162_v58 }
 0x2b4   : > { %3769 = vrsqrt.f32 %v5178_v2  ;;  %vm1420_vm10 = vcmp.eq.f32.partialorder %v5178_v2, inf  ;;  %vm1422_vm11 = vcmp.eq.f32.partialorder %v5178_v2, 0.0 }
 0x2b5   : > { %v1400_v59 = vsel %vm1399_vm4, %v5158_v23, %v1398_v48  ;;  %3771 = vrcp.f32 %v1608_v61 }
 0x2b6   : > { %v3764_v6 = vpop.eup %3763  ;;  %v1403_v4 = vsel %vm1401_vm5, %v1402_v62, %v1400_v59 }
 0x2b7   : > { %v1405_v28 = vmul.f32 %v3764_v6, %v5162_v58  ;;  %v5186_v21 = vpop.xlane.xlu0 %1241  ;;  %v1609_v49 = vadd.f32 0.0001, %v1403_v4  ;;  %v1416_v4 = vand.u32 2147483648, %v5170_v29 }
 0x2b8   : > { %3773 = vrsqrt.f32 %v5186_v21  ;;  %vm1427_vm12 = vcmp.eq.f32.partialorder %v5186_v21, inf  ;;  %vm1429_vm13 = vcmp.eq.f32.partialorder %v5186_v21, 0.0 }
 0x2b9   : > { %v1407_v18 = vsel %vm1406_vm6, %v5162_v58, %v1405_v28  ;;  %3775 = vrcp.f32 %v1609_v49 }
 0x2ba   : > { %v3766_v48 = vpop.eup %3765  ;;  %v1410_v61 = vsel %vm1408_vm7, %v1409_v37, %v1407_v18 }
 0x2bb   : > { %v3768_v23 = vpop.eup %3767  ;;  %v1412_v59 = vmul.f32 %v3766_v48, %v5170_v29  ;;  %v5194_v62 = vpop.xlane.xlu1 %1244  ;;  %v1610_v6 = vadd.f32 0.0001, %v1410_v61 }
 0x2bc   : > { %3777 = vrsqrt.f32 %v5194_v62  ;;  %v1672_v49 = vmul.f32 %v3768_v23, %v4836_v15  ;;  %v1671_v18 = vmul.f32 %v3768_v23, %v4834_v9  ;;  %vm1434_vm14 = vcmp.eq.f32.partialorder %v5194_v62, inf }
 0x2bd   : > { %v1414_v28 = vsel %vm1413_vm8, %v5170_v29, %v1412_v59  ;;  %3779 = vrcp.f32 %v1610_v6  ;;  %v1423_v59 = vand.u32 2147483648, %v5178_v2  ;;  %vm1436_vm15 = vcmp.eq.f32.partialorder %v5194_v62, 0.0 }
 0x2be   : > { %v3770_v37 = vpop.eup %3769  ;;  %v1417_v48 = vsel %vm1415_vm9, %v1416_v4, %v1414_v28  ;;  %1875 = vmatprep.mubr.f32.mxu1 %v1672_v49 }
 0x2bf   : > { %v3772_v58 = vpop.eup %3771  ;;  %v1419_v61 = vmul.f32 %v3770_v37, %v5178_v2  ;;  %v5204_v27 = vpop.xlane.xlu0 %1247  ;;  %v1611_v63 = vadd.f32 0.0001, %v1417_v48  ;;  %1876 = vmatmul.mubr.f32.vlgmr.msra.gmra.mrb[0].mxu1 %v1671_v18  ;;  %v1430_v18 = vand.u32 2147483648, %v5186_v21 }
 0x2c0   : > { %3781 = vrsqrt.f32 %v5204_v27  ;;  %v1674_v15 = vmul.f32 %v3772_v58, %v4846_v46  ;;  %v1673_v23 = vmul.f32 %v3772_v58, %v4844_v25  ;;  %vm1441_vm0 = vcmp.eq.f32.partialorder %v5204_v27, inf }
 0x2c1   : > { %v1421_v9 = vsel %vm1420_vm10, %v5178_v2, %v1419_v61  ;;  %3783 = vrcp.f32 %v1611_v63  ;;  %vm1443_vm1 = vcmp.eq.f32.partialorder %v5204_v27, 0.0 }
 0x2c2   : > { %v3774_v6 = vpop.eup %3773  ;;  %v1424_v4 = vsel %vm1422_vm11, %v1423_v59, %v1421_v9  ;;  %1881 = vmatprep.mubr.f32.mxu1 %v1674_v15 }
 0x2c3   : > { %v3776_v28 = vpop.eup %3775  ;;  %v1426_v49 = vmul.f32 %v3774_v6, %v5186_v21  ;;  %v5214_v37 = vpop.xlane.xlu1 %1250  ;;  %v1612_v48 = vadd.f32 0.0001, %v1424_v4  ;;  %1882 = vmatmul.mubr.f32.gmra.mrb[2].mxu1 %v1673_v23  ;;  %v1437_v23 = vand.u32 2147483648, %v5194_v62 }
 0x2c4   : > { %3785 = vrsqrt.f32 %v5214_v37  ;;  %v1676_v46 = vmul.f32 %v3776_v28, %v4856_v52  ;;  %v1675_v63 = vmul.f32 %v3776_v28, %v4854_v12  ;;  %vm1448_vm2 = vcmp.eq.f32.partialorder %v5214_v37, inf }
 0x2c5   : > { %v1428_v25 = vsel %vm1427_vm12, %v5186_v21, %v1426_v49  ;;  %3787 = vrcp.f32 %v1612_v48  ;;  %vm1450_vm3 = vcmp.eq.f32.partialorder %v5214_v37, 0.0 }
 0x2c6   : > { %v3778_v58 = vpop.eup %3777  ;;  %v1431_v61 = vsel %vm1429_vm13, %v1430_v18, %v1428_v25  ;;  %1887 = vmatprep.mubr.f32.mxu1 %v1676_v46 }
 0x2c7   : > { %v3780_v59 = vpop.eup %3779  ;;  %v1433_v9 = vmul.f32 %v3778_v58, %v5194_v62  ;;  %v5224_v15 = vpop.xlane.xlu0 %1253  ;;  %v1613_v6 = vadd.f32 0.0001, %v1431_v61  ;;  %1888 = vmatmul.mubr.f32.gmra.mrb[4].mxu1 %v1675_v63  ;;  %v1444_v63 = vand.u32 2147483648, %v5204_v27 }
 0x2c8   : > { %3789 = vrsqrt.f32 %v5224_v15  ;;  %v1678_v52 = vmul.f32 %v3780_v59, %v4866_v26  ;;  %v1677_v4 = vmul.f32 %v3780_v59, %v4864_v13  ;;  %vm1455_vm4 = vcmp.eq.f32.partialorder %v5224_v15, inf }
 0x2c9   : > { %v1435_v12 = vsel %vm1434_vm14, %v5194_v62, %v1433_v9  ;;  %3791 = vrcp.f32 %v1613_v6  ;;  %vm1457_vm5 = vcmp.eq.f32.partialorder %v5224_v15, 0.0 }
 0x2ca   : > { %v3782_v28 = vpop.eup %3781  ;;  %v1438_v49 = vsel %vm1436_vm15, %v1437_v23, %v1435_v12  ;;  %1893 = vmatprep.mubr.f32.mxu1 %v1678_v52  ;;  %v1451_v52 = vand.u32 2147483648, %v5214_v37 }
 0x2cb   : > { %v3784_v48 = vpop.eup %3783  ;;  %v1440_v18 = vmul.f32 %v3782_v28, %v5204_v27  ;;  %v5234_v25 = vpop.xlane.xlu1 %1256  ;;  %v1614_v46 = vadd.f32 0.0001, %v1438_v49  ;;  %1894 = vmatmul.mubr.f32.gmra.mrb[6].mxu1 %v1677_v4 }
 0x2cc   : > { %3793 = vrsqrt.f32 %v5234_v25  ;;  %v1680_v26 = vmul.f32 %v3784_v48, %v4876_v36  ;;  %v1679_v58 = vmul.f32 %v3784_v48, %v4874_v39  ;;  %vm1462_vm6 = vcmp.eq.f32.partialorder %v5234_v25, inf }
 0x2cd   : > { %v1442_v13 = vsel %vm1441_vm0, %v5204_v27, %v1440_v18  ;;  %3795 = vrcp.f32 %v1614_v46  ;;  %vm1464_vm7 = vcmp.eq.f32.partialorder %v5234_v25, 0.0 }
 0x2ce   : > { %v3786_v61 = vpop.eup %3785  ;;  %v1445_v59 = vsel %vm1443_vm1, %v1444_v63, %v1442_v13  ;;  %1899 = vmatprep.mubr.f32.mxu1 %v1680_v26  ;;  %v1458_v13 = vand.u32 2147483648, %v5224_v15 }
 0x2cf   : > { %v3788_v9 = vpop.eup %3787  ;;  %v1447_v6 = vmul.f32 %v3786_v61, %v5214_v37  ;;  %v5244_v23 = vpop.xlane.xlu0 %1259  ;;  %v1615_v12 = vadd.f32 0.0001, %v1445_v59  ;;  %1900 = vmatmul.mubr.f32.gmra.mrb[8].mxu1 %v1679_v58 }
 0x2d0   : > { %3797 = vrsqrt.f32 %v5244_v23  ;;  %v1682_v36 = vmul.f32 %v3788_v9, %v4886_v42  ;;  %v1681_v4 = vmul.f32 %v3788_v9, %v4884_v55  ;;  %vm1469_vm8 = vcmp.eq.f32.partialorder %v5244_v23, inf }
 0x2d1   : > { %v1449_v39 = vsel %vm1448_vm2, %v5214_v37, %v1447_v6  ;;  %3799 = vrcp.f32 %v1615_v12  ;;  %vm1471_vm9 = vcmp.eq.f32.partialorder %v5244_v23, 0.0 }
 0x2d2   : > { %v3790_v28 = vpop.eup %3789  ;;  %v1452_v49 = vsel %vm1450_vm3, %v1451_v52, %v1449_v39  ;;  %1905 = vmatprep.mubr.f32.mxu1 %v1682_v36  ;;  %v1465_v52 = vand.u32 2147483648, %v5234_v25 }
 0x2d3   : > { %v3792_v48 = vpop.eup %3791  ;;  %v1454_v18 = vmul.f32 %v3790_v28, %v5224_v15  ;;  %v5254_v46 = vpop.xlane.xlu1 %1262  ;;  %v1616_v63 = vadd.f32 0.0001, %v1452_v49  ;;  %1906 = vmatmul.mubr.f32.gmra.mrb[10].mxu1 %v1681_v4 }
 0x2d4   : > { %3801 = vrsqrt.f32 %v5254_v46  ;;  %v1684_v42 = vmul.f32 %v3792_v48, %v4896_v7  ;;  %v1683_v26 = vmul.f32 %v3792_v48, %v4894_v33  ;;  %vm1476_vm10 = vcmp.eq.f32.partialorder %v5254_v46, inf }
 0x2d5   : > { %v1456_v55 = vsel %vm1455_vm4, %v5224_v15, %v1454_v18  ;;  %3803 = vrcp.f32 %v1616_v63  ;;  %v1472_v63 = vand.u32 2147483648, %v5244_v23  ;;  %vm1478_vm11 = vcmp.eq.f32.partialorder %v5254_v46, 0.0 }
 0x2d6   : > { %v3794_v58 = vpop.eup %3793  ;;  %v1459_v61 = vsel %vm1457_vm5, %v1458_v13, %v1456_v55  ;;  %1911 = vmatprep.mubr.f32.mxu1 %v1684_v42 }
 0x2d7   : > { %v3796_v59 = vpop.eup %3795  ;;  %v1461_v9 = vmul.f32 %v3794_v58, %v5234_v25  ;;  %v5264_v6 = vpop.xlane.xlu0 %1265  ;;  %v1617_v12 = vadd.f32 0.0001, %v1459_v61  ;;  %1912 = vmatmul.mubr.f32.gmra.mrb[12].mxu1 %v1683_v26 }
 0x2d8   : > { %3805 = vrsqrt.f32 %v5264_v6  ;;  %v1686_v7 = vmul.f32 %v3796_v59, %v4906_v41  ;;  %v1685_v39 = vmul.f32 %v3796_v59, %v4904_v17  ;;  %vm1483_vm12 = vcmp.eq.f32.partialorder %v5264_v6, inf }
 0x2d9   : > { %v1463_v33 = vsel %vm1462_vm6, %v5234_v25, %v1461_v9  ;;  %3807 = vrcp.f32 %v1617_v12  ;;  %v1479_v9 = vand.u32 2147483648, %v5254_v46  ;;  %vm1485_vm13 = vcmp.eq.f32.partialorder %v5264_v6, 0.0 }
 0x2da   : > { %v3798_v36 = vpop.eup %3797  ;;  %v1466_v4 = vsel %vm1464_vm7, %v1465_v52, %v1463_v33  ;;  %1917 = vmatprep.mubr.f32.mxu1 %v1686_v7 }
 0x2db   : > { %v3800_v28 = vpop.eup %3799  ;;  %v1468_v49 = vmul.f32 %v3798_v36, %v5244_v23  ;;  %v5274_v48 = vpop.xlane.xlu1 %1268  ;;  %v1618_v18 = vadd.f32 0.0001, %v1466_v4  ;;  %1918 = vmatmul.mubr.f32.gmra.mrb[14].mxu1 %v1685_v39 }
 0x2dc   : > { %3809 = vrsqrt.f32 %v5274_v48  ;;  %v1688_v41 = vmul.f32 %v3800_v28, %v4916_v3  ;;  %v1687_v13 = vmul.f32 %v3800_v28, %v4914_v34  ;;  %v1486_v28 = vand.u32 2147483648, %v5264_v6 }
 0x2dd   : > { %v1470_v17 = vsel %vm1469_vm8, %v5244_v23, %v1468_v49  ;;  %3811 = vrcp.f32 %v1618_v18  ;;  %vm1490_vm14 = vcmp.eq.f32.partialorder %v5274_v48, inf  ;;  %vm1492_vm15 = vcmp.eq.f32.partialorder %v5274_v48, 0.0 }
 0x2de   : > { %v3802_v55 = vpop.eup %3801  ;;  %v1473_v42 = vsel %vm1471_vm9, %v1472_v63, %v1470_v17  ;;  %1923 = vmatprep.mubr.f32.mxu1 %v1688_v41 }
 0x2df   : > { %v3804_v26 = vpop.eup %3803  ;;  %v1475_v58 = vmul.f32 %v3802_v55, %v5254_v46  ;;  %v5284_v61 = vpop.xlane.xlu0 %1271  ;;  %v1619_v59 = vadd.f32 0.0001, %v1473_v42  ;;  %1924 = vmatmul.mubr.f32.gmra.mrb[16].mxu1 %v1687_v13  ;;  %v1493_v42 = vand.u32 2147483648, %v5274_v48 }
 0x2e0   : > { %3813 = vrsqrt.f32 %v5284_v61  ;;  %v1690_v3 = vmul.f32 %v3804_v26, %v4926_v47  ;;  %v1689_v12 = vmul.f32 %v3804_v26, %v4924_v60  ;;  %vm1497_vm0 = vcmp.eq.f32.partialorder %v5284_v61, inf }
 0x2e1   : > { %v1477_v34 = vsel %vm1476_vm10, %v5254_v46, %v1475_v58  ;;  %3815 = vrcp.f32 %v1619_v59  ;;  %vm1499_vm1 = vcmp.eq.f32.partialorder %v5284_v61, 0.0 }
 0x2e2   : > { %v3806_v52 = vpop.eup %3805  ;;  %v1480_v33 = vsel %vm1478_vm11, %v1479_v9, %v1477_v34  ;;  %1929 = vmatprep.mubr.f32.mxu1 %v1690_v3 }
 0x2e3   : > { %v3808_v7 = vpop.eup %3807  ;;  %v1482_v39 = vmul.f32 %v3806_v52, %v5264_v6  ;;  %v5294_v36 = vpop.xlane.xlu1 %1274  ;;  %v1620_v4 = vadd.f32 0.0001, %v1480_v33  ;;  %1930 = vmatmul.mubr.f32.gmra.mrb[18].mxu1 %v1689_v12  ;;  %v1500_v52 = vand.u32 2147483648, %v5284_v61 }
 0x2e4   : > { %3817 = vrsqrt.f32 %v5294_v36  ;;  %v1692_v47 = vmul.f32 %v3808_v7, %v4936_v8  ;;  %v1691_v49 = vmul.f32 %v3808_v7, %v4934_v31  ;;  %vm1504_vm2 = vcmp.eq.f32.partialorder %v5294_v36, inf }
 0x2e5   : > { %v1484_v60 = vsel %vm1483_vm12, %v5264_v6, %v1482_v39  ;;  %3819 = vrcp.f32 %v1620_v4  ;;  %vm1506_vm3 = vcmp.eq.f32.partialorder %v5294_v36, 0.0 }
 0x2e6   : > { %v3810_v18 = vpop.eup %3809  ;;  %v1487_v63 = vsel %vm1485_vm13, %v1486_v28, %v1484_v60  ;;  %1935 = vmatprep.mubr.f32.mxu1 %v1692_v47 }
 0x2e7   : > { %v3812_v17 = vpop.eup %3811  ;;  %v1489_v41 = vmul.f32 %v3810_v18, %v5274_v48  ;;  %v5304_v13 = vpop.xlane.xlu0 %1277  ;;  %v1621_v55 = vadd.f32 0.0001, %v1487_v63  ;;  %1936 = vmatmul.mubr.f32.gmra.mrb[20].mxu1 %v1691_v49  ;;  %v1507_v49 = vand.u32 2147483648, %v5294_v36 }
 0x2e8   : > { %3821 = vrsqrt.f32 %v5304_v13  ;;  %v1694_v8 = vmul.f32 %v3812_v17, %v4946_v5  ;;  %v1693_v26 = vmul.f32 %v3812_v17, %v4944_v1  ;;  %vm1511_vm4 = vcmp.eq.f32.partialorder %v5304_v13, inf }
 0x2e9   : > { %v1491_v31 = vsel %vm1490_vm14, %v5274_v48, %v1489_v41  ;;  %3823 = vrcp.f32 %v1621_v55  ;;  %vm1513_vm5 = vcmp.eq.f32.partialorder %v5304_v13, 0.0 }
 0x2ea   : > { %v3814_v58 = vpop.eup %3813  ;;  %v1494_v59 = vsel %vm1492_vm15, %v1493_v42, %v1491_v31  ;;  %1941 = vmatprep.mubr.f32.mxu1 %v1694_v8  ;;  %v1514_v8 = vand.u32 2147483648, %v5304_v13 }
 0x2eb   : > { %v3816_v9 = vpop.eup %3815  ;;  %v1496_v34 = vmul.f32 %v3814_v58, %v5284_v61  ;;  %v5314_v3 = vpop.xlane.xlu1 %1280  ;;  %v1622_v12 = vadd.f32 0.0001, %v1494_v59  ;;  %1942 = vmatmul.mubr.f32.gmra.mrb[22].mxu1 %v1693_v26 }
 0x2ec   : > { %3825 = vrsqrt.f32 %v5314_v3  ;;  %v1696_v5 = vmul.f32 %v3816_v9, %v4956_v11  ;;  %v1695_v33 = vmul.f32 %v3816_v9, %v4954_v44  ;;  %vm1518_vm6 = vcmp.eq.f32.partialorder %v5314_v3, inf }
 0x2ed   : > { %v1498_v1 = vsel %vm1497_vm0, %v5284_v61, %v1496_v34  ;;  %3827 = vrcp.f32 %v1622_v12  ;;  %vm1520_vm7 = vcmp.eq.f32.partialorder %v5314_v3, 0.0 }
 0x2ee   : > { %v3818_v7 = vpop.eup %3817  ;;  %v1501_v39 = vsel %vm1499_vm1, %v1500_v52, %v1498_v1  ;;  %1947 = vmatprep.mubr.f32.mxu1 %v1696_v5  ;;  %v1521_v1 = vand.u32 2147483648, %v5314_v3 }
 0x2ef   : > { %v3820_v4 = vpop.eup %3819  ;;  %v1503_v28 = vmul.f32 %v3818_v7, %v5294_v36  ;;  %v5324_v60 = vpop.xlane.xlu0 %1283  ;;  %v1623_v47 = vadd.f32 0.0001, %v1501_v39  ;;  %1948 = vmatmul.mubr.f32.gmra.mrb[24].mxu1 %v1695_v33 }
 0x2f0   : > { %6464 = vst [vmem:[#allocation34_spill] sm:$0xff] %v5324_v60  ;;  %3829 = vrsqrt.f32 %v5324_v60  ;;  %v1698_v11 = vmul.f32 %v3820_v4, %v4966_v30  ;;  %v1697_v18 = vmul.f32 %v3820_v4, %v4964_v20  ;;  %vm1525_vm8 = vcmp.eq.f32.partialorder %v5324_v60, inf }
 0x2f1   : > { %v1505_v44 = vsel %vm1504_vm2, %v5294_v36, %v1503_v28  ;;  %3831 = vrcp.f32 %v1623_v47  ;;  %vm1527_vm9 = vcmp.eq.f32.partialorder %v5324_v60, 0.0 }
 0x2f2   : > { %v3822_v63 = vpop.eup %3821  ;;  %v1508_v17 = vsel %vm1506_vm3, %v1507_v49, %v1505_v44  ;;  %1953 = vmatprep.mubr.f32.mxu1 %v1698_v11  ;;  %v1528_v49 = vand.u32 2147483648, %v5324_v60 }
 0x2f3   : > { %v3824_v41 = vpop.eup %3823  ;;  %v1510_v55 = vmul.f32 %v3822_v63, %v5304_v13  ;;  %v5334_v42 = vpop.xlane.xlu1 %1286  ;;  %v1624_v31 = vadd.f32 0.0001, %v1508_v17  ;;  %1954 = vmatmul.mubr.f32.gmra.mrb[26].mxu1 %v1697_v18 }
 0x2f4   : > { %6465 = vst [vmem:[#allocation35_spill] sm:$0xff] %v5334_v42  ;;  %3833 = vrsqrt.f32 %v5334_v42  ;;  %v1700_v30 = vmul.f32 %v3824_v41, %v4976_v0  ;;  %v1699_v26 = vmul.f32 %v3824_v41, %v4974_v40  ;;  %vm1532_vm10 = vcmp.eq.f32.partialorder %v5334_v42, inf }
 0x2f5   : > { %v1512_v20 = vsel %vm1511_vm4, %v5304_v13, %v1510_v55  ;;  %3835 = vrcp.f32 %v1624_v31  ;;  %vm1534_vm11 = vcmp.eq.f32.partialorder %v5334_v42, 0.0  ;;  %v1535_v31 = vand.u32 2147483648, %v5334_v42 }
 0x2f6   : > { %v3826_v58 = vpop.eup %3825  ;;  %v1515_v59 = vsel %vm1513_vm5, %v1514_v8, %v1512_v20  ;;  %1959 = vmatprep.mubr.f32.mxu1 %v1700_v30 }
 0x2f7   : > { %v3828_v9 = vpop.eup %3827  ;;  %v1517_v34 = vmul.f32 %v3826_v58, %v5314_v3  ;;  %v5344_v12 = vpop.xlane.xlu0 %1289  ;;  %v1625_v52 = vadd.f32 0.0001, %v1515_v59  ;;  %1960 = vmatmul.mubr.f32.gmra.mrb[28].mxu1 %v1699_v26 }
 0x2f8   : > { %6466 = vst [vmem:[#allocation36_spill] sm:$0xff] %v5344_v12  ;;  %3837 = vrsqrt.f32 %v5344_v12  ;;  %v1702_v0 = vmul.f32 %v3828_v9, %v4986_v38  ;;  %v1701_v5 = vmul.f32 %v3828_v9, %v4984_v51  ;;  %vm1539_vm12 = vcmp.eq.f32.partialorder %v5344_v12, inf }
 0x2f9   : > { %v1519_v40 = vsel %vm1518_vm6, %v5314_v3, %v1517_v34  ;;  %3839 = vrcp.f32 %v1625_v52  ;;  %vm1541_vm13 = vcmp.eq.f32.partialorder %v5344_v12, 0.0  ;;  %v1542_v34 = vand.u32 2147483648, %v5344_v12 }
 0x2fa   : > { %v3830_v33 = vpop.eup %3829  ;;  %v1522_v7 = vsel %vm1520_vm7, %v1521_v1, %v1519_v40  ;;  %1965 = vmatprep.mubr.f32.mxu1 %v1702_v0 }
 0x2fb   : > { %v3832_v39 = vpop.eup %3831  ;;  %v1524_v4 = vmul.f32 %v3830_v33, %v5324_v60  ;;  %v5354_v28 = vpop.xlane.xlu1 %1292  ;;  %v1626_v47 = vadd.f32 0.0001, %v1522_v7  ;;  %1966 = vmatmul.mubr.f32.gmra.mrb[30].mxu1 %v1701_v5 }
 0x2fc   : > { %6467 = vst [vmem:[#allocation37_spill] sm:$0xff] %v5354_v28  ;;  %3841 = vrsqrt.f32 %v5354_v28  ;;  %v1704_v38 = vmul.f32 %v3832_v39, %v4996_v14  ;;  %v1703_v44 = vmul.f32 %v3832_v39, %v4994_v50  ;;  %vm1546_vm14 = vcmp.eq.f32.partialorder %v5354_v28, inf }
 0x2fd   : > { %v1526_v51 = vsel %vm1525_vm8, %v5324_v60, %v1524_v4  ;;  %3843 = vrcp.f32 %v1626_v47  ;;  %vm1548_vm15 = vcmp.eq.f32.partialorder %v5354_v28, 0.0  ;;  %v1549_v39 = vand.u32 2147483648, %v5354_v28 }
 0x2fe   : > { %v3834_v11 = vpop.eup %3833  ;;  %v1529_v18 = vsel %vm1527_vm9, %v1528_v49, %v1526_v51  ;;  %1971 = vmatprep.mubr.f32.mxu1 %v1704_v38 }
 0x2ff   : > { %v3836_v63 = vpop.eup %3835  ;;  %v1531_v17 = vmul.f32 %v3834_v11, %v5334_v42  ;;  %v5364_v41 = vpop.xlane.xlu0 %1295  ;;  %v1627_v55 = vadd.f32 0.0001, %v1529_v18  ;;  %1972 = vmatmul.mubr.f32.gmra.mrb[32].mxu1 %v1703_v44 }
 0x300   : > { %6468 = vst [vmem:[#allocation38_spill] sm:$0xff] %v5364_v41  ;;  %3845 = vrsqrt.f32 %v5364_v41  ;;  %v1706_v14 = vmul.f32 %v3836_v63, %v5006_v16  ;;  %v1705_v8 = vmul.f32 %v3836_v63, %v5004_v57  ;;  %vm1553_vm0 = vcmp.eq.f32.partialorder %v5364_v41, inf }
 0x301   : > { %v1533_v50 = vsel %vm1532_vm10, %v5334_v42, %v1531_v17  ;;  %3847 = vrcp.f32 %v1627_v55  ;;  %vm1555_vm1 = vcmp.eq.f32.partialorder %v5364_v41, 0.0  ;;  %v1556_v18 = vand.u32 2147483648, %v5364_v41 }
 0x302   : > { %v3838_v20 = vpop.eup %3837  ;;  %v1536_v30 = vsel %vm1534_vm11, %v1535_v31, %v1533_v50  ;;  %1977 = vmatprep.mubr.f32.mxu1 %v1706_v14 }
 0x303   : > { %v3840_v26 = vpop.eup %3839  ;;  %v1538_v58 = vmul.f32 %v3838_v20, %v5344_v12  ;;  %v5374_v59 = vpop.xlane.xlu1 %1298  ;;  %v1628_v9 = vadd.f32 0.0001, %v1536_v30  ;;  %1978 = vmatmul.mubr.f32.gmra.mrb[34].mxu1 %v1705_v8 }
 0x304   : > { %6469 = vst [vmem:[#allocation39_spill] sm:$0xff] %v5374_v59  ;;  %3849 = vrsqrt.f32 %v5374_v59  ;;  %v1708_v16 = vmul.f32 %v3840_v26, %v5016_v54  ;;  %v1707_v52 = vmul.f32 %v3840_v26, %v5014_v53  ;;  %vm1560_vm2 = vcmp.eq.f32.partialorder %v5374_v59, inf }
 0x305   : > { %v1540_v57 = vsel %vm1539_vm12, %v5344_v12, %v1538_v58  ;;  %3851 = vrcp.f32 %v1628_v9  ;;  %vm1562_vm3 = vcmp.eq.f32.partialorder %v5374_v59, 0.0  ;;  %v1563_v20 = vand.u32 2147483648, %v5374_v59 }
 0x306   : > { %v3842_v1 = vpop.eup %3841  ;;  %v1543_v40 = vsel %vm1541_vm13, %v1542_v34, %v1540_v57  ;;  %1983 = vmatprep.mubr.f32.mxu1 %v1708_v16 }
 0x307   : > { %v3844_v0 = vpop.eup %3843  ;;  %v1545_v5 = vmul.f32 %v3842_v1, %v5354_v28  ;;  %v5384_v33 = vpop.xlane.xlu0 %1301  ;;  %v1629_v7 = vadd.f32 0.0001, %v1543_v40  ;;  %1984 = vmatmul.mubr.f32.gmra.mrb[36].mxu1 %v1707_v52 }
 0x308   : > { %6470 = vst [vmem:[#allocation40_spill] sm:$0xff] %v5384_v33  ;;  %3853 = vrsqrt.f32 %v5384_v33  ;;  %v1710_v54 = vmul.f32 %v3844_v0, %v5026_v45  ;;  %v1709_v4 = vmul.f32 %v3844_v0, %v5024_v56  ;;  %vm1567_vm4 = vcmp.eq.f32.partialorder %v5384_v33, inf }
 0x309   : > { %v1547_v53 = vsel %vm1546_vm14, %v5354_v28, %v1545_v5  ;;  %3855 = vrcp.f32 %v1629_v7  ;;  %vm1569_vm5 = vcmp.eq.f32.partialorder %v5384_v33, 0.0  ;;  %v1570_v52 = vand.u32 2147483648, %v5384_v33 }
 0x30a   : > { %v3846_v47 = vpop.eup %3845  ;;  %v1550_v49 = vsel %vm1548_vm15, %v1549_v39, %v1547_v53  ;;  %1989 = vmatprep.mubr.f32.mxu1 %v1710_v54 }
 0x30b   : > { %v3848_v51 = vpop.eup %3847  ;;  %v1552_v38 = vmul.f32 %v3846_v47, %v5364_v41  ;;  %v5394_v44 = vpop.xlane.xlu1 %1304  ;;  %v1630_v11 = vadd.f32 0.0001, %v1550_v49  ;;  %1990 = vmatmul.mubr.f32.gmra.mrb[38].mxu1 %v1709_v4  ;;  %v6475_v4 = vld [vmem:[#allocation13_spill] sm:$0xff] }
 0x30c   : > { %6471 = vst [vmem:[#allocation41_spill] sm:$0xff] %v5394_v44  ;;  %3857 = vrsqrt.f32 %v5394_v44  ;;  %v1712_v45 = vmul.f32 %v3848_v51, %v5036_v32  ;;  %v1711_v63 = vmul.f32 %v3848_v51, %v5034_v43  ;;  %vm1574_vm6 = vcmp.eq.f32.partialorder %v5394_v44, inf }
 0x30d   : > { %v1554_v56 = vsel %vm1553_vm0, %v5364_v41, %v1552_v38  ;;  %3859 = vrcp.f32 %v1630_v11  ;;  %vm1576_vm7 = vcmp.eq.f32.partialorder %v5394_v44, 0.0  ;;  %v1577_v54 = vand.u32 2147483648, %v5394_v44 }
 0x30e   : > { %v3850_v17 = vpop.eup %3849  ;;  %v1557_v55 = vsel %vm1555_vm1, %v1556_v18, %v1554_v56  ;;  %1995 = vmatprep.mubr.f32.mxu1 %v1712_v45 }
 0x30f   : > { %v3852_v31 = vpop.eup %3851  ;;  %v1559_v50 = vmul.f32 %v3850_v17, %v5374_v59  ;;  %v5404_v14 = vpop.xlane.xlu0 %1307  ;;  %v1631_v8 = vadd.f32 0.0001, %v1557_v55  ;;  %1996 = vmatmul.mubr.f32.gmra.mrb[40].mxu1 %v1711_v63  ;;  %v6477_v63 = vld [vmem:[#allocation15_spill] sm:$0xff]  ;;  %v6478_v55 = vld [vmem:[#allocation14_spill] sm:$0xff] }
 0x310   : > { %6472 = vst [vmem:[#allocation42_spill] sm:$0xff] %v5404_v14  ;;  %3861 = vrsqrt.f32 %v5404_v14  ;;  %v1714_v32 = vmul.f32 %v3852_v31, %v5046_v10  ;;  %v1713_v30 = vmul.f32 %v3852_v31, %v5044_v35  ;;  %vm1581_vm8 = vcmp.eq.f32.partialorder %v5404_v14, inf }
 0x311   : > { %v1561_v43 = vsel %vm1560_vm2, %v5374_v59, %v1559_v50  ;;  %3863 = vrcp.f32 %v1631_v8  ;;  %vm1583_vm9 = vcmp.eq.f32.partialorder %v5404_v14, 0.0  ;;  %v1584_v45 = vand.u32 2147483648, %v5404_v14 }
 0x312   : > { %v3854_v26 = vpop.eup %3853  ;;  %v1564_v58 = vsel %vm1562_vm3, %v1563_v20, %v1561_v43  ;;  %2001 = vmatprep.mubr.f32.mxu1 %v1714_v32 }
 0x313   : > { %v3856_v9 = vpop.eup %3855  ;;  %v1566_v34 = vmul.f32 %v3854_v26, %v5384_v33  ;;  %v5414_v57 = vpop.xlane.xlu1 %1310  ;;  %v1632_v16 = vadd.f32 0.0001, %v1564_v58  ;;  %2002 = vmatmul.mubr.f32.gmra.mrb[42].mxu1 %v1713_v30  ;;  %v6479_v26 = vld [vmem:[#allocation17_spill] sm:$0xff] }
 0x314   : > { %6473 = vst [vmem:[#allocation43_spill] sm:$0xff] %v5414_v57  ;;  %3865 = vrsqrt.f32 %v5414_v57  ;;  %v1716_v10 = vmul.f32 %v3856_v9, %v5056_v19  ;;  %v1715_v1 = vmul.f32 %v3856_v9, %v5054_v24  ;;  %vm1588_vm10 = vcmp.eq.f32.partialorder %v5414_v57, inf  ;;  %v6480_v9 = vld [vmem:[#allocation16_spill] sm:$0xff] }
 0x315   : > { %v1568_v35 = vsel %vm1567_vm4, %v5384_v33, %v1566_v34  ;;  %3867 = vrcp.f32 %v1632_v16  ;;  %v1591_v30 = vand.u32 2147483648, %v5414_v57  ;;  %vm1590_vm11 = vcmp.eq.f32.partialorder %v5414_v57, 0.0 }
 0x316   : > { %v3858_v40 = vpop.eup %3857  ;;  %v1571_v0 = vsel %vm1569_vm5, %v1570_v52, %v1568_v35  ;;  %2007 = vmatprep.mubr.f32.mxu1 %v1716_v10 }
 0x317   : > { %v3860_v5 = vpop.eup %3859  ;;  %v1573_v7 = vmul.f32 %v3858_v40, %v5394_v44  ;;  %v5424_v39 = vpop.xlane.xlu0 %1313  ;;  %v1633_v53 = vadd.f32 0.0001, %v1571_v0  ;;  %2008 = vmatmul.mubr.f32.gmra.mrb[44].mxu1 %v1715_v1 }
 0x318   : > { %6474 = vst [vmem:[#allocation44_spill] sm:$0xff] %v5424_v39  ;;  %3869 = vrsqrt.f32 %v5424_v39  ;;  %v1718_v19 = vmul.f32 %v3860_v5, %v5066_v22  ;;  %v1717_v47 = vmul.f32 %v3860_v5, %v6475_v4  ;;  %vm1595_vm12 = vcmp.eq.f32.partialorder %v5424_v39, inf  ;;  %v6481_v5 = vld [vmem:[#allocation19_spill] sm:$0xff] }
 0x319   : > { %v1575_v24 = vsel %vm1574_vm6, %v5394_v44, %v1573_v7  ;;  %3871 = vrcp.f32 %v1633_v53  ;;  %v1598_v0 = vand.u32 2147483648, %v5424_v39  ;;  %v6482_v53 = vld [vmem:[#allocation18_spill] sm:$0xff]  ;;  %vm1597_vm13 = vcmp.eq.f32.partialorder %v5424_v39, 0.0 }
 0x31a   : > { %v3862_v49 = vpop.eup %3861  ;;  %v1578_v51 = vsel %vm1576_vm7, %v1577_v54, %v1575_v24  ;;  %2013 = vmatprep.mubr.f32.mxu1 %v1718_v19 }
 0x31b   : > { %v3864_v38 = vpop.eup %3863  ;;  %v1580_v11 = vmul.f32 %v3862_v49, %v5404_v14  ;;  %v5434_v18 = vpop.xlane.xlu1 %1316  ;;  %v1634_v56 = vadd.f32 0.0001, %v1578_v51  ;;  %2014 = vmatmul.mubr.f32.gmra.mrb[46].mxu1 %v1717_v47 }
 0x31c   : > { %6476 = vst [vmem:[#allocation13_spill] sm:$0xff] %v5434_v18  ;;  %3873 = vrsqrt.f32 %v5434_v18  ;;  %v1720_v17 = vmul.f32 %v3864_v38, %v6477_v63  ;;  %v1719_v31 = vmul.f32 %v3864_v38, %v6478_v55  ;;  %vm1602_vm14 = vcmp.eq.f32.partialorder %v5434_v18, inf }
 0x31d   : > { %v1582_v22 = vsel %vm1581_vm8, %v5404_v14, %v1580_v11  ;;  %3875 = vrcp.f32 %v1634_v56  ;;  %v1605_v38 = vand.u32 2147483648, %v5434_v18  ;;  %v6483_v11 = vld [vmem:[#allocation21_spill] sm:$0xff]  ;;  %vm1604_vm15 = vcmp.eq.f32.partialorder %v5434_v18, 0.0 }
 0x31e   : > { %v3866_v50 = vpop.eup %3865  ;;  %v1585_v8 = vsel %vm1583_vm9, %v1584_v45, %v1582_v22  ;;  %2019 = vmatprep.mubr.f32.mxu1 %v1720_v17  ;;  %v6484_v45 = vld [vmem:[#allocation20_spill] sm:$0xff] }
 0x31f   : > { %v3868_v20 = vpop.eup %3867  ;;  %v1587_v43 = vmul.f32 %v3866_v50, %v5414_v57  ;;  %v1635_v32 = vadd.f32 0.0001, %v1585_v8  ;;  %2020 = vmatmul.mubr.f32.gmra.mrb[48].mxu1 %v1719_v31  ;;  %v6485_v50 = vld [vmem:[#allocation23_spill] sm:$0xff] }
 0x320   : > { %v1722_v58 = vmul.f32 %v3868_v20, %v6479_v26  ;;  %v1721_v34 = vmul.f32 %v3868_v20, %v6480_v9  ;;  %v6486_v20 = vld [vmem:[#allocation22_spill] sm:$0xff] }
 0x321   : > { %v1589_v16 = vsel %vm1588_vm10, %v5414_v57, %v1587_v43  ;;  %3877 = vrcp.f32 %v1635_v32 }
 0x322   : > { %v3870_v52 = vpop.eup %3869  ;;  %2025 = vmatprep.mubr.f32.mxu1 %v1722_v58  ;;  %v1592_v35 = vsel %vm1590_vm11, %v1591_v30, %v1589_v16  ;;  %v6487_v30 = vld [vmem:[#allocation25_spill] sm:$0xff]  ;;  %v6488_v58 = vld [vmem:[#allocation24_spill] sm:$0xff]  ;;  %v6489_v16 = vld [vmem:[#allocation27_spill] sm:$0xff] }
 0x323   : > { %v3872_v10 = vpop.eup %3871  ;;  %v1594_v1 = vmul.f32 %v3870_v52, %v5424_v39  ;;  %v1636_v40 = vadd.f32 0.0001, %v1592_v35  ;;  %2026 = vmatmul.mubr.f32.gmra.mrb[50].mxu1 %v1721_v34  ;;  %v6490_v35 = vld [vmem:[#allocation26_spill] sm:$0xff] }
 0x324   : > { %v1724_v7 = vmul.f32 %v3872_v10, %v6481_v5  ;;  %v1723_v54 = vmul.f32 %v3872_v10, %v6482_v53  ;;  %v6492_v5 = vld [vmem:[#allocation28_spill] sm:$0xff]  ;;  %v2709_v53 = vld [vmem:[#allocation7 + $0x8] sm:$0xff] }
 0x325   : > { %v1596_v24 = vsel %vm1595_vm12, %v5424_v39, %v1594_v1  ;;  %3879 = vrcp.f32 %v1636_v40  ;;  %v6491_v40 = vld [vmem:[#allocation29_spill] sm:$0xff] }
 0x326   : > { %v3874_v19 = vpop.eup %3873  ;;  %2031 = vmatprep.mubr.f32.mxu1 %v1724_v7  ;;  %v1599_v4 = vsel %vm1597_vm13, %v1598_v0, %v1596_v24  ;;  %v2708_v24 = vld [vmem:[#allocation7] sm:$0xff] }
 0x327   : > { %v3876_v47 = vpop.eup %3875  ;;  %v1601_v49 = vmul.f32 %v3874_v19, %v5434_v18  ;;  %v1637_v51 = vadd.f32 0.0001, %v1599_v4  ;;  %2032 = vmatmul.mubr.f32.gmra.mrb[52].mxu1 %v1723_v54  ;;  %v2711_v54 = vld [vmem:[#allocation7 + $0x18] sm:$0xff]  ;;  %v2710_v4 = vld [vmem:[#allocation7 + $0x10] sm:$0xff] }
 0x328   : > { %v1726_v56 = vmul.f32 %v3876_v47, %v6483_v11  ;;  %v1725_v22 = vmul.f32 %v3876_v47, %v6484_v45  ;;  %v3507_v19 = vpack.c.bf16 %v2711_v54, %v2709_v53  ;;  %v3509_v47 = vpack.c.bf16 %v2710_v4, %v2708_v24 }
 0x329   : > { %v1603_v63 = vsel %vm1602_vm14, %v5434_v18, %v1601_v49  ;;  %3881 = vrcp.f32 %v1637_v51  ;;  %v2713_v49 = vld [vmem:[#allocation7 + $0x28] sm:$0xff]  ;;  %v2715_v51 = vld [vmem:[#allocation7 + $0x38] sm:$0xff] }
 0x32a   : > { %2037 = vmatprep.mubr.f32.mxu1 %v1726_v56  ;;  %v1606_v17 = vsel %vm1604_vm15, %v1605_v38, %v1603_v63  ;;  %3508 = vmatprep.subr.bf16.mxu0 %v3507_v19  ;;  %v2712_v38 = vld [vmem:[#allocation7 + $0x20] sm:$0xff]  ;;  %v3511_v11 = vpack.c.bf16 %v2715_v51, %v2713_v49  ;;  %v2714_v56 = vld [vmem:[#allocation7 + $0x30] sm:$0xff]  ;;  %v2719_v63 = vld [vmem:[#allocation7 + $0x58] sm:$0xff] }
 0x32b   : > { %v3878_v55 = vpop.eup %3877  ;;  %v1638_v31 = vadd.f32 0.0001, %v1606_v17  ;;  %2038 = vmatmul.mubr.f32.gmra.mrb[54].mxu1 %v1725_v22  ;;  %3539 = vmatprep.subr.bf16.mxu1 %v3507_v19  ;;  %v3513_v45 = vpack.c.bf16 %v2714_v56, %v2712_v38  ;;  %v2717_v22 = vld [vmem:[#allocation7 + $0x48] sm:$0xff]  ;;  %v2716_v17 = vld [vmem:[#allocation7 + $0x40] sm:$0xff]  ;;  %v2726_v56 = vld [vmem:[#allocation7 + $0x90] sm:$0xff] }
 0x32c   : > { %v1728_v8 = vmul.f32 %v3878_v55, %v6485_v50  ;;  %v1727_v43 = vmul.f32 %v3878_v55, %v6486_v20  ;;  %3510 = vmatpush1.bf16.xpose.msra.mxu0 %v3509_v47  ;;  %3547 = vmatpush1.bf16.xpose.msra.mxu1 %v3509_v47  ;;  %v3515_v55 = vpack.c.bf16 %v2719_v63, %v2717_v22  ;;  %v2721_v20 = vld [vmem:[#allocation7 + $0x68] sm:$0xff] }
 0x32d   : > { %3883 = vrcp.f32 %v1638_v31  ;;  %3512 = vmatprep.subr.bf16.mxu0 %v3511_v11  ;;  %3540 = vmatprep.subr.bf16.mxu1 %v3511_v11  ;;  %v2718_v31 = vld [vmem:[#allocation7 + $0x50] sm:$0xff]  ;;  %v2724_v11 = vld [vmem:[#allocation7 + $0x80] sm:$0xff] }
 0x32e   : > { %2043 = vmatprep.mubr.f32.mxu1 %v1728_v8  ;;  %v3517_v50 = vpack.c.bf16 %v2718_v31, %v2716_v17  ;;  %v1799_v8 = vld [vmem:[%s6345_s4] sm:$0x3]  ;;  %v3525_v63 = vpack.c.bf16 %v2726_v56, %v2724_v11  ;;  %v2731_v17 = vld [vmem:[#allocation7 + $0xb8] sm:$0xff] }
 0x32f   : > { %v3880_v32 = vpop.eup %3879  ;;  %2044 = vmatmul.mubr.f32.gmra.mrb[56].mxu1 %v1727_v43  ;;  %v2723_v43 = vld [vmem:[#allocation7 + $0x78] sm:$0xff] }
 0x330   : > { %v1730_v26 = vmul.f32 %v3880_v32, %v6487_v30  ;;  %v1729_v9 = vmul.f32 %v3880_v32, %v6488_v58  ;;  %v2720_v32 = vld [vmem:[#allocation7 + $0x60] sm:$0xff]  ;;  %v3519_v30 = vpack.c.bf16 %v2723_v43, %v2721_v20 }
 0x332   : > { %2049 = vmatprep.mubr.f32.mxu1 %v1730_v26  ;;  %v2722_v26 = vld [vmem:[#allocation7 + $0x70] sm:$0xff] }
 0x333   : > { %v3882_v34 = vpop.eup %3881  ;;  %2050 = vmatmul.mubr.f32.gmra.mrb[58].mxu1 %v1729_v9  ;;  %v3521_v58 = vpack.c.bf16 %v2722_v26, %v2720_v32  ;;  %v6493_v9 = vld [vmem:[#allocation12_spill] sm:$0xff] }
 0x334   : > { %v1732_v52 = vmul.f32 %v3882_v34, %v6489_v16  ;;  %v1731_v10 = vmul.f32 %v3882_v34, %v6490_v35  ;;  %3514 = vmatpush1.bf16.xpose.msra.mxu0 %v3513_v45  ;;  %3548 = vmatpush1.bf16.xpose.msra.mxu1 %v3513_v45  ;;  %v6494_v34 = vsub.s32 0, %v6493_v9  ;;  %v2729_v45 = vld [vmem:[#allocation7 + $0xa8] sm:$0xff] }
 0x335   : > { %3516 = vmatprep.subr.bf16.mxu0 %v3515_v55  ;;  %3541 = vmatprep.subr.bf16.mxu1 %v3515_v55 }
 0x336   : > { %2055 = vmatprep.mubr.f32.mxu1 %v1732_v52  ;;  %v5477_v16 = vrot.slane %v1799_v8, %v6494_v34  ;;  %v6495_v52 = vsub.s32 1, %v6493_v9  ;;  %v2730_v9 = vld [vmem:[#allocation7 + $0xb0] sm:$0xff] }
 0x337   : > { %v3884_v1 = vpop.eup %3883  ;;  %2056 = vmatmul.mubr.f32.gmra.mrb[60].mxu1 %v1731_v10 }
 0x338   : > { %v1734_v0 = vmul.f32 %v3884_v1, %v6491_v40  ;;  %v1733_v7 = vmul.f32 %v3884_v1, %v6492_v5  ;;  %v5481_v35 = vrot.slane %v1799_v8, %v6495_v52  ;;  %v2725_v5 = vld [vmem:[#allocation7 + $0x88] sm:$0xff]  ;;  %v3527_v8 = vpack.c.bf16 %v2731_v17, %v2729_v45 }
 0x33a   : > { %2061 = vmatprep.mubr.f32.mxu1 %v1734_v0 }
 0x33b   : > { %2062 = vmatmul.mubr.f32.gmra.mrb[62].mxu1 %v1733_v7  ;;  %v2727_v7 = vld [vmem:[#allocation7 + $0x98] sm:$0xff] }
 0x33c   : > { %3518 = vmatpush1.bf16.xpose.msra.mxu0 %v3517_v50  ;;  %3549 = vmatpush1.bf16.xpose.msra.mxu1 %v3517_v50  ;;  %v3523_v54 = vpack.c.bf16 %v2727_v7, %v2725_v5 }
 0x33d   : > { %3520 = vmatprep.subr.bf16.mxu0 %v3519_v30  ;;  %3542 = vmatprep.subr.bf16.mxu1 %v3519_v30 }
 0x344   : > { %3522 = vmatpush1.bf16.xpose.msra.mxu0 %v3521_v58  ;;  %3550 = vmatpush1.bf16.xpose.msra.mxu1 %v3521_v58  ;;  %v2728_v58 = vld [vmem:[#allocation7 + $0xa0] sm:$0xff] }
 0x345   : > { %3524 = vmatprep.subr.bf16.mxu0 %v3523_v54  ;;  %3543 = vmatprep.subr.bf16.mxu1 %v3523_v54  ;;  %v3529_v7 = vpack.c.bf16 %v2730_v9, %v2728_v58 }
 0x34c   : > { %3526 = vmatpush1.bf16.xpose.msra.mxu0 %v3525_v63  ;;  %3551 = vmatpush1.bf16.xpose.msra.mxu1 %v3525_v63 }
 0x34d   : > { %3528 = vmatprep.subr.bf16.mxu0 %v3527_v8  ;;  %3544 = vmatprep.subr.bf16.mxu1 %v3527_v8 }
 0x354   : > { %3530 = vmatpush1.bf16.xpose.msra.mxu0 %v3529_v7  ;;  %3552 = vmatpush1.bf16.xpose.msra.mxu1 %v3529_v7 }
 0x392   : > { %v1877_v10 = vpop.f32.mrb[0].mxu1 }
 0x393   : > { %v1878_v1 = vadd.f32 %v1877_v10, %v5477_v16  ;;  %v1879_v40 = vpop.f32.mrb[1].mxu1 }
 0x394   : > { %v1880_v0 = vadd.f32 %v1879_v40, %v5481_v35 }
 0x395   : > { %v5485_v53 = vmax.f32 %v1878_v1, 0.0 }
 0x396   : > { %v5487_v24 = vmax.f32 %v1880_v0, 0.0  ;;  %v1883_v19 = vpop.f32.mrb[2].mxu1 }
 0x397   : > { %v2132_v4 = vmul.f32 %v5485_v53, %v5485_v53  ;;  %v1884_v47 = vadd.f32 %v1883_v19, %v5477_v16  ;;  %v1885_v49 = vpop.f32.mrb[3].mxu1 }
 0x398   : > { %v2133_v51 = vmul.f32 %v5487_v24, %v5487_v24  ;;  %v1886_v38 = vadd.f32 %v1885_v49, %v5481_v35 }
 0x399   : > { %v5495_v22 = vmax.f32 %v1884_v47, 0.0 }
 0x39a   : > { %v5497_v55 = vmax.f32 %v1886_v38, 0.0  ;;  %v1889_v31 = vpop.f32.mrb[4].mxu1  ;;  %v2196_v50 = vadd.f32 %v2133_v51, %v2132_v4 }
 0x39b   : > { %v2134_v20 = vmul.f32 %v5495_v22, %v5495_v22  ;;  %v1890_v43 = vadd.f32 %v1889_v31, %v5477_v16  ;;  %v1891_v32 = vpop.f32.mrb[5].mxu1 }
 0x39c   : > { %v2135_v30 = vmul.f32 %v5497_v55, %v5497_v55  ;;  %v1892_v26 = vadd.f32 %v1891_v32, %v5481_v35  ;;  %2197 = vadd.xlane.f32.xlu0 %v2196_v50 }
 0x39d   : > { %v5505_v34 = vmax.f32 %v1890_v43, 0.0 }
 0x39e   : > { %v5507_v52 = vmax.f32 %v1892_v26, 0.0  ;;  %v1895_v10 = vpop.f32.mrb[6].mxu1  ;;  %v2199_v1 = vadd.f32 %v2135_v30, %v2134_v20 }
 0x39f   : > { %v2136_v40 = vmul.f32 %v5505_v34, %v5505_v34  ;;  %v1896_v0 = vadd.f32 %v1895_v10, %v5477_v16  ;;  %v1897_v5 = vpop.f32.mrb[7].mxu1 }
 0x3a0   : > { %v2137_v54 = vmul.f32 %v5507_v52, %v5507_v52  ;;  %v1898_v19 = vadd.f32 %v1897_v5, %v5481_v35  ;;  %2200 = vadd.xlane.f32.xlu1 %v2199_v1 }
 0x3a1   : > { %v5515_v4 = vmax.f32 %v1896_v0, 0.0 }
 0x3a2   : > { %v5517_v47 = vmax.f32 %v1898_v19, 0.0  ;;  %v1901_v49 = vpop.f32.mrb[8].mxu1  ;;  %v2202_v51 = vadd.f32 %v2137_v54, %v2136_v40 }
 0x3a3   : > { %v2138_v38 = vmul.f32 %v5515_v4, %v5515_v4  ;;  %v1902_v11 = vadd.f32 %v1901_v49, %v5477_v16  ;;  %v1903_v56 = vpop.f32.mrb[9].mxu1 }
 0x3a4   : > { %v2139_v45 = vmul.f32 %v5517_v47, %v5517_v47  ;;  %v1904_v63 = vadd.f32 %v1903_v56, %v5481_v35  ;;  %2203 = vadd.xlane.f32.xlu0 %v2202_v51 }
 0x3a5   : > { %v5525_v17 = vmax.f32 %v1902_v11, 0.0 }
 0x3a6   : > { %v5527_v31 = vmax.f32 %v1904_v63, 0.0  ;;  %v1907_v50 = vpop.f32.mrb[10].mxu1  ;;  %v2205_v8 = vadd.f32 %v2139_v45, %v2138_v38 }
 0x3a7   : > { %v2140_v20 = vmul.f32 %v5525_v17, %v5525_v17  ;;  %v1908_v43 = vadd.f32 %v1907_v50, %v5477_v16  ;;  %v1909_v32 = vpop.f32.mrb[11].mxu1 }
 0x3a8   : > { %v2141_v30 = vmul.f32 %v5527_v31, %v5527_v31  ;;  %v1910_v26 = vadd.f32 %v1909_v32, %v5481_v35  ;;  %2206 = vadd.xlane.f32.xlu1 %v2205_v8 }
 0x3a9   : > { %v5535_v58 = vmax.f32 %v1908_v43, 0.0 }
 0x3aa   : > { %v5537_v9 = vmax.f32 %v1910_v26, 0.0  ;;  %v1913_v10 = vpop.f32.mrb[12].mxu1  ;;  %v2208_v1 = vadd.f32 %v2141_v30, %v2140_v20 }
 0x3ab   : > { %v2142_v40 = vmul.f32 %v5535_v58, %v5535_v58  ;;  %v1914_v0 = vadd.f32 %v1913_v10, %v5477_v16  ;;  %v1915_v5 = vpop.f32.mrb[13].mxu1 }
 0x3ac   : > { %v2143_v7 = vmul.f32 %v5537_v9, %v5537_v9  ;;  %v1916_v54 = vadd.f32 %v1915_v5, %v5481_v35  ;;  %2209 = vadd.xlane.f32.xlu0 %v2208_v1 }
 0x3ad   : > { %v5545_v19 = vmax.f32 %v1914_v0, 0.0 }
 0x3ae   : > { %v5547_v49 = vmax.f32 %v1916_v54, 0.0  ;;  %v1919_v51 = vpop.f32.mrb[14].mxu1  ;;  %v2211_v38 = vadd.f32 %v2143_v7, %v2142_v40 }
 0x3af   : > { %v2144_v11 = vmul.f32 %v5545_v19, %v5545_v19  ;;  %v1920_v56 = vadd.f32 %v1919_v51, %v5477_v16  ;;  %v1921_v45 = vpop.f32.mrb[15].mxu1 }
 0x3b0   : > { %v2145_v63 = vmul.f32 %v5547_v49, %v5547_v49  ;;  %v1922_v50 = vadd.f32 %v1921_v45, %v5481_v35  ;;  %2212 = vadd.xlane.f32.xlu1 %v2211_v38 }
 0x3b1   : > { %v5555_v8 = vmax.f32 %v1920_v56, 0.0 }
 0x3b2   : > { %v5557_v20 = vmax.f32 %v1922_v50, 0.0  ;;  %v1925_v43 = vpop.f32.mrb[16].mxu1  ;;  %v2214_v32 = vadd.f32 %v2145_v63, %v2144_v11  ;;  %v2733_v63 = vld [vmem:[#allocation7 + $0xc8] sm:$0xff]  ;;  %v2735_v50 = vld [vmem:[#allocation7 + $0xd8] sm:$0xff] }
 0x3b3   : > { %v2146_v30 = vmul.f32 %v5555_v8, %v5555_v8  ;;  %v1926_v26 = vadd.f32 %v1925_v43, %v5477_v16  ;;  %v1927_v10 = vpop.f32.mrb[17].mxu1 }
 0x3b4   : > { %v2147_v1 = vmul.f32 %v5557_v20, %v5557_v20  ;;  %v1928_v40 = vadd.f32 %v1927_v10, %v5481_v35  ;;  %2215 = vadd.xlane.f32.xlu0 %v2214_v32  ;;  %v3531_v32 = vpack.c.bf16 %v2735_v50, %v2733_v63  ;;  %v2734_v10 = vld [vmem:[#allocation7 + $0xd0] sm:$0xff] }
 0x3b5   : > { %v5565_v0 = vmax.f32 %v1926_v26, 0.0  ;;  %v2732_v26 = vld [vmem:[#allocation7 + $0xc0] sm:$0xff] }
 0x3b6   : > { %v5567_v5 = vmax.f32 %v1928_v40, 0.0  ;;  %v1931_v7 = vpop.f32.mrb[18].mxu1  ;;  %v2217_v54 = vadd.f32 %v2147_v1, %v2146_v30  ;;  %v3533_v18 = vpack.c.bf16 %v2734_v10, %v2732_v26  ;;  %3532 = vmatprep.subr.bf16.mxu0 %v3531_v32  ;;  %3545 = vmatprep.subr.bf16.mxu1 %v3531_v32  ;;  %v2737_v10 = vld [vmem:[#allocation7 + $0xe8] sm:$0xff] }
 0x3b7   : > { %v2148_v51 = vmul.f32 %v5565_v0, %v5565_v0  ;;  %v1932_v38 = vadd.f32 %v1931_v7, %v5477_v16  ;;  %v1933_v11 = vpop.f32.mrb[19].mxu1 }
 0x3b8   : > { %v2149_v56 = vmul.f32 %v5567_v5, %v5567_v5  ;;  %v1934_v45 = vadd.f32 %v1933_v11, %v5481_v35  ;;  %2218 = vadd.xlane.f32.xlu1 %v2217_v54  ;;  %3534 = vmatpush1.bf16.xpose.msra.mxu0 %v3533_v18 }
 0x3b9   : > { %v5575_v43 = vmax.f32 %v1932_v38, 0.0  ;;  %3553 = vmatpush1.bf16.xpose.msra.mxu1 %v3533_v18 }
 0x3ba   : > { %v5577_v30 = vmax.f32 %v1934_v45, 0.0  ;;  %v1937_v1 = vpop.f32.mrb[20].mxu1  ;;  %v2220_v40 = vadd.f32 %v2149_v56, %v2148_v51 }
 0x3bb   : > { %v2150_v7 = vmul.f32 %v5575_v43, %v5575_v43  ;;  %v1938_v39 = vadd.f32 %v1937_v1, %v5477_v16  ;;  %v1939_v28 = vpop.f32.mrb[21].mxu1 }
 0x3bc   : > { %v2151_v54 = vmul.f32 %v5577_v30, %v5577_v30  ;;  %v1940_v38 = vadd.f32 %v1939_v28, %v5481_v35  ;;  %2221 = vadd.xlane.f32.xlu0 %v2220_v40  ;;  %v2736_v40 = vld [vmem:[#allocation7 + $0xe0] sm:$0xff] }
 0x3bd   : > { %v5585_v11 = vmax.f32 %v1938_v39, 0.0  ;;  %v2739_v39 = vld [vmem:[#allocation7 + $0xf8] sm:$0xff] }
 0x3be   : > { %v5587_v51 = vmax.f32 %v1940_v38, 0.0  ;;  %v1943_v56 = vpop.f32.mrb[22].mxu1  ;;  %v2223_v45 = vadd.f32 %v2151_v54, %v2150_v7  ;;  %v3535_v18 = vpack.c.bf16 %v2739_v39, %v2737_v10  ;;  %v2738_v38 = vld [vmem:[#allocation7 + $0xf0] sm:$0xff] }
 0x3bf   : > { %v2152_v63 = vmul.f32 %v5585_v11, %v5585_v11  ;;  %v1944_v50 = vadd.f32 %v1943_v56, %v5477_v16  ;;  %v1945_v32 = vpop.f32.mrb[23].mxu1  ;;  %v3537_v14 = vpack.c.bf16 %v2738_v38, %v2736_v40 }
 0x3c0   : > { %v2153_v26 = vmul.f32 %v5587_v51, %v5587_v51  ;;  %v1946_v28 = vadd.f32 %v1945_v32, %v5481_v35  ;;  %2224 = vadd.xlane.f32.xlu1 %v2223_v45  ;;  %3536 = vmatprep.subr.bf16.mxu0 %v3535_v18 }
 0x3c1   : > { %v5595_v1 = vmax.f32 %v1944_v50, 0.0  ;;  %3546 = vmatprep.subr.bf16.mxu1 %v3535_v18  ;;  %3538 = vmatpush1.bf16.xpose.msra.mxu0 %v3537_v14 }
 0x3c2   : > { %v5597_v7 = vmax.f32 %v1946_v28, 0.0  ;;  %v1949_v54 = vpop.f32.mrb[24].mxu1  ;;  %v2226_v57 = vadd.f32 %v2153_v26, %v2152_v63  ;;  %3554 = vmatpush1.bf16.xpose.msra.mxu1 %v3537_v14 }
 0x3c3   : > { %v2154_v56 = vmul.f32 %v5595_v1, %v5595_v1  ;;  %v1950_v44 = vadd.f32 %v1949_v54, %v5477_v16  ;;  %v1951_v33 = vpop.f32.mrb[25].mxu1 }
 0x3c4   : > { %v2155_v45 = vmul.f32 %v5597_v7, %v5597_v7  ;;  %v1952_v50 = vadd.f32 %v1951_v33, %v5481_v35  ;;  %2227 = vadd.xlane.f32.xlu0 %v2226_v57 }
 0x3c5   : > { %v5605_v32 = vmax.f32 %v1950_v44, 0.0 }
 0x3c6   : > { %v5607_v63 = vmax.f32 %v1952_v50, 0.0  ;;  %v1955_v26 = vpop.f32.mrb[26].mxu1  ;;  %v2229_v28 = vadd.f32 %v2155_v45, %v2154_v56 }
 0x3c7   : > { %v2156_v10 = vmul.f32 %v5605_v32, %v5605_v32  ;;  %v1956_v39 = vadd.f32 %v1955_v26, %v5477_v16  ;;  %v1957_v18 = vpop.f32.mrb[27].mxu1 }
 0x3c8   : > { %v2157_v40 = vmul.f32 %v5607_v63, %v5607_v63  ;;  %v1958_v33 = vadd.f32 %v1957_v18, %v5481_v35  ;;  %2230 = vadd.xlane.f32.xlu1 %v2229_v28 }
 0x3c9   : > { %v5615_v57 = vmax.f32 %v1956_v39, 0.0 }
 0x3ca   : > { %v5617_v44 = vmax.f32 %v1958_v33, 0.0  ;;  %v1961_v14 = vpop.f32.mrb[28].mxu1  ;;  %v2232_v38 = vadd.f32 %v2157_v40, %v2156_v10 }
 0x3cb   : > { %6496 = vst [vmem:[#allocation15_spill] sm:$0xff] %v5615_v57  ;;  %v2158_v54 = vmul.f32 %v5615_v57, %v5615_v57  ;;  %v1962_v56 = vadd.f32 %v1961_v14, %v5477_v16  ;;  %v1963_v45 = vpop.f32.mrb[29].mxu1 }
 0x3cc   : > { %6497 = vst [vmem:[#allocation14_spill] sm:$0xff] %v5617_v44  ;;  %v2159_v50 = vmul.f32 %v5617_v44, %v5617_v44  ;;  %v1964_v26 = vadd.f32 %v1963_v45, %v5481_v35  ;;  %2233 = vadd.xlane.f32.xlu0 %v2232_v38 }
 0x3cd   : > { %v5625_v18 = vmax.f32 %v1962_v56, 0.0 }
 0x3ce   : > { %v5627_v28 = vmax.f32 %v1964_v26, 0.0  ;;  %v1967_v39 = vpop.f32.mrb[30].mxu1  ;;  %v2235_v33 = vadd.f32 %v2159_v50, %v2158_v54 }
 0x3cf   : > { %6498 = vst [vmem:[#allocation17_spill] sm:$0xff] %v5625_v18  ;;  %v2160_v10 = vmul.f32 %v5625_v18, %v5625_v18  ;;  %v1968_v40 = vadd.f32 %v1967_v39, %v5477_v16  ;;  %v1969_v59 = vpop.f32.mrb[31].mxu1 }
 0x3d0   : > { %6499 = vst [vmem:[#allocation16_spill] sm:$0xff] %v5627_v28  ;;  %v2161_v14 = vmul.f32 %v5627_v28, %v5627_v28  ;;  %v1970_v41 = vadd.f32 %v1969_v59, %v5481_v35  ;;  %2236 = vadd.xlane.f32.xlu1 %v2235_v33 }
 0x3d1   : > { %v5635_v45 = vmax.f32 %v1968_v40, 0.0 }
 0x3d2   : > { %v5637_v38 = vmax.f32 %v1970_v41, 0.0  ;;  %v1973_v56 = vpop.f32.mrb[32].mxu1  ;;  %v2238_v26 = vadd.f32 %v2161_v14, %v2160_v10 }
 0x3d3   : > { %6500 = vst [vmem:[#allocation19_spill] sm:$0xff] %v5635_v45  ;;  %v2162_v54 = vmul.f32 %v5635_v45, %v5635_v45  ;;  %v1974_v50 = vadd.f32 %v1973_v56, %v5477_v16  ;;  %v1975_v12 = vpop.f32.mrb[33].mxu1 }
 0x3d4   : > { %6501 = vst [vmem:[#allocation18_spill] sm:$0xff] %v5637_v38  ;;  %v2163_v39 = vmul.f32 %v5637_v38, %v5637_v38  ;;  %v1976_v42 = vadd.f32 %v1975_v12, %v5481_v35  ;;  %2239 = vadd.xlane.f32.xlu0 %v2238_v26 }
 0x3d5   : > { %v5645_v59 = vmax.f32 %v1974_v50, 0.0 }
 0x3d6   : > { %v5647_v33 = vmax.f32 %v1976_v42, 0.0  ;;  %v1979_v41 = vpop.f32.mrb[34].mxu1  ;;  %v2241_v40 = vadd.f32 %v2163_v39, %v2162_v54 }
 0x3d7   : > { %6502 = vst [vmem:[#allocation21_spill] sm:$0xff] %v5645_v59  ;;  %v2164_v10 = vmul.f32 %v5645_v59, %v5645_v59  ;;  %v1980_v14 = vadd.f32 %v1979_v41, %v5477_v16  ;;  %v1981_v45 = vpop.f32.mrb[35].mxu1 }
 0x3d8   : > { %6503 = vst [vmem:[#allocation20_spill] sm:$0xff] %v5647_v33  ;;  %v2165_v56 = vmul.f32 %v5647_v33, %v5647_v33  ;;  %v1982_v38 = vadd.f32 %v1981_v45, %v5481_v35  ;;  %2242 = vadd.xlane.f32.xlu1 %v2241_v40 }
 0x3d9   : > { %v5655_v12 = vmax.f32 %v1980_v14, 0.0 }
 0x3da   : > { %v5657_v26 = vmax.f32 %v1982_v38, 0.0  ;;  %v1985_v42 = vpop.f32.mrb[36].mxu1  ;;  %v2244_v50 = vadd.f32 %v2165_v56, %v2164_v10 }
 0x3db   : > { %6504 = vst [vmem:[#allocation23_spill] sm:$0xff] %v5655_v12  ;;  %v2166_v54 = vmul.f32 %v5655_v12, %v5655_v12  ;;  %v1986_v39 = vadd.f32 %v1985_v42, %v5477_v16  ;;  %v1987_v59 = vpop.f32.mrb[37].mxu1 }
 0x3dc   : > { %6505 = vst [vmem:[#allocation22_spill] sm:$0xff] %v5657_v26  ;;  %v2167_v41 = vmul.f32 %v5657_v26, %v5657_v26  ;;  %v1988_v33 = vadd.f32 %v1987_v59, %v5481_v35  ;;  %2245 = vadd.xlane.f32.xlu0 %v2244_v50 }
 0x3dd   : > { %v5665_v45 = vmax.f32 %v1986_v39, 0.0 }
 0x3de   : > { %v5667_v40 = vmax.f32 %v1988_v33, 0.0  ;;  %v1991_v38 = vpop.f32.mrb[38].mxu1  ;;  %v2247_v14 = vadd.f32 %v2167_v41, %v2166_v54 }
 0x3df   : > { %6506 = vst [vmem:[#allocation25_spill] sm:$0xff] %v5665_v45  ;;  %v2168_v10 = vmul.f32 %v5665_v45, %v5665_v45  ;;  %v1992_v56 = vadd.f32 %v1991_v38, %v5477_v16  ;;  %v1993_v12 = vpop.f32.mrb[39].mxu1 }
 0x3e0   : > { %6507 = vst [vmem:[#allocation24_spill] sm:$0xff] %v5667_v40  ;;  %v2169_v42 = vmul.f32 %v5667_v40, %v5667_v40  ;;  %v1994_v26 = vadd.f32 %v1993_v12, %v5481_v35  ;;  %2248 = vadd.xlane.f32.xlu0 %v2247_v14 }
 0x3e1   : > { %v5675_v59 = vmax.f32 %v1992_v56, 0.0 }
 0x3e2   : > { %v5677_v50 = vmax.f32 %v1994_v26, 0.0  ;;  %v1997_v33 = vpop.f32.mrb[40].mxu1  ;;  %v2250_v39 = vadd.f32 %v2169_v42, %v2168_v10 }
 0x3e3   : > { %6508 = vst [vmem:[#allocation27_spill] sm:$0xff] %v5675_v59  ;;  %v2170_v54 = vmul.f32 %v5675_v59, %v5675_v59  ;;  %v1998_v41 = vadd.f32 %v1997_v33, %v5477_v16  ;;  %v1999_v45 = vpop.f32.mrb[41].mxu1 }
 0x3e4   : > { %6509 = vst [vmem:[#allocation26_spill] sm:$0xff] %v5677_v50  ;;  %v2171_v38 = vmul.f32 %v5677_v50, %v5677_v50  ;;  %v2000_v40 = vadd.f32 %v1999_v45, %v5481_v35  ;;  %2251 = vadd.xlane.f32.xlu0 %v2250_v39 }
 0x3e5   : > { %v5685_v12 = vmax.f32 %v1998_v41, 0.0 }
 0x3e6   : > { %v5687_v14 = vmax.f32 %v2000_v40, 0.0  ;;  %v2003_v26 = vpop.f32.mrb[42].mxu1  ;;  %v2253_v56 = vadd.f32 %v2171_v38, %v2170_v54 }
 0x3e7   : > { %6510 = vst [vmem:[#allocation29_spill] sm:$0xff] %v5685_v12  ;;  %v2172_v10 = vmul.f32 %v5685_v12, %v5685_v12  ;;  %v2004_v42 = vadd.f32 %v2003_v26, %v5477_v16  ;;  %v2005_v59 = vpop.f32.mrb[43].mxu1 }
 0x3e8   : > { %6511 = vst [vmem:[#allocation28_spill] sm:$0xff] %v5687_v14  ;;  %v2173_v33 = vmul.f32 %v5687_v14, %v5687_v14  ;;  %v2006_v50 = vadd.f32 %v2005_v59, %v5481_v35  ;;  %2254 = vadd.xlane.f32.xlu0 %v2253_v56 }
 0x3e9   : > { %v5695_v45 = vmax.f32 %v2004_v42, 0.0 }
 0x3ea   : > { %v5697_v39 = vmax.f32 %v2006_v50, 0.0  ;;  %v2009_v40 = vpop.f32.mrb[44].mxu1  ;;  %v2256_v41 = vadd.f32 %v2173_v33, %v2172_v10 }
 0x3eb   : > { %6512 = vst [vmem:[#allocation12_spill] sm:$0xff] %v5695_v45  ;;  %v2174_v54 = vmul.f32 %v5695_v45, %v5695_v45  ;;  %v2010_v38 = vadd.f32 %v2009_v40, %v5477_v16  ;;  %v2011_v12 = vpop.f32.mrb[45].mxu1 }
 0x3ec   : > { %6513 = vst [vmem:[#allocation45_spill] sm:$0xff] %v5697_v39  ;;  %v2175_v26 = vmul.f32 %v5697_v39, %v5697_v39  ;;  %v2012_v14 = vadd.f32 %v2011_v12, %v5481_v35  ;;  %2257 = vadd.xlane.f32.xlu0 %v2256_v41 }
 0x3ed   : > { %v5705_v59 = vmax.f32 %v2010_v38, 0.0 }
 0x3ee   : > { %v5707_v56 = vmax.f32 %v2012_v14, 0.0  ;;  %v2015_v50 = vpop.f32.mrb[46].mxu1  ;;  %v2259_v42 = vadd.f32 %v2175_v26, %v2174_v54 }
 0x3ef   : > { %6514 = vst [vmem:[#allocation46_spill] sm:$0xff] %v5705_v59  ;;  %v2176_v10 = vmul.f32 %v5705_v59, %v5705_v59  ;;  %v2016_v33 = vadd.f32 %v2015_v50, %v5477_v16  ;;  %v2017_v45 = vpop.f32.mrb[47].mxu1 }
 0x3f0   : > { %6515 = vst [vmem:[#allocation47_spill] sm:$0xff] %v5707_v56  ;;  %v2177_v40 = vmul.f32 %v5707_v56, %v5707_v56  ;;  %v2018_v39 = vadd.f32 %v2017_v45, %v5481_v35  ;;  %2260 = vadd.xlane.f32.xlu0 %v2259_v42 }
 0x3f1   : > { %v5715_v12 = vmax.f32 %v2016_v33, 0.0 }
 0x3f2   : > { %v5717_v41 = vmax.f32 %v2018_v39, 0.0  ;;  %v2021_v14 = vpop.f32.mrb[48].mxu1  ;;  %v2262_v38 = vadd.f32 %v2177_v40, %v2176_v10 }
 0x3f3   : > { %6516 = vst [vmem:[#allocation48_spill] sm:$0xff] %v5715_v12  ;;  %v2178_v54 = vmul.f32 %v5715_v12, %v5715_v12  ;;  %v2022_v26 = vadd.f32 %v2021_v14, %v5477_v16  ;;  %v2023_v59 = vpop.f32.mrb[49].mxu1 }
 0x3f4   : > { %6517 = vst [vmem:[#allocation49_spill] sm:$0xff] %v5717_v41  ;;  %v2179_v50 = vmul.f32 %v5717_v41, %v5717_v41  ;;  %v2024_v56 = vadd.f32 %v2023_v59, %v5481_v35  ;;  %2263 = vadd.xlane.f32.xlu0 %v2262_v38 }
 0x3f5   : > { %v5725_v45 = vmax.f32 %v2022_v26, 0.0 }
 0x3f6   : > { %v5727_v42 = vmax.f32 %v2024_v56, 0.0  ;;  %v2027_v39 = vpop.f32.mrb[50].mxu1  ;;  %v2265_v33 = vadd.f32 %v2179_v50, %v2178_v54 }
 0x3f7   : > { %6518 = vst [vmem:[#allocation50_spill] sm:$0xff] %v5725_v45  ;;  %v2180_v10 = vmul.f32 %v5725_v45, %v5725_v45  ;;  %v2028_v40 = vadd.f32 %v2027_v39, %v5477_v16  ;;  %v2029_v12 = vpop.f32.mrb[51].mxu1 }
 0x3f8   : > { %6519 = vst [vmem:[#allocation51_spill] sm:$0xff] %v5727_v42  ;;  %v2181_v14 = vmul.f32 %v5727_v42, %v5727_v42  ;;  %v2030_v41 = vadd.f32 %v2029_v12, %v5481_v35  ;;  %2266 = vadd.xlane.f32.xlu0 %v2265_v33 }
 0x3f9   : > { %v5735_v59 = vmax.f32 %v2028_v40, 0.0 }
 0x3fa   : > { %v5737_v38 = vmax.f32 %v2030_v41, 0.0  ;;  %v2033_v56 = vpop.f32.mrb[52].mxu1  ;;  %v2268_v26 = vadd.f32 %v2181_v14, %v2180_v10 }
 0x3fb   : > { %6520 = vst [vmem:[#allocation52_spill] sm:$0xff] %v5735_v59  ;;  %v2182_v54 = vmul.f32 %v5735_v59, %v5735_v59  ;;  %v2034_v50 = vadd.f32 %v2033_v56, %v5477_v16  ;;  %v2035_v45 = vpop.f32.mrb[53].mxu1 }
 0x3fc   : > { %6521 = vst [vmem:[#allocation53_spill] sm:$0xff] %v5737_v38  ;;  %v2183_v39 = vmul.f32 %v5737_v38, %v5737_v38  ;;  %v2036_v42 = vadd.f32 %v2035_v45, %v5481_v35  ;;  %2269 = vadd.xlane.f32.xlu1 %v2268_v26 }
 0x3fd   : > { %v5745_v12 = vmax.f32 %v2034_v50, 0.0 }
 0x3fe   : > { %v5747_v33 = vmax.f32 %v2036_v42, 0.0  ;;  %v2039_v41 = vpop.f32.mrb[54].mxu1  ;;  %v2271_v40 = vadd.f32 %v2183_v39, %v2182_v54 }
 0x3ff   : > { %6522 = vst [vmem:[#allocation54_spill] sm:$0xff] %v5745_v12  ;;  %v2184_v10 = vmul.f32 %v5745_v12, %v5745_v12  ;;  %v2040_v14 = vadd.f32 %v2039_v41, %v5477_v16  ;;  %v2041_v59 = vpop.f32.mrb[55].mxu1 }
 0x400   : > { %6523 = vst [vmem:[#allocation55_spill] sm:$0xff] %v5747_v33  ;;  %v2185_v56 = vmul.f32 %v5747_v33, %v5747_v33  ;;  %v2042_v38 = vadd.f32 %v2041_v59, %v5481_v35  ;;  %2272 = vadd.xlane.f32.xlu1 %v2271_v40 }
 0x401   : > { %v5755_v45 = vmax.f32 %v2040_v14, 0.0 }
 0x402   : > { %v5757_v26 = vmax.f32 %v2042_v38, 0.0  ;;  %v2045_v42 = vpop.f32.mrb[56].mxu1  ;;  %v2274_v50 = vadd.f32 %v2185_v56, %v2184_v10 }
 0x403   : > { %6524 = vst [vmem:[#allocation56_spill] sm:$0xff] %v5755_v45  ;;  %v2186_v54 = vmul.f32 %v5755_v45, %v5755_v45  ;;  %v2046_v39 = vadd.f32 %v2045_v42, %v5477_v16  ;;  %v2047_v12 = vpop.f32.mrb[57].mxu1 }
 0x404   : > { %6525 = vst [vmem:[#allocation57_spill] sm:$0xff] %v5757_v26  ;;  %v2187_v41 = vmul.f32 %v5757_v26, %v5757_v26  ;;  %v2048_v33 = vadd.f32 %v2047_v12, %v5481_v35  ;;  %2275 = vadd.xlane.f32.xlu1 %v2274_v50 }
 0x405   : > { %v5765_v59 = vmax.f32 %v2046_v39, 0.0 }
 0x406   : > { %v5767_v40 = vmax.f32 %v2048_v33, 0.0  ;;  %v2051_v38 = vpop.f32.mrb[58].mxu1  ;;  %v2277_v14 = vadd.f32 %v2187_v41, %v2186_v54 }
 0x407   : > { %6526 = vst [vmem:[#allocation58_spill] sm:$0xff] %v5765_v59  ;;  %v2188_v10 = vmul.f32 %v5765_v59, %v5765_v59  ;;  %v2052_v56 = vadd.f32 %v2051_v38, %v5477_v16  ;;  %v2053_v45 = vpop.f32.mrb[59].mxu1 }
 0x408   : > { %6527 = vst [vmem:[#allocation59_spill] sm:$0xff] %v5767_v40  ;;  %v2189_v42 = vmul.f32 %v5767_v40, %v5767_v40  ;;  %v2054_v26 = vadd.f32 %v2053_v45, %v5481_v35  ;;  %2278 = vadd.xlane.f32.xlu1 %v2277_v14 }
 0x409   : > { %v5775_v12 = vmax.f32 %v2052_v56, 0.0 }
 0x40a   : > { %v5777_v50 = vmax.f32 %v2054_v26, 0.0  ;;  %v2057_v33 = vpop.f32.mrb[60].mxu1  ;;  %v2280_v39 = vadd.f32 %v2189_v42, %v2188_v10 }
 0x40b   : > { %6528 = vst [vmem:[#allocation60_spill] sm:$0xff] %v5775_v12  ;;  %v2190_v54 = vmul.f32 %v5775_v12, %v5775_v12  ;;  %v2058_v41 = vadd.f32 %v2057_v33, %v5477_v16  ;;  %v2059_v59 = vpop.f32.mrb[61].mxu1 }
 0x40c   : > { %6529 = vst [vmem:[#allocation61_spill] sm:$0xff] %v5777_v50  ;;  %v2191_v38 = vmul.f32 %v5777_v50, %v5777_v50  ;;  %v2060_v40 = vadd.f32 %v2059_v59, %v5481_v35  ;;  %2281 = vadd.xlane.f32.xlu1 %v2280_v39 }
 0x40d   : > { %v5785_v45 = vmax.f32 %v2058_v41, 0.0 }
 0x40e   : > { %v5787_v14 = vmax.f32 %v2060_v40, 0.0  ;;  %v2063_v26 = vpop.f32.mrb[62].mxu1  ;;  %v2283_v56 = vadd.f32 %v2191_v38, %v2190_v54 }
 0x40f   : > { %6530 = vst [vmem:[#allocation62_spill] sm:$0xff] %v5785_v45  ;;  %v2192_v10 = vmul.f32 %v5785_v45, %v5785_v45  ;;  %v2064_v42 = vadd.f32 %v2063_v26, %v5477_v16  ;;  %v2065_v12 = vpop.f32.mrb[63].mxu1  ;;  %v6534_v26 = vld [vmem:[#allocation30_spill] sm:$0xff] }
 0x410   : > { %6531 = vst [vmem:[#allocation63_spill] sm:$0xff] %v5787_v14  ;;  %v2193_v33 = vmul.f32 %v5787_v14, %v5787_v14  ;;  %v2066_v50 = vadd.f32 %v2065_v12, %v5481_v35  ;;  %2284 = vadd.xlane.f32.xlu1 %v2283_v56  ;;  %v1319_v45 = vmul.f32 0.00390625, %v6534_v26 }
 0x411   : > { %v5795_v59 = vmax.f32 %v2064_v42, 0.0 }
 0x412   : > { %v5797_v39 = vmax.f32 %v2066_v50, 0.0  ;;  %v2286_v40 = vadd.f32 %v2193_v33, %v2192_v10  ;;  %v6536_v50 = vld [vmem:[#allocation31_spill] sm:$0xff] }
 0x413   : > { %6532 = vst [vmem:[#allocation64_spill] sm:$0xff] %v5795_v59  ;;  %v2194_v54 = vmul.f32 %v5795_v59, %v5795_v59  ;;  %v1320_v10 = vmul.f32 0.00390625, %v6536_v50 }
 0x414   : > { %6533 = vst [vmem:[#allocation65_spill] sm:$0xff] %v5797_v39  ;;  %v2195_v41 = vmul.f32 %v5797_v39, %v5797_v39  ;;  %2287 = vadd.xlane.f32.xlu1 %v2286_v40  ;;  %v6538_v39 = vld [vmem:[#allocation32_spill] sm:$0xff] }
 0x415   : > { %v1321_v40 = vmul.f32 0.00390625, %v6538_v39 }
 0x416   : > { %v2289_v16 = vadd.f32 %v2195_v41, %v2194_v54 }
 0x418   : > { %2290 = vadd.xlane.f32.xlu1 %v2289_v16 }
 0x429   : > { %v2198_v38 = vpop.xlane.xlu0 %2197 }
 0x42a   : > { %3885 = vrsqrt.f32 %v2198_v38  ;;  %v2292_v35 = vmul.f32 0.00390625, %v2198_v38  ;;  %vm2358_vm0 = vcmp.eq.f32.partialorder %v2198_v38, inf  ;;  %v2361_v26 = vand.u32 2147483648, %v2198_v38 }
 0x42b   : > { %vm2360_vm1 = vcmp.eq.f32.partialorder %v2198_v38, 0.0 }
 0x42c   : > { %v5804_v56 = vadd.f32 %v2292_v35, %v1319_v45  ;;  %v6540_v35 = vld [vmem:[#allocation33_spill] sm:$0xff] }
 0x42d   : > { %v2201_v12 = vpop.xlane.xlu1 %2200  ;;  %v1322_v50 = vmul.f32 0.00390625, %v6540_v35 }
 0x42e   : > { %6535 = vst [vmem:[#allocation30_spill] sm:$0xff] %v5804_v56  ;;  %3887 = vrsqrt.f32 %v2201_v12  ;;  %v2293_v42 = vmul.f32 0.00390625, %v2201_v12  ;;  %vm2365_vm2 = vcmp.eq.f32.partialorder %v2201_v12, inf  ;;  %vm2367_vm3 = vcmp.eq.f32.partialorder %v2201_v12, 0.0 }
 0x430   : > { %v5807_v59 = vadd.f32 %v2293_v42, %v1320_v10 }
 0x431   : > { %v2204_v33 = vpop.xlane.xlu0 %2203 }
 0x432   : > { %6537 = vst [vmem:[#allocation31_spill] sm:$0xff] %v5807_v59  ;;  %3889 = vrsqrt.f32 %v2204_v33  ;;  %v2294_v54 = vmul.f32 0.00390625, %v2204_v33  ;;  %vm2372_vm4 = vcmp.eq.f32.partialorder %v2204_v33, inf  ;;  %vm2374_vm5 = vcmp.eq.f32.partialorder %v2204_v33, 0.0 }
 0x434   : > { %v3886_v41 = vpop.eup %3885  ;;  %v5810_v18 = vadd.f32 %v2294_v54, %v1321_v40  ;;  %v1323_v40 = vmul.f32 0.00390625, %v5170_v29 }
 0x435   : > { %v2357_v16 = vmul.f32 %v3886_v41, %v2198_v38  ;;  %v2207_v14 = vpop.xlane.xlu1 %2206  ;;  %v2368_v41 = vand.u32 2147483648, %v2201_v12 }
 0x436   : > { %6539 = vst [vmem:[#allocation32_spill] sm:$0xff] %v5810_v18  ;;  %3891 = vrsqrt.f32 %v2207_v14  ;;  %v2295_v56 = vmul.f32 0.00390625, %v2207_v14  ;;  %vm2379_vm6 = vcmp.eq.f32.partialorder %v2207_v14, inf  ;;  %vm2381_vm7 = vcmp.eq.f32.partialorder %v2207_v14, 0.0 }
 0x437   : > { %v2359_v45 = vsel %vm2358_vm0, %v2198_v38, %v2357_v16 }
 0x438   : > { %v3888_v28 = vpop.eup %3887  ;;  %v2362_v10 = vsel %vm2360_vm1, %v2361_v26, %v2359_v45  ;;  %v5813_v39 = vadd.f32 %v2295_v56, %v1322_v50  ;;  %v1324_v56 = vmul.f32 0.00390625, %v5178_v2 }
 0x439   : > { %v2364_v42 = vmul.f32 %v3888_v28, %v2201_v12  ;;  %v2210_v59 = vpop.xlane.xlu0 %2209  ;;  %v2580_v60 = vadd.f32 0.0001, %v2362_v10  ;;  %v2375_v28 = vand.u32 2147483648, %v2204_v33 }
 0x43a   : > { %3893 = vrsqrt.f32 %v2210_v59  ;;  %v2296_v16 = vmul.f32 0.00390625, %v2210_v59  ;;  %vm2386_vm8 = vcmp.eq.f32.partialorder %v2210_v59, inf  ;;  %vm2388_vm9 = vcmp.eq.f32.partialorder %v2210_v59, 0.0 }
 0x43b   : > { %v2366_v54 = vsel %vm2365_vm2, %v2201_v12, %v2364_v42  ;;  %3895 = vrcp.f32 %v2580_v60 }
 0x43c   : > { %v3890_v38 = vpop.eup %3889  ;;  %v2369_v18 = vsel %vm2367_vm3, %v2368_v41, %v2366_v54  ;;  %v5816_v26 = vadd.f32 %v2296_v16, %v1323_v40  ;;  %v1325_v40 = vmul.f32 0.00390625, %v5186_v21 }
 0x43d   : > { %v2371_v35 = vmul.f32 %v3890_v38, %v2204_v33  ;;  %v2213_v57 = vpop.xlane.xlu1 %2212  ;;  %v2581_v44 = vadd.f32 0.0001, %v2369_v18  ;;  %v2382_v18 = vand.u32 2147483648, %v2207_v14 }
 0x43e   : > { %3897 = vrsqrt.f32 %v2213_v57  ;;  %v2297_v29 = vmul.f32 0.00390625, %v2213_v57  ;;  %vm2393_vm10 = vcmp.eq.f32.partialorder %v2213_v57, inf  ;;  %vm2395_vm11 = vcmp.eq.f32.partialorder %v2213_v57, 0.0 }
 0x43f   : > { %v2373_v45 = vsel %vm2372_vm4, %v2204_v33, %v2371_v35  ;;  %3899 = vrcp.f32 %v2581_v44 }
 0x440   : > { %v3892_v50 = vpop.eup %3891  ;;  %v2376_v12 = vsel %vm2374_vm5, %v2375_v28, %v2373_v45  ;;  %v5821_v41 = vadd.f32 %v2297_v29, %v1324_v56  ;;  %v2389_v45 = vand.u32 2147483648, %v2210_v59 }
 0x441   : > { %v2378_v60 = vmul.f32 %v3892_v50, %v2207_v14  ;;  %v5819_v10 = vpop.xlane.xlu0 %2215  ;;  %v2582_v42 = vadd.f32 0.0001, %v2376_v12 }
 0x442   : > { %3901 = vrsqrt.f32 %v5819_v10  ;;  %v2298_v2 = vmul.f32 0.00390625, %v5819_v10  ;;  %vm2400_vm12 = vcmp.eq.f32.partialorder %v5819_v10, inf  ;;  %vm2402_vm13 = vcmp.eq.f32.partialorder %v5819_v10, 0.0 }
 0x443   : > { %v2380_v54 = vsel %vm2379_vm6, %v2207_v14, %v2378_v60  ;;  %3903 = vrcp.f32 %v2582_v42 }
 0x444   : > { %v3894_v44 = vpop.eup %3893  ;;  %v2383_v33 = vsel %vm2381_vm7, %v2382_v18, %v2380_v54  ;;  %v5828_v56 = vadd.f32 %v2298_v2, %v1325_v40  ;;  %v1326_v2 = vmul.f32 0.00390625, %v5194_v62 }
 0x445   : > { %v3896_v16 = vpop.eup %3895  ;;  %v2385_v38 = vmul.f32 %v3894_v44, %v2210_v59  ;;  %v5826_v35 = vpop.xlane.xlu1 %2218  ;;  %v2583_v28 = vadd.f32 0.0001, %v2383_v33 }
 0x446   : > { %3905 = vrsqrt.f32 %v5826_v35  ;;  %v2645_v14 = vmul.f32 %v3896_v16, %v5487_v24  ;;  %v2644_v29 = vmul.f32 %v3896_v16, %v5485_v53  ;;  %v2299_v60 = vmul.f32 0.00390625, %v5826_v35 }
 0x447   : > { %v2387_v21 = vsel %vm2386_vm8, %v2210_v59, %v2385_v38  ;;  %3907 = vrcp.f32 %v2583_v28  ;;  %v2396_v59 = vand.u32 2147483648, %v2213_v57  ;;  %vm2407_vm14 = vcmp.eq.f32.partialorder %v5826_v35, inf }
 0x448   : > { %v3898_v50 = vpop.eup %3897  ;;  %v2390_v12 = vsel %vm2388_vm9, %v2389_v45, %v2387_v21  ;;  %2811 = vmatprep.mubr.f32.mxu0 %v2645_v14  ;;  %v5840_v38 = vadd.f32 %v2299_v60, %v1326_v2  ;;  %vm2409_vm15 = vcmp.eq.f32.partialorder %v5826_v35, 0.0 }
 0x449   : > { %v3900_v42 = vpop.eup %3899  ;;  %v2392_v18 = vmul.f32 %v3898_v50, %v2213_v57  ;;  %v5834_v40 = vpop.xlane.xlu0 %2221  ;;  %v2584_v54 = vadd.f32 0.0001, %v2390_v12  ;;  %2812 = vmatmul.mubr.f32.vlgmr.msra.gmra.mrb[64].mxu0 %v2644_v29 }
 0x44a   : > { %3909 = vrsqrt.f32 %v5834_v40  ;;  %v2647_v24 = vmul.f32 %v3900_v42, %v5497_v55  ;;  %v2646_v44 = vmul.f32 %v3900_v42, %v5495_v22  ;;  %v2300_v28 = vmul.f32 0.00390625, %v5834_v40 }
 0x44b   : > { %v2394_v53 = vsel %vm2393_vm10, %v2213_v57, %v2392_v18  ;;  %3911 = vrcp.f32 %v2584_v54  ;;  %v1327_v57 = vmul.f32 0.00390625, %v5204_v27  ;;  %v2403_v22 = vand.u32 2147483648, %v5819_v10 }
 0x44c   : > { %v3902_v33 = vpop.eup %3901  ;;  %v2397_v16 = vsel %vm2395_vm11, %v2396_v59, %v2394_v53  ;;  %2816 = vmatprep.mubr.f32.mxu0 %v2647_v24  ;;  %vm2414_vm0 = vcmp.eq.f32.partialorder %v5834_v40, inf  ;;  %vm2416_vm1 = vcmp.eq.f32.partialorder %v5834_v40, 0.0 }
 0x44d   : > { %v3904_v45 = vpop.eup %3903  ;;  %v2399_v62 = vmul.f32 %v3902_v33, %v5819_v10  ;;  %v5844_v21 = vpop.xlane.xlu1 %2224  ;;  %v2585_v14 = vadd.f32 0.0001, %v2397_v16  ;;  %2817 = vmatmul.mubr.f32.gmra.mrb[66].mxu0 %v2646_v44  ;;  %v5854_v42 = vadd.f32 %v2300_v28, %v1327_v57 }
 0x44e   : > { %3913 = vrsqrt.f32 %v5844_v21  ;;  %v2649_v29 = vmul.f32 %v3904_v45, %v5507_v52  ;;  %v2648_v50 = vmul.f32 %v3904_v45, %v5505_v34  ;;  %v2301_v27 = vmul.f32 0.00390625, %v5844_v21 }
 0x44f   : > { %v2401_v55 = vsel %vm2400_vm12, %v5819_v10, %v2399_v62  ;;  %3915 = vrcp.f32 %v2585_v14  ;;  %v1328_v10 = vmul.f32 0.00390625, %v5214_v37  ;;  %v2410_v34 = vand.u32 2147483648, %v5826_v35 }
 0x450   : > { %v3906_v12 = vpop.eup %3905  ;;  %v2404_v60 = vsel %vm2402_vm13, %v2403_v22, %v2401_v55  ;;  %2821 = vmatprep.mubr.f32.mxu0 %v2649_v29  ;;  %vm2421_vm2 = vcmp.eq.f32.partialorder %v5844_v21, inf  ;;  %vm2423_vm3 = vcmp.eq.f32.partialorder %v5844_v21, 0.0 }
 0x451   : > { %v3908_v18 = vpop.eup %3907  ;;  %v2406_v54 = vmul.f32 %v3906_v12, %v5826_v35  ;;  %v5858_v2 = vpop.xlane.xlu0 %2227  ;;  %v2586_v59 = vadd.f32 0.0001, %v2404_v60  ;;  %2822 = vmatmul.mubr.f32.gmra.mrb[68].mxu0 %v2648_v50  ;;  %v5868_v16 = vadd.f32 %v2301_v27, %v1328_v10 }
 0x452   : > { %3917 = vrsqrt.f32 %v5858_v2  ;;  %v2651_v53 = vmul.f32 %v3908_v18, %v5517_v47  ;;  %v2650_v24 = vmul.f32 %v3908_v18, %v5515_v4  ;;  %v2302_v37 = vmul.f32 0.00390625, %v5858_v2 }
 0x453   : > { %v2408_v52 = vsel %vm2407_vm14, %v5826_v35, %v2406_v54  ;;  %3919 = vrcp.f32 %v2586_v59  ;;  %v1329_v35 = vmul.f32 0.00390625, %v5224_v15  ;;  %v2417_v4 = vand.u32 2147483648, %v5834_v40 }
 0x454   : > { %v3910_v44 = vpop.eup %3909  ;;  %v2411_v33 = vsel %vm2409_vm15, %v2410_v34, %v2408_v52  ;;  %2826 = vmatprep.mubr.f32.mxu0 %v2651_v53  ;;  %vm2428_vm4 = vcmp.eq.f32.partialorder %v5858_v2, inf  ;;  %vm2430_vm5 = vcmp.eq.f32.partialorder %v5858_v2, 0.0 }
 0x455   : > { %v3912_v28 = vpop.eup %3911  ;;  %v2413_v45 = vmul.f32 %v3910_v44, %v5834_v40  ;;  %v5872_v62 = vpop.xlane.xlu1 %2230  ;;  %v2587_v14 = vadd.f32 0.0001, %v2411_v33  ;;  %2827 = vmatmul.mubr.f32.gmra.mrb[70].mxu0 %v2650_v24  ;;  %v5882_v50 = vadd.f32 %v2302_v37, %v1329_v35 }
 0x456   : > { %3921 = vrsqrt.f32 %v5872_v62  ;;  %v2653_v57 = vmul.f32 %v3912_v28, %v5527_v31  ;;  %v2652_v22 = vmul.f32 %v3912_v28, %v5525_v17  ;;  %v2303_v15 = vmul.f32 0.00390625, %v5872_v62 }
 0x457   : > { %v2415_v47 = vsel %vm2414_vm0, %v5834_v40, %v2413_v45  ;;  %3923 = vrcp.f32 %v2587_v14  ;;  %v1330_v40 = vmul.f32 0.00390625, %v5234_v25  ;;  %v2424_v17 = vand.u32 2147483648, %v5844_v21 }
 0x458   : > { %v3914_v55 = vpop.eup %3913  ;;  %v2418_v29 = vsel %vm2416_vm1, %v2417_v4, %v2415_v47  ;;  %2831 = vmatprep.mubr.f32.mxu0 %v2653_v57  ;;  %vm2435_vm6 = vcmp.eq.f32.partialorder %v5872_v62, inf  ;;  %vm2437_vm7 = vcmp.eq.f32.partialorder %v5872_v62, 0.0 }
 0x459   : > { %v3916_v12 = vpop.eup %3915  ;;  %v2420_v60 = vmul.f32 %v3914_v55, %v5844_v21  ;;  %v5886_v27 = vpop.xlane.xlu0 %2233  ;;  %v2588_v18 = vadd.f32 0.0001, %v2418_v29  ;;  %2832 = vmatmul.mubr.f32.gmra.mrb[72].mxu0 %v2652_v22  ;;  %v5896_v52 = vadd.f32 %v2303_v15, %v1330_v40 }
 0x45a   : > { %3925 = vrsqrt.f32 %v5886_v27  ;;  %v2655_v54 = vmul.f32 %v3916_v12, %v5537_v9  ;;  %v2654_v59 = vmul.f32 %v3916_v12, %v5535_v58  ;;  %v2304_v25 = vmul.f32 0.00390625, %v5886_v27 }
 0x45b   : > { %v2422_v31 = vsel %vm2421_vm2, %v5844_v21, %v2420_v60  ;;  %3927 = vrcp.f32 %v2588_v18  ;;  %v1331_v21 = vmul.f32 0.00390625, %v5244_v23  ;;  %v2431_v58 = vand.u32 2147483648, %v5858_v2 }
 0x45c   : > { %v3918_v10 = vpop.eup %3917  ;;  %v2425_v34 = vsel %vm2423_vm3, %v2424_v17, %v2422_v31  ;;  %2836 = vmatprep.mubr.f32.mxu0 %v2655_v54  ;;  %vm2442_vm8 = vcmp.eq.f32.partialorder %v5886_v27, inf  ;;  %vm2444_vm9 = vcmp.eq.f32.partialorder %v5886_v27, 0.0 }
 0x45d   : > { %v3920_v53 = vpop.eup %3919  ;;  %v2427_v24 = vmul.f32 %v3918_v10, %v5858_v2  ;;  %v5900_v44 = vpop.xlane.xlu1 %2236  ;;  %v2589_v33 = vadd.f32 0.0001, %v2425_v34  ;;  %2837 = vmatmul.mubr.f32.gmra.mrb[74].mxu0 %v2654_v59  ;;  %v5910_v35 = vadd.f32 %v2304_v25, %v1331_v21 }
 0x45e   : > { %3929 = vrsqrt.f32 %v5900_v44  ;;  %v2657_v37 = vmul.f32 %v3920_v53, %v5547_v49  ;;  %v2656_v28 = vmul.f32 %v3920_v53, %v5545_v19  ;;  %v2305_v23 = vmul.f32 0.00390625, %v5900_v44 }
 0x45f   : > { %v2429_v9 = vsel %vm2428_vm4, %v5858_v2, %v2427_v24  ;;  %3931 = vrcp.f32 %v2589_v33  ;;  %v1332_v2 = vmul.f32 0.00390625, %v5254_v46  ;;  %v2438_v19 = vand.u32 2147483648, %v5872_v62 }
 0x460   : > { %v3922_v45 = vpop.eup %3921  ;;  %v2432_v14 = vsel %vm2430_vm5, %v2431_v58, %v2429_v9  ;;  %2841 = vmatprep.mubr.f32.mxu0 %v2657_v37  ;;  %vm2449_vm10 = vcmp.eq.f32.partialorder %v5900_v44, inf  ;;  %vm2451_vm11 = vcmp.eq.f32.partialorder %v5900_v44, 0.0 }
 0x461   : > { %v3924_v4 = vpop.eup %3923  ;;  %v2434_v47 = vmul.f32 %v3922_v45, %v5872_v62  ;;  %v5914_v57 = vpop.xlane.xlu0 %2239  ;;  %v2590_v22 = vadd.f32 0.0001, %v2432_v14  ;;  %2842 = vmatmul.mubr.f32.gmra.mrb[76].mxu0 %v2656_v28  ;;  %v5924_v60 = vadd.f32 %v2305_v23, %v1332_v2 }
 0x462   : > { %3933 = vrsqrt.f32 %v5914_v57  ;;  %v2659_v55 = vmul.f32 %v3924_v4, %v5557_v20  ;;  %v2658_v29 = vmul.f32 %v3924_v4, %v5555_v8  ;;  %v2306_v46 = vmul.f32 0.00390625, %v5914_v57 }
 0x463   : > { %v2436_v49 = vsel %vm2435_vm6, %v5872_v62, %v2434_v47  ;;  %3935 = vrcp.f32 %v2590_v22  ;;  %v1333_v62 = vmul.f32 0.00390625, %v5264_v6  ;;  %v2445_v8 = vand.u32 2147483648, %v5886_v27 }
 0x464   : > { %v3926_v15 = vpop.eup %3925  ;;  %v2439_v12 = vsel %vm2437_vm7, %v2438_v19, %v2436_v49  ;;  %2846 = vmatprep.mubr.f32.mxu0 %v2659_v55  ;;  %vm2456_vm12 = vcmp.eq.f32.partialorder %v5914_v57, inf  ;;  %vm2458_vm13 = vcmp.eq.f32.partialorder %v5914_v57, 0.0 }
 0x465   : > { %v3928_v18 = vpop.eup %3927  ;;  %v2441_v40 = vmul.f32 %v3926_v15, %v5886_v27  ;;  %v5928_v17 = vpop.xlane.xlu1 %2242  ;;  %v2591_v31 = vadd.f32 0.0001, %v2439_v12  ;;  %2847 = vmatmul.mubr.f32.gmra.mrb[78].mxu0 %v2658_v29  ;;  %v5938_v25 = vadd.f32 %v2306_v46, %v1333_v62 }
 0x466   : > { %3937 = vrsqrt.f32 %v5928_v17  ;;  %v2661_v54 = vmul.f32 %v3928_v18, %v5567_v5  ;;  %v2660_v59 = vmul.f32 %v3928_v18, %v5565_v0  ;;  %v2307_v6 = vmul.f32 0.00390625, %v5928_v17 }
 0x467   : > { %v2443_v20 = vsel %vm2442_vm8, %v5886_v27, %v2441_v40  ;;  %3939 = vrcp.f32 %v2591_v31  ;;  %v1334_v27 = vmul.f32 0.00390625, %v5274_v48  ;;  %v2452_v0 = vand.u32 2147483648, %v5900_v44 }
 0x468   : > { %v3930_v10 = vpop.eup %3929  ;;  %v2446_v34 = vsel %vm2444_vm9, %v2445_v8, %v2443_v20  ;;  %2851 = vmatprep.mubr.f32.mxu0 %v2661_v54  ;;  %vm2463_vm14 = vcmp.eq.f32.partialorder %v5928_v17, inf  ;;  %vm2465_vm15 = vcmp.eq.f32.partialorder %v5928_v17, 0.0 }
 0x469   : > { %v3932_v53 = vpop.eup %3931  ;;  %v2448_v24 = vmul.f32 %v3930_v10, %v5900_v44  ;;  %v5942_v33 = vpop.xlane.xlu0 %2245  ;;  %v2592_v21 = vadd.f32 0.0001, %v2446_v34  ;;  %2852 = vmatmul.mubr.f32.gmra.mrb[80].mxu0 %v2660_v59  ;;  %v5952_v45 = vadd.f32 %v2307_v6, %v1334_v27 }
 0x46a   : > { %3941 = vrsqrt.f32 %v5942_v33  ;;  %v2663_v58 = vmul.f32 %v3932_v53, %v5577_v30  ;;  %v2662_v9 = vmul.f32 %v3932_v53, %v5575_v43  ;;  %v2308_v48 = vmul.f32 0.00390625, %v5942_v33 }
 0x46b   : > { %v2450_v5 = vsel %vm2449_vm10, %v5900_v44, %v2448_v24  ;;  %3943 = vrcp.f32 %v2592_v21  ;;  %v1335_v44 = vmul.f32 0.00390625, %v5284_v61  ;;  %v2459_v43 = vand.u32 2147483648, %v5914_v57 }
 0x46c   : > { %v3934_v37 = vpop.eup %3933  ;;  %v2453_v28 = vsel %vm2451_vm11, %v2452_v0, %v2450_v5  ;;  %2856 = vmatprep.mubr.f32.mxu0 %v2663_v58  ;;  %vm2470_vm0 = vcmp.eq.f32.partialorder %v5942_v33, inf  ;;  %vm2472_vm1 = vcmp.eq.f32.partialorder %v5942_v33, 0.0 }
 0x46d   : > { %v3936_v14 = vpop.eup %3935  ;;  %v2455_v23 = vmul.f32 %v3934_v37, %v5914_v57  ;;  %v5956_v4 = vpop.xlane.xlu0 %2248  ;;  %v2593_v47 = vadd.f32 0.0001, %v2453_v28  ;;  %2857 = vmatmul.mubr.f32.gmra.mrb[82].mxu0 %v2662_v9  ;;  %v5966_v55 = vadd.f32 %v2308_v48, %v1335_v44  ;;  %v6541_v9 = vld [vmem:[#allocation14_spill] sm:$0xff]  ;;  %v6542_v28 = vld [vmem:[#allocation15_spill] sm:$0xff] }
 0x46e   : > { %3945 = vrsqrt.f32 %v5956_v4  ;;  %v2665_v22 = vmul.f32 %v3936_v14, %v5587_v51  ;;  %v2664_v2 = vmul.f32 %v3936_v14, %v5585_v11  ;;  %v2309_v61 = vmul.f32 0.00390625, %v5956_v4 }
 0x46f   : > { %v2457_v30 = vsel %vm2456_vm12, %v5914_v57, %v2455_v23  ;;  %3947 = vrcp.f32 %v2593_v47  ;;  %v1336_v57 = vmul.f32 0.00390625, %v5294_v36  ;;  %v2466_v11 = vand.u32 2147483648, %v5928_v17 }
 0x470   : > { %v3938_v19 = vpop.eup %3937  ;;  %v2460_v49 = vsel %vm2458_vm13, %v2459_v43, %v2457_v30  ;;  %2861 = vmatprep.mubr.f32.mxu0 %v2665_v22  ;;  %vm2477_vm2 = vcmp.eq.f32.partialorder %v5956_v4, inf  ;;  %vm2479_vm3 = vcmp.eq.f32.partialorder %v5956_v4, 0.0 }
 0x471   : > { %v3940_v29 = vpop.eup %3939  ;;  %v2462_v15 = vmul.f32 %v3938_v19, %v5928_v17  ;;  %v5970_v12 = vpop.xlane.xlu0 %2251  ;;  %v2594_v46 = vadd.f32 0.0001, %v2460_v49  ;;  %2862 = vmatmul.mubr.f32.gmra.mrb[84].mxu0 %v2664_v2  ;;  %v5980_v8 = vadd.f32 %v2309_v61, %v1336_v57  ;;  %v6543_v2 = vld [vmem:[#allocation34_spill] sm:$0xff]  ;;  %v6544_v61 = vld [vmem:[#allocation16_spill] sm:$0xff] }
 0x472   : > { %3949 = vrsqrt.f32 %v5970_v12  ;;  %v2667_v18 = vmul.f32 %v3940_v29, %v5597_v7  ;;  %v2666_v40 = vmul.f32 %v3940_v29, %v5595_v1  ;;  %v2310_v36 = vmul.f32 0.00390625, %v5970_v12 }
 0x473   : > { %v2464_v51 = vsel %vm2463_vm14, %v5928_v17, %v2462_v15  ;;  %3951 = vrcp.f32 %v2594_v46  ;;  %v1337_v17 = vmul.f32 0.00390625, %v5304_v13  ;;  %v2473_v1 = vand.u32 2147483648, %v5942_v33  ;;  %v6545_v15 = vld [vmem:[#allocation17_spill] sm:$0xff] }
 0x474   : > { %v3942_v31 = vpop.eup %3941  ;;  %v2467_v62 = vsel %vm2465_vm15, %v2466_v11, %v2464_v51  ;;  %2866 = vmatprep.mubr.f32.mxu0 %v2667_v18  ;;  %vm2484_vm4 = vcmp.eq.f32.partialorder %v5970_v12, inf  ;;  %vm2486_vm5 = vcmp.eq.f32.partialorder %v5970_v12, 0.0  ;;  %v2487_v19 = vand.u32 2147483648, %v5970_v12 }
 0x475   : > { %v3944_v20 = vpop.eup %3943  ;;  %v2469_v54 = vmul.f32 %v3942_v31, %v5942_v33  ;;  %v5984_v59 = vpop.xlane.xlu0 %2254  ;;  %v2595_v10 = vadd.f32 0.0001, %v2467_v62  ;;  %2867 = vmatmul.mubr.f32.gmra.mrb[86].mxu0 %v2666_v40  ;;  %v5994_v21 = vadd.f32 %v2310_v36, %v1337_v17  ;;  %v6547_v17 = vld [vmem:[#allocation18_spill] sm:$0xff] }
 0x476   : > { %3953 = vrsqrt.f32 %v5984_v59  ;;  %v2669_v34 = vmul.f32 %v3944_v20, %v5607_v63  ;;  %v2668_v6 = vmul.f32 %v3944_v20, %v5605_v32  ;;  %v2311_v13 = vmul.f32 0.00390625, %v5984_v59  ;;  %v6546_v20 = vld [vmem:[#allocation35_spill] sm:$0xff] }
 0x477   : > { %v2471_v7 = vsel %vm2470_vm0, %v5942_v33, %v2469_v54  ;;  %3955 = vrcp.f32 %v2595_v10  ;;  %v1338_v33 = vmul.f32 0.00390625, %v5314_v3  ;;  %v2480_v32 = vand.u32 2147483648, %v5956_v4 }
 0x478   : > { %v3946_v53 = vpop.eup %3945  ;;  %v2474_v24 = vsel %vm2472_vm1, %v2473_v1, %v2471_v7  ;;  %2871 = vmatprep.mubr.f32.mxu0 %v2669_v34  ;;  %vm2491_vm6 = vcmp.eq.f32.partialorder %v5984_v59, inf  ;;  %vm2493_vm7 = vcmp.eq.f32.partialorder %v5984_v59, 0.0  ;;  %v2494_v54 = vand.u32 2147483648, %v5984_v59  ;;  %v6548_v7 = vld [vmem:[#allocation19_spill] sm:$0xff] }
 0x479   : > { %v3948_v27 = vpop.eup %3947  ;;  %v2476_v0 = vmul.f32 %v3946_v53, %v5956_v4  ;;  %v5998_v5 = vpop.xlane.xlu0 %2257  ;;  %v2596_v58 = vadd.f32 0.0001, %v2474_v24  ;;  %2872 = vmatmul.mubr.f32.gmra.mrb[88].mxu0 %v2668_v6  ;;  %v6008_v47 = vadd.f32 %v2311_v13, %v1338_v33 }
 0x47a   : > { %3957 = vrsqrt.f32 %v5998_v5  ;;  %v2671_v37 = vmul.f32 %v3948_v27, %v6541_v9  ;;  %v2670_v48 = vmul.f32 %v3948_v27, %v6542_v28  ;;  %v2312_v3 = vmul.f32 0.00390625, %v5998_v5 }
 0x47b   : > { %v2478_v63 = vsel %vm2477_vm2, %v5956_v4, %v2476_v0  ;;  %3959 = vrcp.f32 %v2596_v58  ;;  %v1339_v4 = vmul.f32 0.00390625, %v6543_v2  ;;  %vm2498_vm8 = vcmp.eq.f32.partialorder %v5998_v5, inf }
 0x47c   : > { %v3950_v14 = vpop.eup %3949  ;;  %v2481_v23 = vsel %vm2479_vm3, %v2480_v32, %v2478_v63  ;;  %2876 = vmatprep.mubr.f32.mxu0 %v2671_v37  ;;  %v6549_v32 = vld [vmem:[#allocation36_spill] sm:$0xff]  ;;  %vm2500_vm9 = vcmp.eq.f32.partialorder %v5998_v5, 0.0  ;;  %v2501_v63 = vand.u32 2147483648, %v5998_v5 }
 0x47d   : > { %v3952_v44 = vpop.eup %3951  ;;  %v2483_v43 = vmul.f32 %v3950_v14, %v5970_v12  ;;  %v6012_v30 = vpop.xlane.xlu0 %2260  ;;  %v2597_v22 = vadd.f32 0.0001, %v2481_v23  ;;  %2877 = vmatmul.mubr.f32.gmra.mrb[90].mxu0 %v2670_v48  ;;  %v6022_v51 = vadd.f32 %v2312_v3, %v1339_v4  ;;  %v6550_v37 = vld [vmem:[#allocation20_spill] sm:$0xff]  ;;  %v6551_v48 = vld [vmem:[#allocation21_spill] sm:$0xff] }
 0x47e   : > { %3961 = vrsqrt.f32 %v6012_v30  ;;  %v2673_v29 = vmul.f32 %v3952_v44, %v6544_v61  ;;  %v2672_v46 = vmul.f32 %v3952_v44, %v6545_v15  ;;  %v2313_v18 = vmul.f32 0.00390625, %v6012_v30 }
 0x47f   : > { %v2485_v49 = vsel %vm2484_vm4, %v5970_v12, %v2483_v43  ;;  %3963 = vrcp.f32 %v2597_v22  ;;  %v1340_v12 = vmul.f32 0.00390625, %v6546_v20  ;;  %vm2505_vm10 = vcmp.eq.f32.partialorder %v6012_v30, inf  ;;  %v6554_v20 = vld [vmem:[#allocation38_spill] sm:$0xff] }
 0x480   : > { %v3954_v57 = vpop.eup %3953  ;;  %v2488_v11 = vsel %vm2486_vm5, %v2487_v19, %v2485_v49  ;;  %2881 = vmatprep.mubr.f32.mxu0 %v2673_v29  ;;  %vm2507_vm11 = vcmp.eq.f32.partialorder %v6012_v30, 0.0  ;;  %v6552_v49 = vld [vmem:[#allocation22_spill] sm:$0xff]  ;;  %v6553_v29 = vld [vmem:[#allocation23_spill] sm:$0xff] }
 0x481   : > { %v3956_v40 = vpop.eup %3955  ;;  %v2490_v31 = vmul.f32 %v3954_v57, %v5984_v59  ;;  %v6026_v62 = vpop.xlane.xlu0 %2263  ;;  %v2598_v36 = vadd.f32 0.0001, %v2488_v11  ;;  %2882 = vmatmul.mubr.f32.gmra.mrb[92].mxu0 %v2672_v46  ;;  %v6036_v24 = vadd.f32 %v2313_v18, %v1340_v12  ;;  %v1343_v12 = vmul.f32 0.00390625, %v6554_v20 }
 0x482   : > { %3965 = vrsqrt.f32 %v6026_v62  ;;  %v2675_v1 = vmul.f32 %v3956_v40, %v6547_v17  ;;  %v2674_v34 = vmul.f32 %v3956_v40, %v6548_v7  ;;  %v2314_v13 = vmul.f32 0.00390625, %v6026_v62 }
 0x483   : > { %v2492_v10 = vsel %vm2491_vm6, %v5984_v59, %v2490_v31  ;;  %3967 = vrcp.f32 %v2598_v36  ;;  %v1341_v59 = vmul.f32 0.00390625, %v6549_v32  ;;  %vm2512_vm12 = vcmp.eq.f32.partialorder %v6026_v62, inf }
 0x484   : > { %v3958_v6 = vpop.eup %3957  ;;  %v2495_v53 = vsel %vm2493_vm7, %v2494_v54, %v2492_v10  ;;  %2886 = vmatprep.mubr.f32.mxu0 %v2675_v1  ;;  %vm2514_vm13 = vcmp.eq.f32.partialorder %v6026_v62, 0.0  ;;  %v6555_v10 = vld [vmem:[#allocation24_spill] sm:$0xff]  ;;  %v6556_v1 = vld [vmem:[#allocation25_spill] sm:$0xff] }
 0x485   : > { %v3960_v27 = vpop.eup %3959  ;;  %v2497_v0 = vmul.f32 %v3958_v6, %v5998_v5  ;;  %v6040_v58 = vpop.xlane.xlu0 %2266  ;;  %v2599_v33 = vadd.f32 0.0001, %v2495_v53  ;;  %2887 = vmatmul.mubr.f32.gmra.mrb[94].mxu0 %v2674_v34  ;;  %v6050_v44 = vadd.f32 %v2314_v13, %v1341_v59  ;;  %v6557_v59 = vld [vmem:[#allocation39_spill] sm:$0xff] }
 0x486   : > { %3969 = vrsqrt.f32 %v6040_v58  ;;  %v2677_v28 = vmul.f32 %v3960_v27, %v6550_v37  ;;  %v2676_v14 = vmul.f32 %v3960_v27, %v6551_v48  ;;  %vm2519_vm14 = vcmp.eq.f32.partialorder %v6040_v58, inf  ;;  %v6558_v37 = vld [vmem:[#allocation26_spill] sm:$0xff]  ;;  %v6559_v48 = vld [vmem:[#allocation27_spill] sm:$0xff] }
 0x487   : > { %v2499_v9 = vsel %vm2498_vm8, %v5998_v5, %v2497_v0  ;;  %3971 = vrcp.f32 %v2599_v33  ;;  %v2508_v5 = vand.u32 2147483648, %v6012_v30  ;;  %vm2521_vm15 = vcmp.eq.f32.partialorder %v6040_v58, 0.0 }
 0x488   : > { %v3962_v23 = vpop.eup %3961  ;;  %v2502_v3 = vsel %vm2500_vm9, %v2501_v63, %v2499_v9  ;;  %2891 = vmatprep.mubr.f32.mxu0 %v2677_v28  ;;  %v2522_v63 = vand.u32 2147483648, %v6040_v58 }
 0x489   : > { %v3964_v43 = vpop.eup %3963  ;;  %v2504_v22 = vmul.f32 %v3962_v23, %v6012_v30  ;;  %v6053_v2 = vpop.xlane.xlu1 %2269  ;;  %v2600_v4 = vadd.f32 0.0001, %v2502_v3  ;;  %2892 = vmatmul.mubr.f32.gmra.mrb[96].mxu0 %v2676_v14 }
 0x48a   : > { %3973 = vrsqrt.f32 %v6053_v2  ;;  %v2679_v61 = vmul.f32 %v3964_v43, %v6552_v49  ;;  %v2678_v15 = vmul.f32 %v3964_v43, %v6553_v29  ;;  %v2316_v11 = vmul.f32 0.00390625, %v6053_v2 }
 0x48b   : > { %v2506_v19 = vsel %vm2505_vm10, %v6012_v30, %v2504_v22  ;;  %3975 = vrcp.f32 %v2600_v4  ;;  %v2515_v30 = vand.u32 2147483648, %v6026_v62  ;;  %vm2526_vm0 = vcmp.eq.f32.partialorder %v6053_v2, inf }
 0x48c   : > { %v3966_v46 = vpop.eup %3965  ;;  %v2509_v57 = vsel %vm2507_vm11, %v2508_v5, %v2506_v19  ;;  %2896 = vmatprep.mubr.f32.mxu0 %v2679_v61  ;;  %v6074_v53 = vadd.f32 %v2316_v11, %v1343_v12  ;;  %v6560_v61 = vld [vmem:[#allocation40_spill] sm:$0xff]  ;;  %vm2528_vm1 = vcmp.eq.f32.partialorder %v6053_v2, 0.0 }
 0x48d   : > { %v3968_v18 = vpop.eup %3967  ;;  %v2511_v40 = vmul.f32 %v3966_v46, %v6026_v62  ;;  %v6064_v31 = vpop.xlane.xlu1 %2272  ;;  %v2601_v36 = vadd.f32 0.0001, %v2509_v57  ;;  %2897 = vmatmul.mubr.f32.gmra.mrb[98].mxu0 %v2678_v15  ;;  %v1345_v29 = vmul.f32 0.00390625, %v6560_v61  ;;  %v2529_v15 = vand.u32 2147483648, %v6053_v2  ;;  %v6561_v57 = vld [vmem:[#allocation28_spill] sm:$0xff] }
 0x48e   : > { %3977 = vrsqrt.f32 %v6064_v31  ;;  %v2681_v17 = vmul.f32 %v3968_v18, %v6555_v10  ;;  %v2680_v7 = vmul.f32 %v3968_v18, %v6556_v1  ;;  %v2317_v13 = vmul.f32 0.00390625, %v6064_v31  ;;  %v6562_v18 = vld [vmem:[#allocation29_spill] sm:$0xff] }
 0x48f   : > { %v2513_v54 = vsel %vm2512_vm12, %v6026_v62, %v2511_v40  ;;  %3979 = vrcp.f32 %v2601_v36  ;;  %v1344_v62 = vmul.f32 0.00390625, %v6557_v59  ;;  %vm2533_vm2 = vcmp.eq.f32.partialorder %v6064_v31, inf }
 0x490   : > { %v3970_v34 = vpop.eup %3969  ;;  %v2516_v6 = vsel %vm2514_vm13, %v2515_v30, %v2513_v54  ;;  %2901 = vmatprep.mubr.f32.mxu0 %v2681_v17  ;;  %vm2535_vm3 = vcmp.eq.f32.partialorder %v6064_v31, 0.0 }
 0x491   : > { %v3972_v27 = vpop.eup %3971  ;;  %v2518_v0 = vmul.f32 %v3970_v34, %v6040_v58  ;;  %v6078_v33 = vpop.xlane.xlu1 %2275  ;;  %v2602_v32 = vadd.f32 0.0001, %v2516_v6  ;;  %2902 = vmatmul.mubr.f32.gmra.mrb[100].mxu0 %v2680_v7  ;;  %v6088_v43 = vadd.f32 %v2317_v13, %v1344_v62  ;;  %v6563_v7 = vld [vmem:[#allocation41_spill] sm:$0xff]  ;;  %v2536_v34 = vand.u32 2147483648, %v6064_v31 }
 0x492   : > { %3981 = vrsqrt.f32 %v6078_v33  ;;  %v2683_v28 = vmul.f32 %v3972_v27, %v6558_v37  ;;  %v2682_v14 = vmul.f32 %v3972_v27, %v6559_v48  ;;  %v2318_v22 = vmul.f32 0.00390625, %v6078_v33  ;;  %v6564_v13 = vld [vmem:[#allocation45_spill] sm:$0xff] }
 0x493   : > { %v2520_v9 = vsel %vm2519_vm14, %v6040_v58, %v2518_v0  ;;  %3983 = vrcp.f32 %v2602_v32  ;;  %v6565_v0 = vld [vmem:[#allocation12_spill] sm:$0xff]  ;;  %vm2540_vm4 = vcmp.eq.f32.partialorder %v6078_v33, inf  ;;  %vm2542_vm5 = vcmp.eq.f32.partialorder %v6078_v33, 0.0 }
 0x494   : > { %v3974_v23 = vpop.eup %3973  ;;  %v2523_v3 = vsel %vm2521_vm15, %v2522_v63, %v2520_v9  ;;  %2906 = vmatprep.mubr.f32.mxu0 %v2683_v28  ;;  %v6102_v12 = vadd.f32 %v2318_v22, %v1345_v29 }
 0x495   : > { %v3976_v4 = vpop.eup %3975  ;;  %v2525_v5 = vmul.f32 %v3974_v23, %v6053_v2  ;;  %v6092_v19 = vpop.xlane.xlu1 %2278  ;;  %v2603_v49 = vadd.f32 0.0001, %v2523_v3  ;;  %2907 = vmatmul.mubr.f32.gmra.mrb[102].mxu0 %v2682_v14  ;;  %v6566_v23 = vld [vmem:[#allocation42_spill] sm:$0xff]  ;;  %v2543_v3 = vand.u32 2147483648, %v6078_v33 }
 0x496   : > { %3985 = vrsqrt.f32 %v6092_v19  ;;  %v2685_v11 = vmul.f32 %v3976_v4, %v6561_v57  ;;  %v2684_v40 = vmul.f32 %v3976_v4, %v6562_v18  ;;  %v2319_v30 = vmul.f32 0.00390625, %v6092_v19  ;;  %v6567_v4 = vld [vmem:[#allocation47_spill] sm:$0xff] }
 0x497   : > { %v2527_v46 = vsel %vm2526_vm0, %v6053_v2, %v2525_v5  ;;  %3987 = vrcp.f32 %v2603_v49  ;;  %v1346_v2 = vmul.f32 0.00390625, %v6563_v7  ;;  %v6568_v49 = vld [vmem:[#allocation46_spill] sm:$0xff]  ;;  %vm2547_vm6 = vcmp.eq.f32.partialorder %v6092_v19, inf  ;;  %v6571_v7 = vld [vmem:[#allocation48_spill] sm:$0xff] }
 0x498   : > { %v3978_v36 = vpop.eup %3977  ;;  %v2530_v20 = vsel %vm2528_vm1, %v2529_v15, %v2527_v46  ;;  %2911 = vmatprep.mubr.f32.mxu0 %v2685_v11  ;;  %vm2549_vm7 = vcmp.eq.f32.partialorder %v6092_v19, 0.0  ;;  %vm3165_vm0 = vcmask 7168  }
 0x499   : > { %v3980_v54 = vpop.eup %3979  ;;  %v2532_v10 = vmul.f32 %v3978_v36, %v6064_v31  ;;  %v6106_v17 = vpop.xlane.xlu1 %2281  ;;  %v2604_v1 = vadd.f32 0.0001, %v2530_v20  ;;  %2912 = vmatmul.mubr.f32.gmra.mrb[104].mxu0 %v2684_v40  ;;  %v6116_v63 = vadd.f32 %v2319_v30, %v1346_v2  ;;  %v6569_v20 = vld [vmem:[#allocation43_spill] sm:$0xff]  ;;  %v2550_v30 = vand.u32 2147483648, %v6092_v19 }
 0x49a   : > { %3989 = vrsqrt.f32 %v6106_v17  ;;  %v2687_v27 = vmul.f32 %v3980_v54, %v6564_v13  ;;  %v2686_v32 = vmul.f32 %v3980_v54, %v6565_v0  ;;  %v2320_v9 = vmul.f32 0.00390625, %v6106_v17 }
 0x49b   : > { %v2534_v6 = vsel %vm2533_vm2, %v6064_v31, %v2532_v10  ;;  %3991 = vrcp.f32 %v2604_v1  ;;  %v1347_v31 = vmul.f32 0.00390625, %v6566_v23  ;;  %v6570_v10 = vld [vmem:[#allocation49_spill] sm:$0xff]  ;;  %vm2554_vm8 = vcmp.eq.f32.partialorder %v6106_v17, inf }
 0x49c   : > { %v3982_v59 = vpop.eup %3981  ;;  %v2537_v62 = vsel %vm2535_vm3, %v2536_v34, %v2534_v6  ;;  %2916 = vmatprep.mubr.f32.mxu0 %v2687_v27  ;;  %vm2556_vm9 = vcmp.eq.f32.partialorder %v6106_v17, 0.0 }
 0x49d   : > { %v3984_v37 = vpop.eup %3983  ;;  %v2539_v28 = vmul.f32 %v3982_v59, %v6078_v33  ;;  %v6120_v48 = vpop.xlane.xlu1 %2284  ;;  %v2605_v14 = vadd.f32 0.0001, %v2537_v62  ;;  %2917 = vmatmul.mubr.f32.gmra.mrb[106].mxu0 %v2686_v32  ;;  %v6130_v46 = vadd.f32 %v2320_v9, %v1347_v31  ;;  %v6572_v9 = vld [vmem:[#allocation51_spill] sm:$0xff] }
 0x49e   : > { %3993 = vrsqrt.f32 %v6120_v48  ;;  %v2689_v5 = vmul.f32 %v3984_v37, %v6567_v4  ;;  %v2688_v61 = vmul.f32 %v3984_v37, %v6568_v49  ;;  %v2321_v57 = vmul.f32 0.00390625, %v6120_v48  ;;  %v6574_v49 = vld [vmem:[#allocation53_spill] sm:$0xff] }
 0x49f   : > { %v2541_v22 = vsel %vm2540_vm4, %v6078_v33, %v2539_v28  ;;  %3995 = vrcp.f32 %v2605_v14  ;;  %v1348_v33 = vmul.f32 0.00390625, %v6569_v20  ;;  %v6573_v28 = vld [vmem:[#allocation50_spill] sm:$0xff]  ;;  %vm2561_vm10 = vcmp.eq.f32.partialorder %v6120_v48, inf }
 0x4a0   : > { %v3986_v29 = vpop.eup %3985  ;;  %v2544_v15 = vsel %vm2542_vm5, %v2543_v3, %v2541_v22  ;;  %2921 = vmatprep.mubr.f32.mxu0 %v2689_v5  ;;  %v2564_v5 = vand.u32 2147483648, %v6120_v48  ;;  %vm2563_vm11 = vcmp.eq.f32.partialorder %v6120_v48, 0.0 }
 0x4a1   : > { %v3988_v11 = vpop.eup %3987  ;;  %v2546_v18 = vmul.f32 %v3986_v29, %v6092_v19  ;;  %v6134_v40 = vpop.xlane.xlu1 %2287  ;;  %v2606_v36 = vadd.f32 0.0001, %v2544_v15  ;;  %2922 = vmatmul.mubr.f32.gmra.mrb[108].mxu0 %v2688_v61  ;;  %v6144_v13 = vadd.f32 %v2321_v57, %v1348_v33 }
 0x4a2   : > { %3997 = vrsqrt.f32 %v6134_v40  ;;  %v2691_v1 = vmul.f32 %v3988_v11, %v6570_v10  ;;  %v2690_v2 = vmul.f32 %v3988_v11, %v6571_v7  ;;  %vm2568_vm12 = vcmp.eq.f32.partialorder %v6134_v40, inf  ;;  %v6577_v10 = vld [vmem:[#allocation54_spill] sm:$0xff] }
 0x4a3   : > { %v2548_v54 = vsel %vm2547_vm6, %v6092_v19, %v2546_v18  ;;  %3999 = vrcp.f32 %v2606_v36  ;;  %v2557_v19 = vand.u32 2147483648, %v6106_v17  ;;  %v2571_v33 = vand.u32 2147483648, %v6134_v40 }
 0x4a4   : > { %v3990_v34 = vpop.eup %3989  ;;  %v2551_v6 = vsel %vm2549_vm7, %v2550_v30, %v2548_v54  ;;  %2926 = vmatprep.mubr.f32.mxu0 %v2691_v1  ;;  %v6576_v30 = vld [vmem:[#allocation55_spill] sm:$0xff]  ;;  %vm2570_vm13 = vcmp.eq.f32.partialorder %v6134_v40, 0.0 }
 0x4a5   : > { %v3992_v27 = vpop.eup %3991  ;;  %v2553_v0 = vmul.f32 %v3990_v34, %v6106_v17  ;;  %v6147_v32 = vpop.xlane.xlu1 %2290  ;;  %v2607_v59 = vadd.f32 0.0001, %v2551_v6  ;;  %2927 = vmatmul.mubr.f32.gmra.mrb[110].mxu0 %v2690_v2 }
 0x4a6   : > { %4001 = vrsqrt.f32 %v6147_v32  ;;  %v2693_v37 = vmul.f32 %v3992_v27, %v6572_v9  ;;  %v2692_v14 = vmul.f32 %v3992_v27, %v6573_v28  ;;  %vm2575_vm14 = vcmp.eq.f32.partialorder %v6147_v32, inf }
 0x4a7   : > { %v2555_v62 = vsel %vm2554_vm8, %v6106_v17, %v2553_v0  ;;  %4003 = vrcp.f32 %v2607_v59  ;;  %v6575_v17 = vld [vmem:[#allocation52_spill] sm:$0xff]  ;;  %v2578_v0 = vand.u32 2147483648, %v6147_v32  ;;  %v6578_v59 = vld [vmem:[#allocation57_spill] sm:$0xff]  ;;  %vm2577_vm15 = vcmp.eq.f32.partialorder %v6147_v32, 0.0 }
 0x4a8   : > { %v3994_v23 = vpop.eup %3993  ;;  %v2558_v31 = vsel %vm2556_vm9, %v2557_v19, %v2555_v62  ;;  %2931 = vmatprep.mubr.f32.mxu1 %v2693_v37  ;;  %v6579_v62 = vld [vmem:[#allocation56_spill] sm:$0xff] }
 0x4a9   : > { %v3996_v3 = vpop.eup %3995  ;;  %v2560_v22 = vmul.f32 %v3994_v23, %v6120_v48  ;;  %v2608_v4 = vadd.f32 0.0001, %v2558_v31  ;;  %2932 = vmatmul.mubr.f32.vlgmr.msra.gmra.mrb[64].mxu1 %v2692_v14  ;;  %v6580_v31 = vld [vmem:[#allocation59_spill] sm:$0xff] }
 0x4aa   : > { %v2695_v61 = vmul.f32 %v3996_v3, %v6574_v49  ;;  %v2694_v29 = vmul.f32 %v3996_v3, %v6575_v17  ;;  %v6582_v49 = vld [vmem:[#allocation61_spill] sm:$0xff]  ;;  %v6583_v17 = vld [vmem:[#allocation60_spill] sm:$0xff] }
 0x4ab   : > { %v2562_v15 = vsel %vm2561_vm10, %v6120_v48, %v2560_v22  ;;  %4005 = vrcp.f32 %v2608_v4  ;;  %v6581_v22 = vld [vmem:[#allocation58_spill] sm:$0xff] }
 0x4ac   : > { %v3998_v57 = vpop.eup %3997  ;;  %2936 = vmatprep.mubr.f32.mxu1 %v2695_v61  ;;  %v2565_v11 = vsel %vm2563_vm11, %v2564_v5, %v2562_v15 }
 0x4ad   : > { %v4000_v18 = vpop.eup %3999  ;;  %v2567_v36 = vmul.f32 %v3998_v57, %v6134_v40  ;;  %v2609_v20 = vadd.f32 0.0001, %v2565_v11  ;;  %2937 = vmatmul.mubr.f32.gmra.mrb[66].mxu1 %v2694_v29  ;;  %v6584_v57 = vld [vmem:[#allocation63_spill] sm:$0xff] }
 0x4ae   : > { %v2697_v54 = vmul.f32 %v4000_v18, %v6576_v30  ;;  %v2696_v1 = vmul.f32 %v4000_v18, %v6577_v10  ;;  %v6585_v18 = vld [vmem:[#allocation62_spill] sm:$0xff] }
 0x4af   : > { %v2569_v7 = vsel %vm2568_vm12, %v6134_v40, %v2567_v36  ;;  %4007 = vrcp.f32 %v2609_v20 }
 0x4b0   : > { %v4002_v48 = vpop.eup %4001  ;;  %2941 = vmatprep.mubr.f32.mxu1 %v2697_v54  ;;  %v2572_v2 = vsel %vm2570_vm13, %v2571_v33, %v2569_v7  ;;  %v6586_v33 = vld [vmem:[#allocation65_spill] sm:$0xff]  ;;  %v6587_v54 = vld [vmem:[#allocation64_spill] sm:$0xff] }
 0x4b1   : > { %v4004_v34 = vpop.eup %4003  ;;  %v2574_v6 = vmul.f32 %v4002_v48, %v6147_v32  ;;  %v2610_v27 = vadd.f32 0.0001, %v2572_v2  ;;  %2942 = vmatmul.mubr.f32.gmra.mrb[68].mxu1 %v2696_v1  ;;  %v6188_v1 = vld [vmem:[%s6347_s6] ss:$0 sm:$0xff] }
 0x4b2   : > { %v2699_v19 = vmul.f32 %v4004_v34, %v6578_v59  ;;  %v2698_v9 = vmul.f32 %v4004_v34, %v6579_v62 }
 0x4b3   : > { %v2576_v37 = vsel %vm2575_vm14, %v6147_v32, %v2574_v6  ;;  %4009 = vrcp.f32 %v2610_v27 }
 0x4b4   : > { %2946 = vmatprep.mubr.f32.mxu1 %v2699_v19  ;;  %v2579_v28 = vsel %vm2577_vm15, %v2578_v0, %v2576_v37 }
 0x4b5   : > { %v4006_v14 = vpop.eup %4005  ;;  %v2611_v23 = vadd.f32 0.0001, %v2579_v28  ;;  %2947 = vmatmul.mubr.f32.gmra.mrb[70].mxu1 %v2698_v9 }
 0x4b6   : > { %v2701_v3 = vmul.f32 %v4006_v14, %v6580_v31  ;;  %v2700_v4 = vmul.f32 %v4006_v14, %v6581_v22 }
 0x4b7   : > { %4011 = vrcp.f32 %v2611_v23 }
 0x4b8   : > { %2951 = vmatprep.mubr.f32.mxu1 %v2701_v3 }
 0x4b9   : > { %v4008_v5 = vpop.eup %4007  ;;  %2952 = vmatmul.mubr.f32.gmra.mrb[72].mxu1 %v2700_v4 }
 0x4ba   : > { %v2703_v61 = vmul.f32 %v4008_v5, %v6582_v49  ;;  %v2702_v29 = vmul.f32 %v4008_v5, %v6583_v17 }
 0x4bc   : > { %2956 = vmatprep.mubr.f32.mxu1 %v2703_v61 }
 0x4bd   : > { %v4010_v15 = vpop.eup %4009  ;;  %2957 = vmatmul.mubr.f32.gmra.mrb[74].mxu1 %v2702_v29 }
 0x4be   : > { %v2705_v11 = vmul.f32 %v4010_v15, %v6584_v57  ;;  %v2704_v36 = vmul.f32 %v4010_v15, %v6585_v18 }
 0x4c0   : > { %2961 = vmatprep.mubr.f32.mxu1 %v2705_v11 }
 0x4c1   : > { %v4012_v20 = vpop.eup %4011  ;;  %2962 = vmatmul.mubr.f32.gmra.mrb[76].mxu1 %v2704_v36 }
 0x4c2   : > { %v2707_v30 = vmul.f32 %v4012_v20, %v6586_v33  ;;  %v2706_v10 = vmul.f32 %v4012_v20, %v6587_v54 }
 0x4c4   : > { %2966 = vmatprep.mubr.f32.mxu1 %v2707_v30 }
 0x4c5   : > { %2967 = vmatmul.mubr.f32.gmra.mrb[78].mxu1 %v2706_v10 }
 0x51c   : > { %v2813_v7 = vpop.f32.mrb[64].mxu0 }
 0x51d   : > { %v2814_v48 = vadd.f32 %v6188_v1, %v2813_v7  ;;  %v2815_v2 = vpop.f32.mrb[65].mxu0 }
 0x51f   : > { %v2972_v34 = vmax.f32 %v2814_v48, 0.0 }
 0x520   : > { %v2818_v6 = vpop.f32.mrb[66].mxu0 }
 0x521   : > { %v2819_v27 = vadd.f32 %v6188_v1, %v2818_v6  ;;  %v2820_v0 = vpop.f32.mrb[67].mxu0  ;;  %v3004_v59 = vmul.f32 %v2972_v34, %v2972_v34 }
 0x523   : > { %v2973_v19 = vmax.f32 %v2819_v27, 0.0  ;;  %3036 = vadd.xlane.f32.xlu0 %v3004_v59 }
 0x524   : > { %v2823_v62 = vpop.f32.mrb[68].mxu0 }
 0x525   : > { %v2824_v9 = vadd.f32 %v6188_v1, %v2823_v62  ;;  %v2825_v37 = vpop.f32.mrb[69].mxu0  ;;  %v3005_v28 = vmul.f32 %v2973_v19, %v2973_v19 }
 0x527   : > { %v2974_v14 = vmax.f32 %v2824_v9, 0.0  ;;  %3038 = vadd.xlane.f32.xlu1 %v3005_v28 }
 0x528   : > { %v2828_v23 = vpop.f32.mrb[70].mxu0 }
 0x529   : > { %v3006_v31 = vmul.f32 %v2974_v14, %v2974_v14  ;;  %v2829_v3 = vadd.f32 %v6188_v1, %v2828_v23  ;;  %v2830_v22 = vpop.f32.mrb[71].mxu0 }
 0x52b   : > { %v2975_v4 = vmax.f32 %v2829_v3, 0.0  ;;  %3040 = vadd.xlane.f32.xlu0 %v3006_v31 }
 0x52c   : > { %v2833_v5 = vpop.f32.mrb[72].mxu0 }
 0x52d   : > { %v3007_v49 = vmul.f32 %v2975_v4, %v2975_v4  ;;  %v2834_v61 = vadd.f32 %v6188_v1, %v2833_v5  ;;  %v2835_v17 = vpop.f32.mrb[73].mxu0 }
 0x52f   : > { %v2976_v29 = vmax.f32 %v2834_v61, 0.0  ;;  %3042 = vadd.xlane.f32.xlu1 %v3007_v49 }
 0x530   : > { %v2838_v15 = vpop.f32.mrb[74].mxu0 }
 0x531   : > { %v3008_v57 = vmul.f32 %v2976_v29, %v2976_v29  ;;  %v2839_v11 = vadd.f32 %v6188_v1, %v2838_v15  ;;  %v2840_v18 = vpop.f32.mrb[75].mxu0 }
 0x533   : > { %v2977_v36 = vmax.f32 %v2839_v11, 0.0  ;;  %3044 = vadd.xlane.f32.xlu0 %v3008_v57 }
 0x534   : > { %v2843_v20 = vpop.f32.mrb[76].mxu0 }
 0x535   : > { %v3009_v33 = vmul.f32 %v2977_v36, %v2977_v36  ;;  %v2844_v30 = vadd.f32 %v6188_v1, %v2843_v20  ;;  %v2845_v54 = vpop.f32.mrb[77].mxu0 }
 0x537   : > { %v2978_v10 = vmax.f32 %v2844_v30, 0.0  ;;  %3046 = vadd.xlane.f32.xlu1 %v3009_v33 }
 0x538   : > { %v2848_v7 = vpop.f32.mrb[78].mxu0 }
 0x539   : > { %v3010_v48 = vmul.f32 %v2978_v10, %v2978_v10  ;;  %v2849_v2 = vadd.f32 %v6188_v1, %v2848_v7  ;;  %v2850_v34 = vpop.f32.mrb[79].mxu0 }
 0x53b   : > { %v2979_v6 = vmax.f32 %v2849_v2, 0.0  ;;  %3048 = vadd.xlane.f32.xlu0 %v3010_v48 }
 0x53c   : > { %v2853_v27 = vpop.f32.mrb[80].mxu0 }
 0x53d   : > { %v3011_v0 = vmul.f32 %v2979_v6, %v2979_v6  ;;  %v2854_v59 = vadd.f32 %v6188_v1, %v2853_v27  ;;  %v2855_v19 = vpop.f32.mrb[81].mxu0 }
 0x53f   : > { %v2980_v62 = vmax.f32 %v2854_v59, 0.0  ;;  %3050 = vadd.xlane.f32.xlu1 %v3011_v0 }
 0x540   : > { %v2858_v9 = vpop.f32.mrb[82].mxu0 }
 0x541   : > { %v3012_v37 = vmul.f32 %v2980_v62, %v2980_v62  ;;  %v2859_v28 = vadd.f32 %v6188_v1, %v2858_v9  ;;  %v2860_v14 = vpop.f32.mrb[83].mxu0 }
 0x543   : > { %v2981_v23 = vmax.f32 %v2859_v28, 0.0  ;;  %3052 = vadd.xlane.f32.xlu0 %v3012_v37 }
 0x544   : > { %v2863_v31 = vpop.f32.mrb[84].mxu0 }
 0x545   : > { %v3013_v3 = vmul.f32 %v2981_v23, %v2981_v23  ;;  %v2864_v22 = vadd.f32 %v6188_v1, %v2863_v31  ;;  %v2865_v4 = vpop.f32.mrb[85].mxu0 }
 0x547   : > { %v2982_v5 = vmax.f32 %v2864_v22, 0.0  ;;  %3054 = vadd.xlane.f32.xlu1 %v3013_v3 }
 0x548   : > { %v2868_v49 = vpop.f32.mrb[86].mxu0 }
 0x549   : > { %v3014_v61 = vmul.f32 %v2982_v5, %v2982_v5  ;;  %v2869_v17 = vadd.f32 %v6188_v1, %v2868_v49  ;;  %v2870_v29 = vpop.f32.mrb[87].mxu0 }
 0x54b   : > { %v2983_v15 = vmax.f32 %v2869_v17, 0.0  ;;  %3056 = vadd.xlane.f32.xlu0 %v3014_v61 }
 0x54c   : > { %v2873_v57 = vpop.f32.mrb[88].mxu0 }
 0x54d   : > { %v3015_v11 = vmul.f32 %v2983_v15, %v2983_v15  ;;  %v2874_v18 = vadd.f32 %v6188_v1, %v2873_v57  ;;  %v2875_v36 = vpop.f32.mrb[89].mxu0 }
 0x54f   : > { %v2984_v20 = vmax.f32 %v2874_v18, 0.0  ;;  %3058 = vadd.xlane.f32.xlu1 %v3015_v11 }
 0x550   : > { %v2878_v33 = vpop.f32.mrb[90].mxu0 }
 0x551   : > { %v3016_v30 = vmul.f32 %v2984_v20, %v2984_v20  ;;  %v2879_v54 = vadd.f32 %v6188_v1, %v2878_v33  ;;  %v2880_v10 = vpop.f32.mrb[91].mxu0 }
 0x553   : > { %v2985_v7 = vmax.f32 %v2879_v54, 0.0  ;;  %3060 = vadd.xlane.f32.xlu0 %v3016_v30 }
 0x554   : > { %v2883_v48 = vpop.f32.mrb[92].mxu0 }
 0x555   : > { %v3017_v2 = vmul.f32 %v2985_v7, %v2985_v7  ;;  %v2884_v34 = vadd.f32 %v6188_v1, %v2883_v48  ;;  %v2885_v6 = vpop.f32.mrb[93].mxu0 }
 0x557   : > { %v2986_v27 = vmax.f32 %v2884_v34, 0.0  ;;  %3062 = vadd.xlane.f32.xlu1 %v3017_v2 }
 0x558   : > { %v2888_v0 = vpop.f32.mrb[94].mxu0 }
 0x559   : > { %v3018_v59 = vmul.f32 %v2986_v27, %v2986_v27  ;;  %v2889_v19 = vadd.f32 %v6188_v1, %v2888_v0  ;;  %v2890_v62 = vpop.f32.mrb[95].mxu0 }
 0x55b   : > { %v2987_v9 = vmax.f32 %v2889_v19, 0.0  ;;  %3064 = vadd.xlane.f32.xlu0 %v3018_v59 }
 0x55c   : > { %v2893_v37 = vpop.f32.mrb[96].mxu0 }
 0x55d   : > { %v3019_v28 = vmul.f32 %v2987_v9, %v2987_v9  ;;  %v2894_v14 = vadd.f32 %v6188_v1, %v2893_v37  ;;  %v2895_v23 = vpop.f32.mrb[97].mxu0 }
 0x55f   : > { %v2988_v31 = vmax.f32 %v2894_v14, 0.0  ;;  %3066 = vadd.xlane.f32.xlu1 %v3019_v28 }
 0x560   : > { %v2898_v3 = vpop.f32.mrb[98].mxu0 }
 0x561   : > { %v3020_v22 = vmul.f32 %v2988_v31, %v2988_v31  ;;  %v2899_v4 = vadd.f32 %v6188_v1, %v2898_v3  ;;  %v2900_v5 = vpop.f32.mrb[99].mxu0 }
 0x563   : > { %v2989_v49 = vmax.f32 %v2899_v4, 0.0  ;;  %3068 = vadd.xlane.f32.xlu0 %v3020_v22 }
 0x564   : > { %v2903_v61 = vpop.f32.mrb[100].mxu0 }
 0x565   : > { %v3021_v17 = vmul.f32 %v2989_v49, %v2989_v49  ;;  %v2904_v29 = vadd.f32 %v6188_v1, %v2903_v61  ;;  %v2905_v15 = vpop.f32.mrb[101].mxu0 }
 0x567   : > { %v2990_v57 = vmax.f32 %v2904_v29, 0.0  ;;  %3070 = vadd.xlane.f32.xlu1 %v3021_v17 }
 0x568   : > { %v2908_v11 = vpop.f32.mrb[102].mxu0 }
 0x569   : > { %v3022_v18 = vmul.f32 %v2990_v57, %v2990_v57  ;;  %v2909_v36 = vadd.f32 %v6188_v1, %v2908_v11  ;;  %v2910_v20 = vpop.f32.mrb[103].mxu0 }
 0x56b   : > { %v2991_v33 = vmax.f32 %v2909_v36, 0.0  ;;  %3072 = vadd.xlane.f32.xlu0 %v3022_v18 }
 0x56c   : > { %v2913_v30 = vpop.f32.mrb[104].mxu0 }
 0x56d   : > { %v3023_v54 = vmul.f32 %v2991_v33, %v2991_v33  ;;  %v2914_v10 = vadd.f32 %v6188_v1, %v2913_v30  ;;  %v2915_v7 = vpop.f32.mrb[105].mxu0 }
 0x56f   : > { %v2992_v48 = vmax.f32 %v2914_v10, 0.0  ;;  %3074 = vadd.xlane.f32.xlu1 %v3023_v54 }
 0x570   : > { %v2918_v2 = vpop.f32.mrb[106].mxu0 }
 0x571   : > { %v3024_v34 = vmul.f32 %v2992_v48, %v2992_v48  ;;  %v2919_v6 = vadd.f32 %v6188_v1, %v2918_v2  ;;  %v2920_v27 = vpop.f32.mrb[107].mxu0 }
 0x573   : > { %v2993_v0 = vmax.f32 %v2919_v6, 0.0  ;;  %3076 = vadd.xlane.f32.xlu0 %v3024_v34 }
 0x574   : > { %v2923_v59 = vpop.f32.mrb[108].mxu0 }
 0x575   : > { %v3025_v19 = vmul.f32 %v2993_v0, %v2993_v0  ;;  %v2924_v62 = vadd.f32 %v6188_v1, %v2923_v59  ;;  %v2925_v9 = vpop.f32.mrb[109].mxu0 }
 0x577   : > { %v2994_v37 = vmax.f32 %v2924_v62, 0.0  ;;  %3078 = vadd.xlane.f32.xlu1 %v3025_v19 }
 0x578   : > { %v2928_v28 = vpop.f32.mrb[110].mxu0 }
 0x579   : > { %v3026_v14 = vmul.f32 %v2994_v37, %v2994_v37  ;;  %v2929_v23 = vadd.f32 %v6188_v1, %v2928_v28  ;;  %v2930_v31 = vpop.f32.mrb[111].mxu0 }
 0x57b   : > { %v2995_v3 = vmax.f32 %v2929_v23, 0.0  ;;  %3080 = vadd.xlane.f32.xlu0 %v3026_v14 }
 0x57c   : > { %v2933_v22 = vpop.f32.mrb[64].mxu1 }
 0x57d   : > { %v3027_v4 = vmul.f32 %v2995_v3, %v2995_v3  ;;  %v2934_v5 = vadd.f32 %v6188_v1, %v2933_v22  ;;  %v2935_v49 = vpop.f32.mrb[65].mxu1 }
 0x57f   : > { %v2996_v61 = vmax.f32 %v2934_v5, 0.0  ;;  %3082 = vadd.xlane.f32.xlu1 %v3027_v4 }
 0x580   : > { %v2938_v17 = vpop.f32.mrb[66].mxu1 }
 0x581   : > { %v3028_v29 = vmul.f32 %v2996_v61, %v2996_v61  ;;  %v2939_v15 = vadd.f32 %v6188_v1, %v2938_v17  ;;  %v2940_v57 = vpop.f32.mrb[67].mxu1 }
 0x583   : > { %v2997_v11 = vmax.f32 %v2939_v15, 0.0  ;;  %3084 = vadd.xlane.f32.xlu0 %v3028_v29 }
 0x584   : > { %v2943_v18 = vpop.f32.mrb[68].mxu1 }
 0x585   : > { %v3029_v36 = vmul.f32 %v2997_v11, %v2997_v11  ;;  %v2944_v20 = vadd.f32 %v6188_v1, %v2943_v18  ;;  %v2945_v33 = vpop.f32.mrb[69].mxu1 }
 0x587   : > { %v2998_v30 = vmax.f32 %v2944_v20, 0.0  ;;  %3086 = vadd.xlane.f32.xlu1 %v3029_v36  ;;  %v6590_v20 = vld [vmem:[#allocation31_spill] sm:$0xff] }
 0x588   : > { %v2948_v54 = vpop.f32.mrb[70].mxu1 }
 0x589   : > { %v3030_v10 = vmul.f32 %v2998_v30, %v2998_v30  ;;  %v2949_v7 = vadd.f32 %v6188_v1, %v2948_v54  ;;  %v2950_v48 = vpop.f32.mrb[71].mxu1 }
 0x58b   : > { %v2999_v2 = vmax.f32 %v2949_v7, 0.0  ;;  %3088 = vadd.xlane.f32.xlu0 %v3030_v10  ;;  %v6591_v10 = vld [vmem:[#allocation32_spill] sm:$0xff] }
 0x58c   : > { %v2953_v34 = vpop.f32.mrb[72].mxu1 }
 0x58d   : > { %v3031_v6 = vmul.f32 %v2999_v2, %v2999_v2  ;;  %v2954_v27 = vadd.f32 %v6188_v1, %v2953_v34  ;;  %v2955_v0 = vpop.f32.mrb[73].mxu1 }
 0x58f   : > { %v3000_v59 = vmax.f32 %v2954_v27, 0.0  ;;  %3090 = vadd.xlane.f32.xlu1 %v3031_v6 }
 0x590   : > { %v2958_v19 = vpop.f32.mrb[74].mxu1 }
 0x591   : > { %v3032_v62 = vmul.f32 %v3000_v59, %v3000_v59  ;;  %v2959_v9 = vadd.f32 %v6188_v1, %v2958_v19  ;;  %v2960_v37 = vpop.f32.mrb[75].mxu1 }
 0x593   : > { %v3001_v28 = vmax.f32 %v2959_v9, 0.0  ;;  %3092 = vadd.xlane.f32.xlu0 %v3032_v62 }
 0x594   : > { %v2963_v14 = vpop.f32.mrb[76].mxu1 }
 0x595   : > { %v3033_v23 = vmul.f32 %v3001_v28, %v3001_v28  ;;  %v2964_v31 = vadd.f32 %v6188_v1, %v2963_v14  ;;  %v2965_v3 = vpop.f32.mrb[77].mxu1 }
 0x597   : > { %v3002_v22 = vmax.f32 %v2964_v31, 0.0  ;;  %3094 = vadd.xlane.f32.xlu1 %v3033_v23 }
 0x598   : > { %v2968_v4 = vpop.f32.mrb[78].mxu1 }
 0x599   : > { %v3034_v5 = vmul.f32 %v3002_v22, %v3002_v22  ;;  %v2969_v49 = vadd.f32 %v6188_v1, %v2968_v4  ;;  %v2970_v61 = vpop.f32.mrb[79].mxu1  ;;  %v6589_v1 = vld [vmem:[#allocation30_spill] sm:$0xff] }
 0x59b   : > { %v3003_v17 = vmax.f32 %v2969_v49, 0.0  ;;  %3096 = vadd.xlane.f32.xlu0 %v3034_v5 }
 0x59d   : > { %v3035_v29 = vmul.f32 %v3003_v17, %v3003_v17 }
 0x59f   : > { %3098 = vadd.xlane.f32.xlu1 %v3035_v29 }
 0x5b0   : > { %v3037_v15 = vpop.xlane.xlu0 %3036 }
 0x5b1   : > { %v3101_v57 = vmul.f32 0.0078125, %v3037_v15 }
 0x5b3   : > { %v3133_v11 = vadd.f32 %v3101_v57, %v6589_v1 }
 0x5b4   : > { %v3039_v18 = vpop.xlane.xlu1 %3038 }
 0x5b5   : > { %3166 = vst.msk [vmem:[%s6227_s20] sm:$0xff] %vm3165_vm0, %v3133_v11  ;;  %v3102_v36 = vmul.f32 0.0078125, %v3039_v18 }
 0x5b7   : > { %v3134_v33 = vadd.f32 %v3102_v36, %v6590_v20 }
 0x5b8   : > { %v3041_v30 = vpop.xlane.xlu0 %3040 }
 0x5b9   : > { %3167 = vst.msk [vmem:[%s6227_s20 + $0x8] sm:$0xff] %vm3165_vm0, %v3134_v33  ;;  %v3103_v54 = vmul.f32 0.0078125, %v3041_v30 }
 0x5bb   : > { %v3135_v7 = vadd.f32 %v3103_v54, %v6591_v10 }
 0x5bc   : > { %v3043_v48 = vpop.xlane.xlu1 %3042 }
 0x5bd   : > { %3168 = vst.msk [vmem:[%s6227_s20 + $0x10] sm:$0xff] %vm3165_vm0, %v3135_v7  ;;  %v3104_v2 = vmul.f32 0.0078125, %v3043_v48 }
 0x5bf   : > { %v3136_v34 = vadd.f32 %v3104_v2, %v5813_v39 }
 0x5c0   : > { %v3045_v6 = vpop.xlane.xlu0 %3044 }
 0x5c1   : > { %3169 = vst.msk [vmem:[%s6227_s20 + $0x18] sm:$0xff] %vm3165_vm0, %v3136_v34  ;;  %v3105_v27 = vmul.f32 0.0078125, %v3045_v6 }
 0x5c3   : > { %v3137_v0 = vadd.f32 %v3105_v27, %v5816_v26 }
 0x5c4   : > { %v3047_v59 = vpop.xlane.xlu1 %3046 }
 0x5c5   : > { %3170 = vst.msk [vmem:[%s6227_s20 + $0x20] sm:$0xff] %vm3165_vm0, %v3137_v0  ;;  %v3106_v19 = vmul.f32 0.0078125, %v3047_v59 }
 0x5c7   : > { %v3138_v62 = vadd.f32 %v3106_v19, %v5821_v41 }
 0x5c8   : > { %v3049_v9 = vpop.xlane.xlu0 %3048 }
 0x5c9   : > { %3171 = vst.msk [vmem:[%s6227_s20 + $0x28] sm:$0xff] %vm3165_vm0, %v3138_v62  ;;  %v3107_v37 = vmul.f32 0.0078125, %v3049_v9  ;;  %v6592_v9 = vld [vmem:[#allocation37_spill] sm:$0xff] }
 0x5cb   : > { %v3139_v39 = vadd.f32 %v3107_v37, %v5828_v56  ;;  %v1342_v37 = vmul.f32 0.00390625, %v6592_v9 }
 0x5cc   : > { %v3051_v28 = vpop.xlane.xlu1 %3050 }
 0x5cd   : > { %3172 = vst.msk [vmem:[%s6227_s20 + $0x30] sm:$0xff] %vm3165_vm0, %v3139_v39  ;;  %v3108_v14 = vmul.f32 0.0078125, %v3051_v28 }
 0x5cf   : > { %v3140_v26 = vadd.f32 %v3108_v14, %v5840_v38 }
 0x5d0   : > { %v3053_v23 = vpop.xlane.xlu0 %3052 }
 0x5d1   : > { %3173 = vst.msk [vmem:[%s6227_s20 + $0x38] sm:$0xff] %vm3165_vm0, %v3140_v26  ;;  %v3109_v31 = vmul.f32 0.0078125, %v3053_v23 }
 0x5d3   : > { %v3141_v41 = vadd.f32 %v3109_v31, %v5854_v42 }
 0x5d4   : > { %v3055_v3 = vpop.xlane.xlu1 %3054 }
 0x5d5   : > { %3174 = vst.msk [vmem:[%s6227_s20 + $0x40] sm:$0xff] %vm3165_vm0, %v3141_v41  ;;  %v3110_v22 = vmul.f32 0.0078125, %v3055_v3 }
 0x5d7   : > { %v3142_v56 = vadd.f32 %v3110_v22, %v5868_v16 }
 0x5d8   : > { %v3057_v4 = vpop.xlane.xlu0 %3056 }
 0x5d9   : > { %3175 = vst.msk [vmem:[%s6227_s20 + $0x48] sm:$0xff] %vm3165_vm0, %v3142_v56  ;;  %v3111_v5 = vmul.f32 0.0078125, %v3057_v4 }
 0x5db   : > { %v3143_v38 = vadd.f32 %v3111_v5, %v5882_v50 }
 0x5dc   : > { %v3059_v49 = vpop.xlane.xlu1 %3058 }
 0x5dd   : > { %3176 = vst.msk [vmem:[%s6227_s20 + $0x50] sm:$0xff] %vm3165_vm0, %v3143_v38  ;;  %v3112_v61 = vmul.f32 0.0078125, %v3059_v49 }
 0x5df   : > { %v3144_v42 = vadd.f32 %v3112_v61, %v5896_v52 }
 0x5e0   : > { %v3061_v17 = vpop.xlane.xlu0 %3060 }
 0x5e1   : > { %3177 = vst.msk [vmem:[%s6227_s20 + $0x58] sm:$0xff] %vm3165_vm0, %v3144_v42  ;;  %v3113_v29 = vmul.f32 0.0078125, %v3061_v17  ;;  %v6593_v17 = vld [vmem:[#allocation44_spill] sm:$0xff] }
 0x5e3   : > { %v3145_v16 = vadd.f32 %v3113_v29, %v5910_v35  ;;  %v1349_v29 = vmul.f32 0.00390625, %v6593_v17 }
 0x5e4   : > { %v3063_v15 = vpop.xlane.xlu1 %3062 }
 0x5e5   : > { %3178 = vst.msk [vmem:[%s6227_s20 + $0x60] sm:$0xff] %vm3165_vm0, %v3145_v16  ;;  %v3114_v57 = vmul.f32 0.0078125, %v3063_v15 }
 0x5e7   : > { %v3146_v50 = vadd.f32 %v3114_v57, %v5924_v60  ;;  %v2323_v57 = vmul.f32 0.00390625, %v6147_v32 }
 0x5e8   : > { %v3065_v1 = vpop.xlane.xlu0 %3064 }
 0x5e9   : > { %3179 = vst.msk [vmem:[%s6227_s20 + $0x68] sm:$0xff] %vm3165_vm0, %v3146_v50  ;;  %v3115_v11 = vmul.f32 0.0078125, %v3065_v1 }
 0x5eb   : > { %v3147_v52 = vadd.f32 %v3115_v11, %v5938_v25 }
 0x5ec   : > { %v3067_v18 = vpop.xlane.xlu1 %3066 }
 0x5ed   : > { %3180 = vst.msk [vmem:[%s6227_s20 + $0x70] sm:$0xff] %vm3165_vm0, %v3147_v52  ;;  %v3116_v36 = vmul.f32 0.0078125, %v3067_v18 }
 0x5ef   : > { %v3148_v35 = vadd.f32 %v3116_v36, %v5952_v45 }
 0x5f0   : > { %v3069_v20 = vpop.xlane.xlu0 %3068 }
 0x5f1   : > { %3181 = vst.msk [vmem:[%s6227_s20 + $0x78] sm:$0xff] %vm3165_vm0, %v3148_v35  ;;  %v3117_v33 = vmul.f32 0.0078125, %v3069_v20 }
 0x5f3   : > { %v3149_v60 = vadd.f32 %v3117_v33, %v5966_v55 }
 0x5f4   : > { %v3071_v30 = vpop.xlane.xlu1 %3070 }
 0x5f5   : > { %3182 = vst.msk [vmem:[%s6227_s20 + $0x80] sm:$0xff] %vm3165_vm0, %v3149_v60  ;;  %v3118_v54 = vmul.f32 0.0078125, %v3071_v30 }
 0x5f7   : > { %v3150_v25 = vadd.f32 %v3118_v54, %v5980_v8 }
 0x5f8   : > { %v3073_v10 = vpop.xlane.xlu0 %3072 }
 0x5f9   : > { %3183 = vst.msk [vmem:[%s6227_s20 + $0x88] sm:$0xff] %vm3165_vm0, %v3150_v25  ;;  %v3119_v7 = vmul.f32 0.0078125, %v3073_v10 }
 0x5fb   : > { %v3151_v45 = vadd.f32 %v3119_v7, %v5994_v21 }
 0x5fc   : > { %v3075_v48 = vpop.xlane.xlu1 %3074 }
 0x5fd   : > { %3184 = vst.msk [vmem:[%s6227_s20 + $0x90] sm:$0xff] %vm3165_vm0, %v3151_v45  ;;  %v3120_v2 = vmul.f32 0.0078125, %v3075_v48 }
 0x5ff   : > { %v3152_v55 = vadd.f32 %v3120_v2, %v6008_v47  ;;  %v2315_v47 = vmul.f32 0.00390625, %v6040_v58 }
 0x600   : > { %v3077_v34 = vpop.xlane.xlu0 %3076 }
 0x601   : > { %3185 = vst.msk [vmem:[%s6227_s20 + $0x98] sm:$0xff] %vm3165_vm0, %v3152_v55  ;;  %v3121_v6 = vmul.f32 0.0078125, %v3077_v34  ;;  %v2347_v39 = vadd.f32 %v2315_v47, %v1342_v37 }
 0x603   : > { %v3153_v8 = vadd.f32 %v3121_v6, %v6022_v51 }
 0x604   : > { %v3079_v27 = vpop.xlane.xlu1 %3078 }
 0x605   : > { %3186 = vst.msk [vmem:[%s6227_s20 + $0xa0] sm:$0xff] %vm3165_vm0, %v3153_v8  ;;  %v3122_v0 = vmul.f32 0.0078125, %v3079_v27 }
 0x607   : > { %v3154_v21 = vadd.f32 %v3122_v0, %v6036_v24 }
 0x608   : > { %v3081_v59 = vpop.xlane.xlu0 %3080 }
 0x609   : > { %3187 = vst.msk [vmem:[%s6227_s20 + $0xa8] sm:$0xff] %vm3165_vm0, %v3154_v21  ;;  %v3123_v19 = vmul.f32 0.0078125, %v3081_v59 }
 0x60b   : > { %v3155_v62 = vadd.f32 %v3123_v19, %v6050_v44 }
 0x60c   : > { %v3083_v51 = vpop.xlane.xlu1 %3082 }
 0x60d   : > { %3188 = vst.msk [vmem:[%s6227_s20 + $0xb0] sm:$0xff] %vm3165_vm0, %v3155_v62  ;;  %v3124_v28 = vmul.f32 0.0078125, %v3083_v51 }
 0x60f   : > { %v3156_v14 = vadd.f32 %v3124_v28, %v2347_v39 }
 0x610   : > { %v3085_v24 = vpop.xlane.xlu0 %3084 }
 0x611   : > { %3189 = vst.msk [vmem:[%s6227_s20 + $0xb8] sm:$0xff] %vm3165_vm0, %v3156_v14  ;;  %v3125_v26 = vmul.f32 0.0078125, %v3085_v24 }
 0x613   : > { %v3157_v23 = vadd.f32 %v3125_v26, %v6074_v53 }
 0x614   : > { %v3087_v58 = vpop.xlane.xlu1 %3086 }
 0x615   : > { %3190 = vst.msk [vmem:[%s6227_s20 + $0xc0] sm:$0xff] %vm3165_vm0, %v3157_v23  ;;  %v3126_v44 = vmul.f32 0.0078125, %v3087_v58 }
 0x617   : > { %v3158_v31 = vadd.f32 %v3126_v44, %v6088_v43 }
 0x618   : > { %v3089_v41 = vpop.xlane.xlu0 %3088 }
 0x619   : > { %3191 = vst.msk [vmem:[%s6227_s20 + $0xc8] sm:$0xff] %vm3165_vm0, %v3158_v31  ;;  %v3127_v3 = vmul.f32 0.0078125, %v3089_v41 }
 0x61b   : > { %v3159_v22 = vadd.f32 %v3127_v3, %v6102_v12  ;;  %v2322_v12 = vmul.f32 0.00390625, %v6134_v40 }
 0x61c   : > { %v3091_v56 = vpop.xlane.xlu1 %3090 }
 0x61d   : > { %3192 = vst.msk [vmem:[%s6227_s20 + $0xd0] sm:$0xff] %vm3165_vm0, %v3159_v22  ;;  %v3128_v4 = vmul.f32 0.0078125, %v3091_v56 }
 0x61f   : > { %v3160_v53 = vadd.f32 %v3128_v4, %v6116_v63  ;;  %v2354_v63 = vadd.f32 %v2322_v12, %v1349_v29 }
 0x620   : > { %v3093_v5 = vpop.xlane.xlu0 %3092 }
 0x621   : > { %3193 = vst.msk [vmem:[%s6227_s20 + $0xd8] sm:$0xff] %vm3165_vm0, %v3160_v53  ;;  %v3129_v38 = vmul.f32 0.0078125, %v3093_v5 }
 0x623   : > { %v3161_v43 = vadd.f32 %v3129_v38, %v6130_v46  ;;  %v6594_v46 = vld [vmem:[#allocation13_spill] sm:$0xff] }
 0x624   : > { %v3095_v49 = vpop.xlane.xlu1 %3094  ;;  %v1350_v1 = vmul.f32 0.00390625, %v6594_v46 }
 0x625   : > { %3194 = vst.msk [vmem:[%s6227_s20 + $0xe0] sm:$0xff] %vm3165_vm0, %v3161_v43  ;;  %v3130_v61 = vmul.f32 0.0078125, %v3095_v49 }
 0x626   : > { %v2355_v52 = vadd.f32 %v2323_v57, %v1350_v1 }
 0x627   : > { %v3162_v42 = vadd.f32 %v3130_v61, %v6144_v13 }
 0x628   : > { %v3097_v16 = vpop.xlane.xlu0 %3096 }
 0x629   : > { %3195 = vst.msk [vmem:[%s6227_s20 + $0xe8] sm:$0xff] %vm3165_vm0, %v3162_v42  ;;  %v3131_v15 = vmul.f32 0.0078125, %v3097_v16 }
 0x62b   : > { %v3163_v50 = vadd.f32 %v3131_v15, %v2354_v63 }
 0x62c   : > { %v3099_v11 = vpop.xlane.xlu1 %3098 }
 0x62d   : > { %3196 = vst.msk [vmem:[%s6227_s20 + $0xf0] sm:$0xff] %vm3165_vm0, %v3163_v50  ;;  %v3132_v18 = vmul.f32 0.0078125, %v3099_v11 }
 0x62f   : > { %v3164_v40 = vadd.f32 %v3132_v18, %v2355_v52 }
 0x631   : > { %3197 = vst.msk [vmem:[%s6227_s20 + $0xf8] sm:$0xff] %vm3165_vm0, %v3164_v40 }
 0x632 PF: > { %p19_p6 = scmp.ge.s32.totalorder %s4318_s17, 4   ;;  %s6595_s24 = smov %s4161_s25 }
 0x633   : > { %s6596_s25 = smov %s4165_s26  ;;  %s6597_s26 = smov %s4346_s11 }
 0x634   : > { %s6598_s27 = smov %s4318_s17  ;;  %21 = sbr.rel (!%p19_p6) target bundleno = 5 (0x5), region = 100 }
 0x63b   :  { %3220 = vsyncpa [#allocation3], 1 }
 0x63c   :  { %3222 = vsyncpa [#allocation3 + $0x1], 1 }
 0x63d   :  { %3223 = vsyncpa [#allocation5], 1 }
 0x63e   :  { %3224 = vsyncpa [#allocation8], 1 }

</bundles_post_ra>
